<compile_context>
chip_gen: v7x
topology: tpu7x:2x2x1
jax: 0.10.0
libtpu: 0.0.40
codegen_flags: <defaults>
</compile_context>

<pallas_src>
import functools

import jax
import jax.numpy as jnp
from jax.experimental import pallas as pl
from jax.experimental.pallas import tpu as pltpu


# ----------------------------------------------------------------------------
# helpers
# ----------------------------------------------------------------------------
def _round_up(a, b):
    return ((a + b - 1) // b) * b


def _sublane(dtype):
    # sublane tile height for a dtype (8 for 32-bit, 16 for bf16, ...)
    return max(8, 32 // jnp.dtype(dtype).itemsize)


def _padded_vmem_bytes(shape, dtype):
    """VMEM bytes of ONE buffer holding `shape`, incl. lane/sublane padding."""
    shape = tuple(int(s) for s in shape)
    if len(shape) == 1:
        shape = (1,) + shape
    lead = 1
    for s in shape[:-2]:
        lead *= s
    rows = _round_up(shape[-2], _sublane(dtype))
    cols = _round_up(shape[-1], 128)
    return lead * rows * cols * jnp.dtype(dtype).itemsize


def _vmem_capacity_bytes():
    try:
        info = pltpu.get_tpu_info()
        cap = int(getattr(info, "vmem_capacity_bytes", 0) or 0)
        if cap > 0:
            return cap
    except Exception:
        pass
    return 64 * 1024 * 1024  # v7x-safe lower bound


def _is_multi_tensorcore():
    # Only v7x has 2 TensorCores per chip; used to gate a grid-split heuristic.
    try:
        kind = jax.devices()[0].device_kind.lower()
    except Exception:
        return False
    return "v7" in kind


# ----------------------------------------------------------------------------
# shared epilogue: h/g split at a 128-lane boundary, activation, sigmoid gate
# ----------------------------------------------------------------------------
def _gate_epilogue(hg, coutp, activation, approx_sigmoid):
    """hg: [M, 2*coutp] f32, h in lanes [0, coutp), g in lanes [coutp, 2*coutp)."""
    h = hg[:, :coutp]          # vreg-boundary slices (coutp is a multiple of 128)
    g = hg[:, coutp:]
    if activation == "relu":
        h = jnp.maximum(h, 0.0)
    elif activation == "tanh":
        h = jnp.tanh(h)
    elif activation is not None:
        raise NotImplementedError(f"activation={activation!r}")
    if approx_sigmoid:
        # 1 / (1 + exp(-g)) with the divide on the EUP slot (approx reciprocal).
        sig = pl.reciprocal(1.0 + jnp.exp(-g), approx=True)
    else:
        sig = jax.nn.sigmoid(g)
    return h * sig


# ----------------------------------------------------------------------------
# fast path: implicit GEMM (stride == 1), grid over batch images
# ----------------------------------------------------------------------------
def _gated_conv_direct_kernel(x_ref, w_ref, b_ref, o_ref, *,
                              k_size, dilation, h_out, w_out,
                              cout, coutp, activation, approx_sigmoid):
    # x_ref : [Hp, Wp, Cin]        padded input image (compute dtype)
    # w_ref : [K*K, Cin, 2*Coutp]  per-tap fused (h | g) weights
    # b_ref : [1, 2*Coutp]         fused bias (f32)
    # o_ref : [Hout*Wout, Cout]    gated output for this image
    m = h_out * w_out
    acc = jnp.zeros((m, 2 * coutp), jnp.float32)
    for kh in range(k_size):
        for kw in range(k_size):
            tap = kh * k_size + kw
            patch = x_ref[kh * dilation: kh * dilation + h_out,
                          kw * dilation: kw * dilation + w_out, :]
            patch = patch.reshape(m, patch.shape[-1])
            acc = acc + jnp.dot(patch, w_ref[tap],
                                preferred_element_type=jnp.float32)
    hg = acc + b_ref[...].astype(jnp.float32)
    gated = _gate_epilogue(hg, coutp, activation, approx_sigmoid)
    o_ref[...] = gated[:, :cout].astype(o_ref.dtype)


# ----------------------------------------------------------------------------
# fallback: im2col + fused GEMM (general stride / very large images)
# ----------------------------------------------------------------------------
def _gated_conv_im2col_kernel(p_ref, w_ref, b_ref, o_ref, *,
                              cout, coutp, activation, approx_sigmoid):
    # p_ref : [tm, Cin*K*K], w_ref : [Cin*K*K, 2*Coutp], b_ref : [1, 2*Coutp]
    hg = jnp.dot(p_ref[...], w_ref[...], preferred_element_type=jnp.float32)
    hg = hg + b_ref[...].astype(jnp.float32)
    gated = _gate_epilogue(hg, coutp, activation, approx_sigmoid)
    o_ref[...] = gated[:, :cout].astype(o_ref.dtype)


def _im2col_nchw(x, kernel_size, stride, padding, dilation):
    """x: [N, Cin, H, W] -> patches [N*Hout*Wout, Cin*K*K], plus (Hout, Wout)."""
    N, Cin, H, W = x.shape
    K = kernel_size
    x_pad = jnp.pad(x, ((0, 0), (0, 0), (padding, padding), (padding, padding)))
    H_out = (H + 2 * padding - dilation * (K - 1) - 1) // stride + 1
    W_out = (W + 2 * padding - dilation * (K - 1) - 1) // stride + 1

    cols = []
    for kh in range(K):
        for kw in range(K):
            h0 = kh * dilation
            w0 = kw * dilation
            sl = x_pad[:, :,
                       h0:h0 + stride * (H_out - 1) + 1:stride,
                       w0:w0 + stride * (W_out - 1) + 1:stride]  # [N,Cin,Hout,Wout]
            cols.append(sl)
    patches = jnp.stack(cols, axis=2)                        # [N,Cin,K*K,Hout,Wout]
    patches = jnp.transpose(patches, (0, 3, 4, 1, 2))        # [N,Hout,Wout,Cin,K*K]
    patches = patches.reshape(N * H_out * W_out, Cin * K * K)
    return patches, H_out, W_out


# ----------------------------------------------------------------------------
# fused-weight builders (each branch padded to its own 128-lane block)
# ----------------------------------------------------------------------------
def _fused_bias(b_h, b_g, coutp):
    cout = b_h.shape[0]
    pad = coutp - cout
    z = jnp.zeros((pad,), b_h.dtype)
    return jnp.concatenate([b_h, z, b_g, z]).reshape(1, 2 * coutp).astype(jnp.float32)


def _fused_tap_weights(w_h, w_g, b_h, b_g, coutp, compute_dtype):
    """[K*K, Cin, 2*Coutp] per-tap weights for the implicit-GEMM path."""
    cout, cin, k, _ = w_h.shape

    def taps(w):
        w = jnp.transpose(w, (2, 3, 1, 0)).reshape(k * k, cin, cout)  # (kh,kw,ci,co)
        pad = coutp - cout
        if pad:
            w = jnp.concatenate([w, jnp.zeros((k * k, cin, pad), w.dtype)], axis=-1)
        return w

    w_taps = jnp.concatenate([taps(w_h), taps(w_g)], axis=-1).astype(compute_dtype)
    return w_taps, _fused_bias(b_h, b_g, coutp)


def _fused_flat_weights(w_h, w_g, b_h, b_g, coutp, compute_dtype):
    """[Cin*K*K, 2*Coutp] fused weights matching the im2col (ci, kh, kw) layout."""
    cout, cin, k, _ = w_h.shape
    ckk = cin * k * k

    def flat(w):
        w = w.reshape(cout, ckk).T                       # [CKK, Cout]
        pad = coutp - cout
        if pad:
            w = jnp.concatenate([w, jnp.zeros((ckk, pad), w.dtype)], axis=-1)
        return w

    w_fused = jnp.concatenate([flat(w_h), flat(w_g)], axis=-1).astype(compute_dtype)
    return w_fused, _fused_bias(b_h, b_g, coutp)


# ----------------------------------------------------------------------------
# public wrapper
# ----------------------------------------------------------------------------
def gated_conv2d(x, w_h, b_h, w_g, b_g, *, stride=1, padding=1, dilation=1,
                 activation=None, approx_sigmoid=True,
                 compute_dtype=jnp.bfloat16, out_dtype=None,
                 tm=1024, force_im2col=False):
    """Forward pass of GatedConv2d: act(conv_h(x)) * sigmoid(conv_g(x)).

    x   : [N, Cin, H, W]     (NCHW, like PyTorch)
    w_* : [Cout, Cin, K, K]
    b_* : [Cout]
    activation: None | "relu" | "tanh"  (static)
    returns [N, Cout, Hout, Wout]
    """
    N, Cin, H, W = x.shape
    Cout, Cin_w, K, K2 = w_h.shape
    assert Cin_w == Cin and K == K2 and w_g.shape == w_h.shape
    out_dtype = x.dtype if out_dtype is None else out_dtype

    H_out = (H + 2 * padding - dilation * (K - 1) - 1) // stride + 1
    W_out = (W + 2 * padding - dilation * (K - 1) - 1) // stride + 1
    Coutp = _round_up(Cout, 128)     # each branch on its own 128-lane block(s)

    cap = _vmem_capacity_bytes()
    budget = int(min(0.55 * cap, 48 * 1024 * 1024))

    # ------------------- fast path: implicit GEMM (stride == 1) -------------------
    Hp, Wp = H + 2 * padding, W + 2 * padding
    hw = H_out * W_out
    direct_bytes = (
        2 * _padded_vmem_bytes((Hp, Wp, Cin), compute_dtype)            # x (double buf)
        + _padded_vmem_bytes((K * K, Cin, 2 * Coutp), compute_dtype)    # weights (single)
        + _padded_vmem_bytes((1, 2 * Coutp), jnp.float32)               # bias
        + 2 * _padded_vmem_bytes((hw, Cout), out_dtype)                 # out (double buf)
        + 3 * _padded_vmem_bytes((hw, 2 * Coutp), jnp.float32)          # f32 acc + temps
        + 2 * _padded_vmem_bytes((hw, Cin), compute_dtype))             # per-tap patch
    use_direct = (stride == 1) and (not force_im2col) and direct_bytes <= budget

    if use_direct:
        x_pad = jnp.pad(jnp.transpose(x, (0, 2, 3, 1)).astype(compute_dtype),
                        ((0, 0), (padding, padding), (padding, padding), (0, 0)))
        w_taps, b_fused = _fused_tap_weights(w_h, w_g, b_h, b_g, Coutp, compute_dtype)
        vmem_limit = int(min(0.75 * cap,
                             max(2 * direct_bytes + (8 << 20), 32 << 20)))
        kernel = functools.partial(
            _gated_conv_direct_kernel, k_size=K, dilation=dilation,
            h_out=H_out, w_out=W_out, cout=Cout, coutp=Coutp,
            activation=activation, approx_sigmoid=approx_sigmoid)
        out = pl.pallas_call(
            kernel,
            out_shape=jax.ShapeDtypeStruct((N, hw, Cout), out_dtype),
            grid_spec=pltpu.PrefetchScalarGridSpec(
                num_scalar_prefetch=0,
                grid=(N,),
                in_specs=[
                    pl.BlockSpec((None, Hp, Wp, Cin), lambda n: (n, 0, 0, 0)),
                    pl.BlockSpec((K * K, Cin, 2 * Coutp), lambda n: (0, 0, 0),
                                 pipeline_mode=pl.Buffered(1)),
                    pl.BlockSpec((1, 2 * Coutp), lambda n: (0, 0),
                                 pipeline_mode=pl.Buffered(1)),
                ],
                out_specs=pl.BlockSpec((None, hw, Cout), lambda n: (n, 0, 0)),
            ),
            compiler_params=pltpu.CompilerParams(
                dimension_semantics=("parallel",),
                vmem_limit_bytes=vmem_limit),
        )(x_pad, w_taps, b_fused)
        out = out.reshape(N, H_out, W_out, Cout)
        return jnp.transpose(out, (0, 3, 1, 2))

    # ----------- fallback: im2col + fused GEMM (stride != 1, huge images) -----------
    patches, H_out, W_out = _im2col_nchw(x.astype(compute_dtype), K, stride,
                                         padding, dilation)
    M, CKK = patches.shape
    w_fused, b_fused = _fused_flat_weights(w_h, w_g, b_h, b_g, Coutp, compute_dtype)

    row_align = _sublane(compute_dtype)          # 16 for bf16, 8 for f32
    tm = max(row_align, min(_round_up(tm, row_align), _round_up(M, row_align)))
    if _is_multi_tensorcore() and tm >= M and M >= 256:
        # >=2 grid steps so both v7x TensorCores get work; skipped on 1-TC chips.
        tm = _round_up(pl.cdiv(M, 2), row_align)

    def tile_bytes(t):
        return (2 * _padded_vmem_bytes((t, CKK), compute_dtype)
                + _padded_vmem_bytes((CKK, 2 * Coutp), compute_dtype)
                + _padded_vmem_bytes((1, 2 * Coutp), jnp.float32)
                + 2 * _padded_vmem_bytes((t, Cout), out_dtype)
                + 3 * _padded_vmem_bytes((t, 2 * Coutp), jnp.float32))

    while tm > 128 and tile_bytes(tm) > budget:
        tm = max(128, _round_up(tm // 2, row_align))
    vmem_limit = int(min(0.75 * cap, max(2 * tile_bytes(tm) + (8 << 20), 32 << 20)))

    kernel = functools.partial(_gated_conv_im2col_kernel, cout=Cout, coutp=Coutp,
                               activation=activation, approx_sigmoid=approx_sigmoid)
    out = pl.pallas_call(
        kernel,
        out_shape=jax.ShapeDtypeStruct((M, Cout), out_dtype),
        grid_spec=pltpu.PrefetchScalarGridSpec(
            num_scalar_prefetch=0,
            grid=(pl.cdiv(M, tm),),          # ragged last tile -> block masking
            in_specs=[
                pl.BlockSpec((tm, CKK), lambda i: (i, 0)),
                pl.BlockSpec((CKK, 2 * Coutp), lambda i: (0, 0),
                             pipeline_mode=pl.Buffered(1)),
                pl.BlockSpec((1, 2 * Coutp), lambda i: (0, 0),
                             pipeline_mode=pl.Buffered(1)),
            ],
            out_specs=pl.BlockSpec((tm, Cout), lambda i: (i, 0)),
        ),
        compiler_params=pltpu.CompilerParams(
            dimension_semantics=("parallel",),
            vmem_limit_bytes=vmem_limit),
    )(patches, w_fused, b_fused)
    out = out.reshape(N, H_out, W_out, Cout)
    return jnp.transpose(out, (0, 3, 1, 2))


# ----------------------------------------------------------------------------
# pure-JAX reference (lax conv) for correctness checks
# ----------------------------------------------------------------------------
def _reference(x, w_h, b_h, w_g, b_g, *, stride, padding, dilation=1, activation=None):
    dn = jax.lax.conv_dimension_numbers(x.shape, w_h.shape, ("NCHW", "OIHW", "NCHW"))

    def conv(w, b):
        y = jax.lax.conv_general_dilated(
            x, w, window_strides=(stride, stride),
            padding=[(padding, padding), (padding, padding)],
            rhs_dilation=(dilation, dilation), dimension_numbers=dn)
        return y + b.reshape(1, -1, 1, 1)

    h = conv(w_h, b_h)
    if activation == "relu":
        h = jnp.maximum(h, 0.0)
    elif activation == "tanh":
        h = jnp.tanh(h)
    g = jax.nn.sigmoid(conv(w_g, b_g))
    return h * g


if __name__ == "__main__":
    key = jax.random.PRNGKey(0)
    k_x, k_wh, k_bh, k_wg, k_bg = jax.random.split(key, 5)

    # GatedConv2d(input_channels=4, output_channels=8, kernel_size=3,
    #             stride=1, padding=1, activation=None)
    N, Cin, H, W = 2, 4, 16, 16
    Cout, K = 8, 3

    x = jax.random.normal(k_x, (N, Cin, H, W), dtype=jnp.float32)
    fan_in = Cin * K * K
    scale = 1.0 / (fan_in ** 0.5)   # PyTorch Conv2d default init scale
    w_h = jax.random.uniform(k_wh, (Cout, Cin, K, K), jnp.float32, -scale, scale)
    b_h = jax.random.uniform(k_bh, (Cout,), jnp.float32, -scale, scale)
    w_g = jax.random.uniform(k_wg, (Cout, Cin, K, K), jnp.float32, -scale, scale)
    b_g = jax.random.uniform(k_bg, (Cout,), jnp.float32, -scale, scale)

    def check(out, ref, atol, rtol, tag):
        assert out.shape == ref.shape, (tag, out.shape, ref.shape)
        err = float(jnp.max(jnp.abs(out - ref)))
        assert jnp.allclose(out, ref, atol=atol, rtol=rtol), (tag, err)

    # 1) default fast path: implicit GEMM, bf16 MXU inputs, f32 accumulate/gate,
    #    approx (EUP) sigmoid.
    out = jax.block_until_ready(
        gated_conv2d(x, w_h, b_h, w_g, b_g, stride=1, padding=1, activation=None))
    ref = _reference(x, w_h, b_h, w_g, b_g, stride=1, padding=1, activation=None)
    check(out, ref, 3e-2, 3e-2, "bf16-direct")

    # 2) exact-structure check: f32 compute, exact sigmoid (tight tolerance).
    out32 = jax.block_until_ready(
        gated_conv2d(x, w_h, b_h, w_g, b_g, stride=1, padding=1, activation=None,
                     compute_dtype=jnp.float32, approx_sigmoid=False))
    check(out32, ref, 1e-4, 1e-4, "f32-direct")

    # 3) stride 2 + relu: exercises the im2col fallback path.
    out_r = jax.block_until_ready(
        gated_conv2d(x, w_h, b_h, w_g, b_g, stride=2, padding=1, activation="relu",
                     compute_dtype=jnp.float32, approx_sigmoid=False))
    ref_r = _reference(x, w_h, b_h, w_g, b_g, stride=2, padding=1, activation="relu")
    check(out_r, ref_r, 1e-4, 1e-4, "f32-im2col-s2-relu")

    # 4) tanh + approx sigmoid on the fast path.
    out_t = jax.block_until_ready(
        gated_conv2d(x, w_h, b_h, w_g, b_g, stride=1, padding=1, activation="tanh",
                     compute_dtype=jnp.float32))
    ref_t = _reference(x, w_h, b_h, w_g, b_g, stride=1, padding=1, activation="tanh")
    check(out_t, ref_t, 2e-2, 2e-2, "f32-direct-tanh-approx")

    # 5) dilation = 2 on the fast path (tap-offset / halo arithmetic).
    out_d = jax.block_until_ready(
        gated_conv2d(x, w_h, b_h, w_g, b_g, stride=1, padding=2, dilation=2,
                     activation=None, compute_dtype=jnp.float32,
                     approx_sigmoid=False))
    ref_d = _reference(x, w_h, b_h, w_g, b_g, stride=1, padding=2, dilation=2,
                       activation=None)
    check(out_d, ref_d, 1e-4, 1e-4, "f32-direct-dil2")

    # 6) force the im2col path at stride 1 (covers both kernels on the same problem).
    out_f = jax.block_until_ready(
        gated_conv2d(x, w_h, b_h, w_g, b_g, stride=1, padding=1, activation=None,
                     compute_dtype=jnp.float32, approx_sigmoid=False,
                     force_im2col=True))
    check(out_f, ref, 1e-4, 1e-4, "f32-im2col-forced")

    print("KERNEL_OK")
</pallas_src>

<mosaic_0001>
module attributes {stable_mosaic.version = 11 : i64} {
  func.func @_gated_conv_direct_kernel(%arg0: i32, %arg1: memref<1x18x18x4xbf16, #tpu.memory_space<vmem>>, %arg2: memref<9x4x256xbf16, #tpu.memory_space<vmem>>, %arg3: memref<1x256xf32, #tpu.memory_space<vmem>>, %arg4: memref<1x256x8xf32, #tpu.memory_space<vmem>>) attributes {dimension_semantics = [#tpu.dimension_semantics<parallel>], iteration_bounds = array<i64: 2>, scalar_prefetch = 0 : i64, scratch_operands = 0 : i64, tpu.core_type = #tpu.core_type<tc>, window_params = [{transform_indices = @transform_0, window_bounds = array<i64: 1, 18, 18, 4>}, {pipeline_mode = #tpu.pipeline_mode<synchronous>, transform_indices = @transform_1, window_bounds = array<i64: 9, 4, 256>}, {pipeline_mode = #tpu.pipeline_mode<synchronous>, transform_indices = @transform_2, window_bounds = array<i64: 1, 256>}, {transform_indices = @transform_3, window_bounds = array<i64: 1, 256, 8>}]} {
    %cst = arith.constant 0.000000e+00 : f32
    %0 = vector.broadcast %cst : f32 to vector<256x256xf32>
    %c0 = arith.constant 0 : index
    %c0_0 = arith.constant 0 : index
    %c0_1 = arith.constant 0 : index
    %c0_2 = arith.constant 0 : index
    %1 = vector.load %arg1[%c0, %c0_0, %c0_1, %c0_2] : memref<1x18x18x4xbf16, #tpu.memory_space<vmem>>, vector<1x16x16x4xbf16>
    %2 = vector.shape_cast %1 : vector<1x16x16x4xbf16> to vector<16x16x4xbf16>
    %3 = vector.shape_cast %2 : vector<16x16x4xbf16> to vector<256x4xbf16>
    %c0_3 = arith.constant 0 : index
    %c0_4 = arith.constant 0 : index
    %c0_5 = arith.constant 0 : index
    %4 = vector.load %arg2[%c0_3, %c0_4, %c0_5] : memref<9x4x256xbf16, #tpu.memory_space<vmem>>, vector<1x4x256xbf16>
    %5 = vector.shape_cast %4 : vector<1x4x256xbf16> to vector<4x256xbf16>
    %cst_6 = arith.constant dense<0.000000e+00> : vector<256x256xf32>
    %6 = tpu.matmul %3, %5, %cst_6 {dimension_numbers = #tpu.dot_dimension_numbers<[1], [0], [0], [1], [0, 0, 1, 1], [], []>} : vector<256x4xbf16>, vector<4x256xbf16>, vector<256x256xf32> -> vector<256x256xf32>
    %7 = arith.addf %0, %6 : vector<256x256xf32>
    %c0_7 = arith.constant 0 : index
    %c0_8 = arith.constant 0 : index
    %c1 = arith.constant 1 : index
    %c0_9 = arith.constant 0 : index
    %8 = vector.load %arg1[%c0_7, %c0_8, %c1, %c0_9] : memref<1x18x18x4xbf16, #tpu.memory_space<vmem>>, vector<1x16x16x4xbf16>
    %9 = vector.shape_cast %8 : vector<1x16x16x4xbf16> to vector<16x16x4xbf16>
    %10 = vector.shape_cast %9 : vector<16x16x4xbf16> to vector<256x4xbf16>
    %c1_10 = arith.constant 1 : index
    %c0_11 = arith.constant 0 : index
    %c0_12 = arith.constant 0 : index
    %11 = vector.load %arg2[%c1_10, %c0_11, %c0_12] : memref<9x4x256xbf16, #tpu.memory_space<vmem>>, vector<1x4x256xbf16>
    %12 = vector.shape_cast %11 : vector<1x4x256xbf16> to vector<4x256xbf16>
    %cst_13 = arith.constant dense<0.000000e+00> : vector<256x256xf32>
    %13 = tpu.matmul %10, %12, %cst_13 {dimension_numbers = #tpu.dot_dimension_numbers<[1], [0], [0], [1], [0, 0, 1, 1], [], []>} : vector<256x4xbf16>, vector<4x256xbf16>, vector<256x256xf32> -> vector<256x256xf32>
    %14 = arith.addf %7, %13 : vector<256x256xf32>
    %c0_14 = arith.constant 0 : index
    %c0_15 = arith.constant 0 : index
    %c2 = arith.constant 2 : index
    %c0_16 = arith.constant 0 : index
    %15 = vector.load %arg1[%c0_14, %c0_15, %c2, %c0_16] : memref<1x18x18x4xbf16, #tpu.memory_space<vmem>>, vector<1x16x16x4xbf16>
    %16 = vector.shape_cast %15 : vector<1x16x16x4xbf16> to vector<16x16x4xbf16>
    %17 = vector.shape_cast %16 : vector<16x16x4xbf16> to vector<256x4xbf16>
    %c2_17 = arith.constant 2 : index
    %c0_18 = arith.constant 0 : index
    %c0_19 = arith.constant 0 : index
    %18 = vector.load %arg2[%c2_17, %c0_18, %c0_19] : memref<9x4x256xbf16, #tpu.memory_space<vmem>>, vector<1x4x256xbf16>
    %19 = vector.shape_cast %18 : vector<1x4x256xbf16> to vector<4x256xbf16>
    %cst_20 = arith.constant dense<0.000000e+00> : vector<256x256xf32>
    %20 = tpu.matmul %17, %19, %cst_20 {dimension_numbers = #tpu.dot_dimension_numbers<[1], [0], [0], [1], [0, 0, 1, 1], [], []>} : vector<256x4xbf16>, vector<4x256xbf16>, vector<256x256xf32> -> vector<256x256xf32>
    %21 = arith.addf %14, %20 : vector<256x256xf32>
    %c0_21 = arith.constant 0 : index
    %c1_22 = arith.constant 1 : index
    %c0_23 = arith.constant 0 : index
    %c0_24 = arith.constant 0 : index
    %22 = vector.load %arg1[%c0_21, %c1_22, %c0_23, %c0_24] : memref<1x18x18x4xbf16, #tpu.memory_space<vmem>>, vector<1x16x16x4xbf16>
    %23 = vector.shape_cast %22 : vector<1x16x16x4xbf16> to vector<16x16x4xbf16>
    %24 = vector.shape_cast %23 : vector<16x16x4xbf16> to vector<256x4xbf16>
    %c3 = arith.constant 3 : index
    %c0_25 = arith.constant 0 : index
    %c0_26 = arith.constant 0 : index
    %25 = vector.load %arg2[%c3, %c0_25, %c0_26] : memref<9x4x256xbf16, #tpu.memory_space<vmem>>, vector<1x4x256xbf16>
    %26 = vector.shape_cast %25 : vector<1x4x256xbf16> to vector<4x256xbf16>
    %cst_27 = arith.constant dense<0.000000e+00> : vector<256x256xf32>
    %27 = tpu.matmul %24, %26, %cst_27 {dimension_numbers = #tpu.dot_dimension_numbers<[1], [0], [0], [1], [0, 0, 1, 1], [], []>} : vector<256x4xbf16>, vector<4x256xbf16>, vector<256x256xf32> -> vector<256x256xf32>
    %28 = arith.addf %21, %27 : vector<256x256xf32>
    %c0_28 = arith.constant 0 : index
    %c1_29 = arith.constant 1 : index
    %c1_30 = arith.constant 1 : index
    %c0_31 = arith.constant 0 : index
    %29 = vector.load %arg1[%c0_28, %c1_29, %c1_30, %c0_31] : memref<1x18x18x4xbf16, #tpu.memory_space<vmem>>, vector<1x16x16x4xbf16>
    %30 = vector.shape_cast %29 : vector<1x16x16x4xbf16> to vector<16x16x4xbf16>
    %31 = vector.shape_cast %30 : vector<16x16x4xbf16> to vector<256x4xbf16>
    %c4 = arith.constant 4 : index
    %c0_32 = arith.constant 0 : index
    %c0_33 = arith.constant 0 : index
    %32 = vector.load %arg2[%c4, %c0_32, %c0_33] : memref<9x4x256xbf16, #tpu.memory_space<vmem>>, vector<1x4x256xbf16>
    %33 = vector.shape_cast %32 : vector<1x4x256xbf16> to vector<4x256xbf16>
    %cst_34 = arith.constant dense<0.000000e+00> : vector<256x256xf32>
    %34 = tpu.matmul %31, %33, %cst_34 {dimension_numbers = #tpu.dot_dimension_numbers<[1], [0], [0], [1], [0, 0, 1, 1], [], []>} : vector<256x4xbf16>, vector<4x256xbf16>, vector<256x256xf32> -> vector<256x256xf32>
    %35 = arith.addf %28, %34 : vector<256x256xf32>
    %c0_35 = arith.constant 0 : index
    %c1_36 = arith.constant 1 : index
    %c2_37 = arith.constant 2 : index
    %c0_38 = arith.constant 0 : index
    %36 = vector.load %arg1[%c0_35, %c1_36, %c2_37, %c0_38] : memref<1x18x18x4xbf16, #tpu.memory_space<vmem>>, vector<1x16x16x4xbf16>
    %37 = vector.shape_cast %36 : vector<1x16x16x4xbf16> to vector<16x16x4xbf16>
    %38 = vector.shape_cast %37 : vector<16x16x4xbf16> to vector<256x4xbf16>
    %c5 = arith.constant 5 : index
    %c0_39 = arith.constant 0 : index
    %c0_40 = arith.constant 0 : index
    %39 = vector.load %arg2[%c5, %c0_39, %c0_40] : memref<9x4x256xbf16, #tpu.memory_space<vmem>>, vector<1x4x256xbf16>
    %40 = vector.shape_cast %39 : vector<1x4x256xbf16> to vector<4x256xbf16>
    %cst_41 = arith.constant dense<0.000000e+00> : vector<256x256xf32>
    %41 = tpu.matmul %38, %40, %cst_41 {dimension_numbers = #tpu.dot_dimension_numbers<[1], [0], [0], [1], [0, 0, 1, 1], [], []>} : vector<256x4xbf16>, vector<4x256xbf16>, vector<256x256xf32> -> vector<256x256xf32>
    %42 = arith.addf %35, %41 : vector<256x256xf32>
    %c0_42 = arith.constant 0 : index
    %c2_43 = arith.constant 2 : index
    %c0_44 = arith.constant 0 : index
    %c0_45 = arith.constant 0 : index
    %43 = vector.load %arg1[%c0_42, %c2_43, %c0_44, %c0_45] : memref<1x18x18x4xbf16, #tpu.memory_space<vmem>>, vector<1x16x16x4xbf16>
    %44 = vector.shape_cast %43 : vector<1x16x16x4xbf16> to vector<16x16x4xbf16>
    %45 = vector.shape_cast %44 : vector<16x16x4xbf16> to vector<256x4xbf16>
    %c6 = arith.constant 6 : index
    %c0_46 = arith.constant 0 : index
    %c0_47 = arith.constant 0 : index
    %46 = vector.load %arg2[%c6, %c0_46, %c0_47] : memref<9x4x256xbf16, #tpu.memory_space<vmem>>, vector<1x4x256xbf16>
    %47 = vector.shape_cast %46 : vector<1x4x256xbf16> to vector<4x256xbf16>
    %cst_48 = arith.constant dense<0.000000e+00> : vector<256x256xf32>
    %48 = tpu.matmul %45, %47, %cst_48 {dimension_numbers = #tpu.dot_dimension_numbers<[1], [0], [0], [1], [0, 0, 1, 1], [], []>} : vector<256x4xbf16>, vector<4x256xbf16>, vector<256x256xf32> -> vector<256x256xf32>
    %49 = arith.addf %42, %48 : vector<256x256xf32>
    %c0_49 = arith.constant 0 : index
    %c2_50 = arith.constant 2 : index
    %c1_51 = arith.constant 1 : index
    %c0_52 = arith.constant 0 : index
    %50 = vector.load %arg1[%c0_49, %c2_50, %c1_51, %c0_52] : memref<1x18x18x4xbf16, #tpu.memory_space<vmem>>, vector<1x16x16x4xbf16>
    %51 = vector.shape_cast %50 : vector<1x16x16x4xbf16> to vector<16x16x4xbf16>
    %52 = vector.shape_cast %51 : vector<16x16x4xbf16> to vector<256x4xbf16>
    %c7 = arith.constant 7 : index
    %c0_53 = arith.constant 0 : index
    %c0_54 = arith.constant 0 : index
    %53 = vector.load %arg2[%c7, %c0_53, %c0_54] : memref<9x4x256xbf16, #tpu.memory_space<vmem>>, vector<1x4x256xbf16>
    %54 = vector.shape_cast %53 : vector<1x4x256xbf16> to vector<4x256xbf16>
    %cst_55 = arith.constant dense<0.000000e+00> : vector<256x256xf32>
    %55 = tpu.matmul %52, %54, %cst_55 {dimension_numbers = #tpu.dot_dimension_numbers<[1], [0], [0], [1], [0, 0, 1, 1], [], []>} : vector<256x4xbf16>, vector<4x256xbf16>, vector<256x256xf32> -> vector<256x256xf32>
    %56 = arith.addf %49, %55 : vector<256x256xf32>
    %c0_56 = arith.constant 0 : index
    %c2_57 = arith.constant 2 : index
    %c2_58 = arith.constant 2 : index
    %c0_59 = arith.constant 0 : index
    %57 = vector.load %arg1[%c0_56, %c2_57, %c2_58, %c0_59] : memref<1x18x18x4xbf16, #tpu.memory_space<vmem>>, vector<1x16x16x4xbf16>
    %58 = vector.shape_cast %57 : vector<1x16x16x4xbf16> to vector<16x16x4xbf16>
    %59 = vector.shape_cast %58 : vector<16x16x4xbf16> to vector<256x4xbf16>
    %c8 = arith.constant 8 : index
    %c0_60 = arith.constant 0 : index
    %c0_61 = arith.constant 0 : index
    %60 = vector.load %arg2[%c8, %c0_60, %c0_61] : memref<9x4x256xbf16, #tpu.memory_space<vmem>>, vector<1x4x256xbf16>
    %61 = vector.shape_cast %60 : vector<1x4x256xbf16> to vector<4x256xbf16>
    %cst_62 = arith.constant dense<0.000000e+00> : vector<256x256xf32>
    %62 = tpu.matmul %59, %61, %cst_62 {dimension_numbers = #tpu.dot_dimension_numbers<[1], [0], [0], [1], [0, 0, 1, 1], [], []>} : vector<256x4xbf16>, vector<4x256xbf16>, vector<256x256xf32> -> vector<256x256xf32>
    %63 = arith.addf %56, %62 : vector<256x256xf32>
    %c0_63 = arith.constant 0 : index
    %c0_64 = arith.constant 0 : index
    %64 = vector.load %arg3[%c0_63, %c0_64] : memref<1x256xf32, #tpu.memory_space<vmem>>, vector<1x256xf32>
    %65 = vector.broadcast %64 : vector<1x256xf32> to vector<256x256xf32>
    %66 = arith.addf %63, %65 : vector<256x256xf32>
    %67 = vector.extract_strided_slice %66 {offsets = [0, 0], sizes = [256, 128], strides = [1, 1]} : vector<256x256xf32> to vector<256x128xf32>
    %68 = vector.extract_strided_slice %66 {offsets = [0, 128], sizes = [256, 128], strides = [1, 1]} : vector<256x256xf32> to vector<256x128xf32>
    %cst_65 = arith.constant 0.000000e+00 : f32
    %69 = vector.broadcast %cst_65 : f32 to vector<256x128xf32>
    %70 = arith.subf %69, %68 : vector<256x128xf32>
    %71 = math.exp %70 : vector<256x128xf32>
    %cst_66 = arith.constant 1.000000e+00 : f32
    %72 = vector.broadcast %cst_66 : f32 to vector<256x128xf32>
    %73 = arith.addf %72, %71 : vector<256x128xf32>
    %74 = tpu.reciprocal %73 {approx = true} : vector<256x128xf32> -> vector<256x128xf32>
    %75 = arith.mulf %67, %74 : vector<256x128xf32>
    %76 = vector.extract_strided_slice %75 {offsets = [0, 0], sizes = [256, 8], strides = [1, 1]} : vector<256x128xf32> to vector<256x8xf32>
    %c0_67 = arith.constant 0 : index
    %c0_68 = arith.constant 0 : index
    %c0_69 = arith.constant 0 : index
    %77 = vector.load %arg4[%c0_67, %c0_68, %c0_69] : memref<1x256x8xf32, #tpu.memory_space<vmem>>, vector<1x256x8xf32>
    %78 = vector.shape_cast %77 : vector<1x256x8xf32> to vector<256x8xf32>
    %79 = vector.shape_cast %76 : vector<256x8xf32> to vector<1x256x8xf32>
    tpu.vector_store %arg4[%c0_67, %c0_68, %c0_69], %79 {strides = array<i32>} : memref<1x256x8xf32, #tpu.memory_space<vmem>>, vector<1x256x8xf32>,
    return
  }
  func.func @transform_0(%arg0: i32) -> (i32, i32, i32, i32) {
    %c0_i32 = arith.constant 0 : i32
    %c0_i32_0 = arith.constant 0 : i32
    %c0_i32_1 = arith.constant 0 : i32
    %c0_i32_2 = arith.constant 0 : i32
    return %arg0, %c0_i32, %c0_i32_0, %c0_i32_1 : i32, i32, i32, i32
  }
  func.func @transform_1(%arg0: i32) -> (i32, i32, i32) {
    %c0_i32 = arith.constant 0 : i32
    %c0_i32_0 = arith.constant 0 : i32
    %c0_i32_1 = arith.constant 0 : i32
    %c0_i32_2 = arith.constant 0 : i32
    return %c0_i32, %c0_i32_0, %c0_i32_1 : i32, i32, i32
  }
  func.func @transform_2(%arg0: i32) -> (i32, i32) {
    %c0_i32 = arith.constant 0 : i32
    %c0_i32_0 = arith.constant 0 : i32
    %c0_i32_1 = arith.constant 0 : i32
    return %c0_i32, %c0_i32_0 : i32, i32
  }
  func.func @transform_3(%arg0: i32) -> (i32, i32, i32) {
    %c0_i32 = arith.constant 0 : i32
    %c0_i32_0 = arith.constant 0 : i32
    %c0_i32_1 = arith.constant 0 : i32
    return %arg0, %c0_i32, %c0_i32_0 : i32, i32, i32
  }
}

</mosaic_0001>

<bundles_post_ra>
// kernel: tpu_custom_call.1
= control target key start
LH: loop header
LB: loop body
LE: loop exit
PB: predicated region body
PF: predicated region fallthrough
CT: control target
= control target key end

     0   :  { %s7193_s12 = smov 0   ;;  %s8780_s0 = inlined_call_operand.vmem [shape: bf16[2,18,18,4], index: 0, kind: input, shape index: {}]   ;;  %s8781_s1 = inlined_call_operand.vmem [shape: bf16[9,4,256], index: 1, kind: input, shape index: {}]   ;;  %s8782_s2 = inlined_call_operand.vmem [shape: f32[1,256], index: 2, kind: input, shape index: {}]   ;;  %s8783_s3 = inlined_call_operand.vmem [shape: f32[2,256,8], index: 3, kind: output, shape index: {}]  }
   0x1 LB: > { %s5819_s13 = sadd.s32 4294967295, %s7170_s12   ;;  %p5823_p0 = scmp.ge.s32.totalorder %s7170_s12, 1  ;;  %s7170_s12 = sphi %s7193_s12, %s13_s12  }
   0x2   : > { %p137_p1 = scmp.lt.s32.totalorder %s7170_s12, 3 }
   0x4   : > { %p138_p2 = pnand %p5823_p0, %p137_p1 }
   0x5   : > { %v5844_v0 = vld.sshfl [vmem:[%s8781_s1 + $0x4] sm:$0x33 pattern:$0x76325410] (!%p138_p2)  ;;  %vm716_vm0 = vcmask (!%p138_p2), 1041408   ;;  %v7172_v4 = vmov (!%p138_p2), 0  }
   0x6   : > { %141 = sbr.rel (%p138_p2) target bundleno = 854 (0x356), region = 32  ;;  %v666_v1 = vcombine.high (!%p138_p2), %v5844_v0, %v5844_v0  ;;  %v6079_v2 = vld.sshfl [vmem:[%s8781_s1 + $0x10] sm:$0x33 pattern:$0x76325410] (!%p138_p2)  ;;  %v718_v3 = vsel (!%p138_p2), %vm716_vm0, %v5844_v0, 0  ;;  %755 = vmatprep.mubr.bf16.mxu1 (!%p138_p2), %v7172_v4  ;;  %2845 = vmatprep.mubr.bf16.mxu0 (!%p138_p2), %v7172_v4 }
   0x7   : > { %p161_p3 = scmp.lt.s32.totalorder (!%p138_p2), %s5819_s13, 1  ;;  %v7210_v5 = vcombine.high (!%p138_p2), %v6079_v2, %v6079_v2  ;;  %v7213_v6 = vsel (!%p138_p2), %vm716_vm0, %v6079_v2, 0  ;;  %v5878_v7 = vld.sshfl [vmem:[%s8781_s1] sm:$0x33 pattern:$0x76325410] (!%p138_p2) }
   0x8   : > { %5845 = vmatprep.subr.msk.bf16.mxu1 (!%p138_p2), %vm716_vm0, %v666_v1  ;;  %v1004_v8 = vcombine.high (!%p138_p2), %v5878_v7, %v5878_v7  ;;  %v6178_v9 = vld.sshfl [vmem:[%s8781_s1 + $0x14] sm:$0x33 pattern:$0x76325410] (!%p138_p2)  ;;  %v7231_v11 = vsel (!%p138_p2), %vm716_vm0, %v5878_v7, 0  ;;  %vm667_vm3 = vcmask (!%p138_p2), 31744  }
   0x9   : > { %6080 = vmatprep.subr.msk.bf16.mxu0 (!%p138_p2), %vm716_vm0, %v7210_v5  ;;  %724 = vmatpush1.bf16.msra.mxu1 (!%p138_p2), %v718_v3  ;;  %v3336_v10 = vcombine.high (!%p138_p2), %v6178_v9, %v6178_v9  ;;  %v7236_v12 = vld.sshfl [vmem:[%s8781_s1 + $0x18] sm:$0x33 pattern:$0x76325410] (!%p138_p2)  ;;  %vm221_vm1 = vsmask.f32 (!%p138_p2), 3328 }
   0xa   : > { %2814 = vmatpush1.bf16.msra.mxu0 (!%p138_p2), %v7213_v6  ;;  %5879 = vmatprep.subr.msk.bf16.mxu1 (!%p138_p2), %vm716_vm0, %v1004_v8  ;;  %vm222_vm2 = vsmask.f32 (!%p138_p2), 7440  ;;  %v7244_v13 = vsel (!%p138_p2), %vm716_vm0, %v6178_v9, 0  ;;  %v7248_v14 = vsel (!%p138_p2), %vm716_vm0, %v7236_v12, 0  ;;  %v3771_v27 = vcombine.high (!%p138_p2), %v7236_v12, %v7236_v12 }
   0xb   : > { %6179 = vmatprep.subr.msk.bf16.mxu0 (!%p138_p2), %vm716_vm0, %v3336_v10  ;;  %vm7262_vm4 = vmor (!%p138_p2), %vm221_vm1, %vm222_vm2  ;;  %vm1348_vm5 = vcmask (!%p138_p2), 1042432   ;;  %vm1349_vm6 = vcmask (!%p138_p2), 1046532   ;;  %vm5731_vm8 = vcmask (!%p138_p2), 64512  }
   0xc   : > { %vm7421_vm7 = vmor (!%p138_p2), %vm1348_vm5, %vm1349_vm6 }
   0xd   : > { %s8789_s13 = smov (!%p161_p3, %s5819_s13), 1 }
   0xe   : > { %s6962_s22 = smul.u32 216, %s8789_s13  ;;  %s6447_s11 = sshll.u32 %s8789_s13, 8 }
   0xf   : > { %s8564_s16 = scalar_lea.vmem %s8783_s3, %s6447_s11 }
  0x10   : > { %s7241_s27 = scalar_lea.vmem %s8780_s0, %s6962_s22 }
  0x11   : > { %v172_v15 = vld [vmem:[%s7241_s27] sm:$0xf]  ;;  %v173_v16 = vld [vmem:[%s7241_s27 + $0x4] sm:$0xf]  ;;  %v205_v17 = vld [vmem:[%s7241_s27 + $0x8] sm:$0x1] }
  0x12   : > { %v225_v18 = vshrl.u32 %v172_v15, 16  ;;  %v228_v19 = vshll.u32 %v172_v15, 16  ;;  %v234_v20 = vshll.u32 %v173_v16, 16  ;;  %v238_v21 = vshrl.u32 %v173_v16, 16  ;;  %v6014_v22 = vld [vmem:[%s7241_s27 + $0xc] sm:$0xf] }
  0x13   : > { %v244_v23 = vshll.u32 %v205_v17, 16  ;;  %v6015_v24 = vld [vmem:[%s7241_s27 + $0x10] sm:$0xf]  ;;  %v6016_v25 = vld [vmem:[%s7241_s27 + $0x14] sm:$0x1]  ;;  %v2317_v26 = vshrl.u32 %v6014_v22, 16 }
  0x14   : > { %v227_v28 = vrot.slane %v225_v18, 4  ;;  %v230_v29 = vrot.slane %v228_v19, 5  ;;  %v236_v30 = vrot.slane %v234_v20, 5  ;;  %v240_v31 = vrot.slane %v238_v21, 4  ;;  %v174_v32 = vld [vmem:[%s7241_s27 + $0xc] sm:$0xf] }
  0x15   : > { %v246_v33 = vrot.slane %v244_v23, 5  ;;  %v2319_v34 = vrot.slane %v2317_v26, 4  ;;  %v2320_v35 = vshll.u32 %v6014_v22, 16  ;;  %v2326_v36 = vshll.u32 %v6015_v24, 16  ;;  %v175_v41 = vld [vmem:[%s7241_s27 + $0x10] sm:$0xf] }
  0x16   : > { %v231_v37 = vor.u32 %v230_v29, %v227_v28  ;;  %v241_v38 = vor.u32 %v240_v31, %v236_v30  ;;  %v2330_v39 = vshrl.u32 %v6015_v24, 16  ;;  %v2336_v40 = vshll.u32 %v6016_v25, 16  ;;  %v206_v51 = vld [vmem:[%s7241_s27 + $0x14] sm:$0x1]  ;;  %v6017_v56 = vld [vmem:[%s7241_s27 + $0x18] sm:$0xf] }
  0x17   : > { %v2322_v43 = vrot.slane %v2320_v35, 5  ;;  %v2328_v44 = vrot.slane %v2326_v36, 5  ;;  %v249_v45 = vshrl.u32 %v174_v32, 16  ;;  %v252_v46 = vshll.u32 %v174_v32, 16  ;;  %v6018_v61 = vld [vmem:[%s7241_s27 + $0x1c] sm:$0xf] }
  0x18   : > { %v232_v47 = vrot.slane %v231_v37, 4  ;;  %v242_v48 = vrot.slane %v241_v38, 4  ;;  %v2332_v49 = vrot.slane %v2330_v39, 4  ;;  %v2338_v50 = vrot.slane %v2336_v40, 5  ;;  %v6019_v8 = vld [vmem:[%s7241_s27 + $0x20] sm:$0x1] }
  0x19   : > { %v2323_v52 = vor.u32 %v2322_v43, %v2319_v34  ;;  %v251_v53 = vrot.slane %v249_v45, 4  ;;  %v254_v54 = vrot.slane %v252_v46, 5  ;;  %v258_v55 = vshll.u32 %v175_v41, 16  ;;  %v176_v18 = vld [vmem:[%s7241_s27 + $0x18] sm:$0xf] }
  0x1a   : > { %v237_v57 = vsel %vm7262_vm4, %v232_v47, %v236_v30  ;;  %v247_v58 = vsel %vm7262_vm4, %v242_v48, %v246_v33  ;;  %v2333_v59 = vor.u32 %v2332_v49, %v2328_v44  ;;  %v262_v60 = vshrl.u32 %v175_v41, 16  ;;  %v177_v23 = vld [vmem:[%s7241_s27 + $0x1c] sm:$0xf]  ;;  %v207_v31 = vld [vmem:[%s7241_s27 + $0x20] sm:$0x1] }
  0x1b   : > { %v5828_v62 = vcombine.low %v237_v57, %v247_v58  ;;  %v2324_v63 = vrot.slane %v2323_v52, 4  ;;  %v255_v0 = vor.u32 %v254_v54, %v251_v53  ;;  %v260_v1 = vrot.slane %v258_v55, 5  ;;  %v6020_v37 = vld [vmem:[%s7241_s27 + $0x24] sm:$0xf]  ;;  %v6021_v43 = vld [vmem:[%s7241_s27 + $0x28] sm:$0xf] }
  0x1c   : > { %v2334_v2 = vrot.slane %v2333_v59, 4  ;;  %v264_v3 = vrot.slane %v262_v60, 4  ;;  %v268_v7 = vshll.u32 %v206_v51, 16  ;;  %v2341_v9 = vshrl.u32 %v6017_v56, 16  ;;  %v6022_v53 = vld [vmem:[%s7241_s27 + $0x2c] sm:$0x1] }
  0x1d   : > { %5846 = vmatmul.mubr.msk.bf16.vlgmr.msra.gmra.mrb[0].mxu1 %vm667_vm3, %v5828_v62  ;;  %v2329_v10 = vsel %vm7262_vm4, %v2324_v63, %v2328_v44  ;;  %v256_v15 = vrot.slane %v255_v0, 4  ;;  %v2344_v16 = vshll.u32 %v6017_v56, 16  ;;  %v2350_v17 = vshll.u32 %v6018_v61, 16  ;;  %v178_v56 = vld [vmem:[%s7241_s27 + $0x24] sm:$0xf] }
  0x1e   : > { %1060 = vmatpush1.bf16.msra.mxu1 %v7231_v11  ;;  %v2339_v19 = vsel %vm7262_vm4, %v2334_v2, %v2338_v50  ;;  %765 = vmatprep.mubr.bf16.mxu1 %v7172_v4  ;;  %v265_v20 = vor.u32 %v264_v3, %v260_v1  ;;  %v270_v21 = vrot.slane %v268_v7, 5  ;;  %v2343_v22 = vrot.slane %v2341_v9, 4  ;;  %v179_v2 = vld [vmem:[%s7241_s27 + $0x28] sm:$0xf] }
  0x1f   : > { %v6063_v24 = vcombine.low %v2329_v10, %v2339_v19  ;;  %v261_v25 = vsel %vm7262_vm4, %v256_v15, %v260_v1  ;;  %v2346_v26 = vrot.slane %v2344_v16, 5  ;;  %v2352_v28 = vrot.slane %v2350_v17, 5  ;;  %v208_v15 = vld [vmem:[%s7241_s27 + $0x2c] sm:$0x1]  ;;  %v6023_v16 = vld [vmem:[%s7241_s27 + $0x30] sm:$0xf] }
  0x20   : > { %v266_v29 = vrot.slane %v265_v20, 4  ;;  %v2354_v30 = vshrl.u32 %v6018_v61, 16  ;;  %v2360_v11 = vshll.u32 %v6019_v8, 16  ;;  %v273_v32 = vshrl.u32 %v176_v18, 16 }
  0x21   : > { %6081 = vmatmul.mubr.msk.bf16.vlgmr.msra.gmra.mrb[0].mxu0 %vm667_vm3, %v6063_v24  ;;  %v2347_v33 = vor.u32 %v2346_v26, %v2343_v22  ;;  %v276_v34 = vshll.u32 %v176_v18, 16  ;;  %v282_v35 = vshll.u32 %v177_v23, 16  ;;  %v286_v36 = vshrl.u32 %v177_v23, 16 }
  0x22   : > { %3392 = vmatpush1.bf16.msra.mxu0 %v7244_v13  ;;  %2855 = vmatprep.mubr.bf16.mxu0 %v7172_v4  ;;  %v271_v38 = vsel %vm7262_vm4, %v266_v29, %v270_v21  ;;  %v2356_v39 = vrot.slane %v2354_v30, 4  ;;  %v2362_v40 = vrot.slane %v2360_v11, 5  ;;  %v275_v41 = vrot.slane %v273_v32, 4  ;;  %v6024_v29 = vld [vmem:[%s7241_s27 + $0x34] sm:$0xf] }
  0x23   : > { %v5829_v44 = vcombine.low %v261_v25, %v271_v38  ;;  %v2348_v45 = vrot.slane %v2347_v33, 4  ;;  %v278_v46 = vrot.slane %v276_v34, 5  ;;  %v284_v47 = vrot.slane %v282_v35, 5  ;;  %6246 = vmatprep.subr.msk.bf16.mxu0 %vm716_vm0, %v3771_v27  ;;  %v6025_v33 = vld [vmem:[%s7241_s27 + $0x38] sm:$0x1] }
  0x24   : > { %v2357_v13 = vor.u32 %v2356_v39, %v2352_v28  ;;  %v288_v48 = vrot.slane %v286_v36, 4  ;;  %v292_v49 = vshll.u32 %v207_v31, 16  ;;  %v2365_v50 = vshrl.u32 %v6020_v37, 16  ;;  %v180_v39 = vld [vmem:[%s7241_s27 + $0x30] sm:$0xf] }
  0x25   : > { %5847 = vmatmul.mubr.msk.bf16.gmra.mrb[4].mxu1 %vm667_vm3, %v5829_v44  ;;  %v2353_v51 = vsel %vm7262_vm4, %v2348_v45, %v2352_v28  ;;  %v279_v52 = vor.u32 %v278_v46, %v275_v41  ;;  %v2368_v54 = vshll.u32 %v6020_v37, 16  ;;  %v2374_v55 = vshll.u32 %v6021_v43, 16 }
  0x26   : > { %v2358_v57 = vrot.slane %v2357_v13, 4  ;;  %775 = vmatprep.mubr.bf16.mxu1 %v7172_v4  ;;  %v289_v12 = vor.u32 %v288_v48, %v284_v47  ;;  %v294_v27 = vrot.slane %v292_v49, 5  ;;  %v2367_v58 = vrot.slane %v2365_v50, 4  ;;  %v181_v48 = vld [vmem:[%s7241_s27 + $0x34] sm:$0xf] }
  0x27   : > { %v280_v59 = vrot.slane %v279_v52, 4  ;;  %v2370_v60 = vrot.slane %v2368_v54, 5  ;;  %v2376_v61 = vrot.slane %v2374_v55, 5  ;;  %v2378_v62 = vshrl.u32 %v6021_v43, 16  ;;  %v209_v52 = vld [vmem:[%s7241_s27 + $0x38] sm:$0x1] }
  0x28   : > { %v2363_v63 = vsel %vm7262_vm4, %v2358_v57, %v2362_v40  ;;  %v290_v0 = vrot.slane %v289_v12, 4  ;;  %v2384_v1 = vshll.u32 %v6022_v53, 16  ;;  %v297_v3 = vshrl.u32 %v178_v56, 16 }
  0x29   : > { %v6064_v7 = vcombine.low %v2353_v51, %v2363_v63  ;;  %v285_v8 = vsel %vm7262_vm4, %v280_v59, %v284_v47  ;;  %v2371_v9 = vor.u32 %v2370_v60, %v2367_v58  ;;  %v2380_v10 = vrot.slane %v2378_v62, 4  ;;  %v6026_v60 = vld [vmem:[%s7241_s27 + $0x3c] sm:$0xf] }
  0x2a   : > { %v295_v17 = vsel %vm7262_vm4, %v290_v0, %v294_v27  ;;  %v2386_v18 = vrot.slane %v2384_v1, 5  ;;  %v299_v19 = vrot.slane %v297_v3, 4  ;;  %v300_v20 = vshll.u32 %v178_v56, 16  ;;  %v6027_v1 = vld [vmem:[%s7241_s27 + $0x40] sm:$0xf] }
  0x2b   : > { %6082 = vmatmul.mubr.msk.bf16.gmra.mrb[4].mxu0 %vm667_vm3, %v6064_v7  ;;  %v5830_v21 = vcombine.low %v285_v8, %v295_v17  ;;  %v2372_v22 = vrot.slane %v2371_v9, 4  ;;  %v2381_v23 = vor.u32 %v2380_v10, %v2376_v61  ;;  %v306_v24 = vshll.u32 %v179_v2, 16 }
  0x2c   : > { %2865 = vmatprep.mubr.bf16.mxu0 %v7172_v4  ;;  %v302_v25 = vrot.slane %v300_v20, 5  ;;  %v310_v26 = vshrl.u32 %v179_v2, 16  ;;  %v316_v28 = vshll.u32 %v208_v15, 16  ;;  %v2389_v30 = vshrl.u32 %v6023_v16, 16 }
  0x2d   : > { %5848 = vmatmul.mubr.msk.bf16.gmra.mrb[8].mxu1 %vm667_vm3, %v5830_v21  ;;  %v2377_v11 = vsel %vm7262_vm4, %v2372_v22, %v2376_v61  ;;  %v2382_v31 = vrot.slane %v2381_v23, 4  ;;  %v308_v32 = vrot.slane %v306_v24, 5  ;;  %v2392_v34 = vshll.u32 %v6023_v16, 16  ;;  %v6028_v16 = vld [vmem:[%s7241_s27 + $0x44] sm:$0x1] }
  0x2e   : > { %785 = vmatprep.mubr.bf16.mxu1 %v7172_v4  ;;  %v303_v35 = vor.u32 %v302_v25, %v299_v19  ;;  %v312_v36 = vrot.slane %v310_v26, 4  ;;  %v318_v37 = vrot.slane %v316_v28, 5  ;;  %v2391_v38 = vrot.slane %v2389_v30, 4  ;;  %v182_v22 = vld [vmem:[%s7241_s27 + $0x3c] sm:$0xf] }
  0x2f   : > { %v2387_v40 = vsel %vm7262_vm4, %v2382_v31, %v2386_v18  ;;  %v2394_v41 = vrot.slane %v2392_v34, 5  ;;  %v2398_v43 = vshll.u32 %v6024_v29, 16  ;;  %v2402_v44 = vshrl.u32 %v6024_v29, 16  ;;  %v183_v28 = vld [vmem:[%s7241_s27 + $0x40] sm:$0xf] }
  0x30   : > { %v6065_v45 = vcombine.low %v2377_v11, %v2387_v40  ;;  %v304_v46 = vrot.slane %v303_v35, 4  ;;  %v313_v47 = vor.u32 %v312_v36, %v308_v32  ;;  %v2408_v13 = vshll.u32 %v6025_v33, 16 }
  0x31   : > { %v2395_v49 = vor.u32 %v2394_v41, %v2391_v38  ;;  %v2400_v50 = vrot.slane %v2398_v43, 5  ;;  %v2404_v51 = vrot.slane %v2402_v44, 4  ;;  %v321_v53 = vshrl.u32 %v180_v39, 16  ;;  %v6029_v41 = vld [vmem:[%s7241_s27 + $0x48] sm:$0xf] }
  0x32   : > { %v309_v54 = vsel %vm7262_vm4, %v304_v46, %v308_v32  ;;  %v314_v55 = vrot.slane %v313_v47, 4  ;;  %v2410_v56 = vrot.slane %v2408_v13, 5  ;;  %v324_v57 = vshll.u32 %v180_v39, 16  ;;  %v210_v39 = vld [vmem:[%s7241_s27 + $0x44] sm:$0x1] }
  0x33   : > { %6083 = vmatmul.mubr.msk.bf16.gmra.mrb[8].mxu0 %vm667_vm3, %v6065_v45  ;;  %v2396_v12 = vrot.slane %v2395_v49, 4  ;;  %v2405_v27 = vor.u32 %v2404_v51, %v2400_v50  ;;  %v323_v58 = vrot.slane %v321_v53, 4  ;;  %v330_v59 = vshll.u32 %v181_v48, 16  ;;  %v6030_v47 = vld [vmem:[%s7241_s27 + $0x4c] sm:$0xf] }
  0x34   : > { %2875 = vmatprep.mubr.bf16.mxu0 %v7172_v4  ;;  %v319_v61 = vsel %vm7262_vm4, %v314_v55, %v318_v37  ;;  %v326_v62 = vrot.slane %v324_v57, 5  ;;  %v334_v63 = vshrl.u32 %v181_v48, 16  ;;  %v340_v0 = vshll.u32 %v209_v52, 16  ;;  %v6031_v57 = vld [vmem:[%s7241_s27 + $0x50] sm:$0x1] }
  0x35   : > { %v5831_v2 = vcombine.low %v309_v54, %v319_v61  ;;  %v2401_v3 = vsel %vm7262_vm4, %v2396_v12, %v2400_v50  ;;  %v2406_v7 = vrot.slane %v2405_v27, 4  ;;  %v332_v8 = vrot.slane %v330_v59, 5 }
  0x36   : > { %v327_v9 = vor.u32 %v326_v62, %v323_v58  ;;  %v336_v10 = vrot.slane %v334_v63, 4  ;;  %v342_v15 = vrot.slane %v340_v0, 5  ;;  %v2413_v17 = vshrl.u32 %v6026_v60, 16  ;;  %v184_v58 = vld [vmem:[%s7241_s27 + $0x48] sm:$0xf] }
  0x37   : > { %5849 = vmatmul.mubr.msk.bf16.gmra.mrb[12].mxu1 %vm667_vm3, %v5831_v2  ;;  %v2411_v18 = vsel %vm7262_vm4, %v2406_v7, %v2410_v56  ;;  %v2416_v19 = vshll.u32 %v6026_v60, 16  ;;  %v2422_v20 = vshll.u32 %v6027_v1, 16  ;;  %v2426_v21 = vshrl.u32 %v6027_v1, 16  ;;  %v185_v63 = vld [vmem:[%s7241_s27 + $0x4c] sm:$0xf] }
  0x38   : > { %v6066_v23 = vcombine.low %v2401_v3, %v2411_v18  ;;  %795 = vmatprep.mubr.bf16.mxu1 %v7172_v4  ;;  %v328_v24 = vrot.slane %v327_v9, 4  ;;  %v337_v25 = vor.u32 %v336_v10, %v332_v8  ;;  %v2415_v26 = vrot.slane %v2413_v17, 4  ;;  %v211_v10 = vld [vmem:[%s7241_s27 + $0x50] sm:$0x1] }
  0x39   : > { %v2418_v29 = vrot.slane %v2416_v19, 5  ;;  %v2424_v30 = vrot.slane %v2422_v20, 5  ;;  %v2428_v11 = vrot.slane %v2426_v21, 4  ;;  %v2432_v31 = vshll.u32 %v6028_v16, 16  ;;  %v6032_v20 = vld [vmem:[%s7241_s27 + $0x54] sm:$0xf] }
  0x3a   : > { %v333_v32 = vsel %vm7262_vm4, %v328_v24, %v332_v8  ;;  %v338_v33 = vrot.slane %v337_v25, 4  ;;  %v345_v34 = vshrl.u32 %v182_v22, 16  ;;  %v348_v35 = vshll.u32 %v182_v22, 16 }
  0x3b   : > { %6084 = vmatmul.mubr.msk.bf16.gmra.mrb[12].mxu0 %vm667_vm3, %v6066_v23  ;;  %v2419_v36 = vor.u32 %v2418_v29, %v2415_v26  ;;  %v2429_v37 = vor.u32 %v2428_v11, %v2424_v30  ;;  %v2434_v38 = vrot.slane %v2432_v31, 5  ;;  %v354_v40 = vshll.u32 %v183_v28, 16 }
  0x3c   : > { %2885 = vmatprep.mubr.bf16.mxu0 %v7172_v4  ;;  %v343_v43 = vsel %vm7262_vm4, %v338_v33, %v342_v15  ;;  %v347_v44 = vrot.slane %v345_v34, 4  ;;  %v350_v45 = vrot.slane %v348_v35, 5  ;;  %v358_v46 = vshrl.u32 %v183_v28, 16 }
  0x3d   : > { %v5832_v13 = vcombine.low %v333_v32, %v343_v43  ;;  %v2420_v48 = vrot.slane %v2419_v36, 4  ;;  %v2430_v49 = vrot.slane %v2429_v37, 4  ;;  %v356_v50 = vrot.slane %v354_v40, 5  ;;  %v6034_v37 = vld [vmem:[%s7241_s27 + $0x5c] sm:$0x1] }
  0x3e   : > { %v351_v51 = vor.u32 %v350_v45, %v347_v44  ;;  %v360_v52 = vrot.slane %v358_v46, 4  ;;  %v364_v53 = vshll.u32 %v210_v39, 16  ;;  %v2437_v54 = vshrl.u32 %v6029_v41, 16  ;;  %v186_v44 = vld [vmem:[%s7241_s27 + $0x54] sm:$0xf] }
  0x3f   : > { %5850 = vmatmul.mubr.msk.bf16.gmra.mrb[16].mxu1 %vm667_vm3, %v5832_v13  ;;  %v2425_v55 = vsel %vm7262_vm4, %v2420_v48, %v2424_v30  ;;  %v2435_v56 = vsel %vm7262_vm4, %v2430_v49, %v2434_v38  ;;  %v2440_v12 = vshll.u32 %v6029_v41, 16  ;;  %v2446_v27 = vshll.u32 %v6030_v47, 16  ;;  %v6033_v30 = vld [vmem:[%s7241_s27 + $0x58] sm:$0xf] }
  0x40   : > { %v6067_v59 = vcombine.low %v2425_v55, %v2435_v56  ;;  %805 = vmatprep.mubr.bf16.mxu1 %v7172_v4  ;;  %v352_v60 = vrot.slane %v351_v51, 4  ;;  %v361_v61 = vor.u32 %v360_v52, %v356_v50  ;;  %v366_v62 = vrot.slane %v364_v53, 5  ;;  %v187_v48 = vld [vmem:[%s7241_s27 + $0x58] sm:$0xf]  ;;  %v212_v56 = vld [vmem:[%s7241_s27 + $0x5c] sm:$0x1] }
  0x41   : > { %v2439_v0 = vrot.slane %v2437_v54, 4  ;;  %v2442_v1 = vrot.slane %v2440_v12, 5  ;;  %v2448_v2 = vrot.slane %v2446_v27, 5  ;;  %v2450_v3 = vshrl.u32 %v6030_v47, 16 }
  0x42   : > { %v357_v7 = vsel %vm7262_vm4, %v352_v60, %v356_v50  ;;  %v362_v8 = vrot.slane %v361_v61, 4  ;;  %v2456_v9 = vshll.u32 %v6031_v57, 16  ;;  %v369_v15 = vshrl.u32 %v184_v58, 16  ;;  %v6035_v60 = vld [vmem:[%s7241_s27 + $0x60] sm:$0xf] }
  0x43   : > { %6085 = vmatmul.mubr.msk.bf16.gmra.mrb[16].mxu0 %vm667_vm3, %v6067_v59  ;;  %v2443_v16 = vor.u32 %v2442_v1, %v2439_v0  ;;  %v2452_v17 = vrot.slane %v2450_v3, 4  ;;  %v372_v18 = vshll.u32 %v184_v58, 16  ;;  %v378_v19 = vshll.u32 %v185_v63, 16  ;;  %v6036_v1 = vld [vmem:[%s7241_s27 + $0x64] sm:$0xf] }
  0x44   : > { %2895 = vmatprep.mubr.bf16.mxu0 %v7172_v4  ;;  %v367_v21 = vsel %vm7262_vm4, %v362_v8, %v366_v62  ;;  %v2458_v22 = vrot.slane %v2456_v9, 5  ;;  %v371_v23 = vrot.slane %v369_v15, 4  ;;  %v382_v24 = vshrl.u32 %v185_v63, 16  ;;  %v6037_v15 = vld [vmem:[%s7241_s27 + $0x68] sm:$0x1] }
  0x45   : > { %v5833_v25 = vcombine.low %v357_v7, %v367_v21  ;;  %v2444_v26 = vrot.slane %v2443_v16, 4  ;;  %v2453_v28 = vor.u32 %v2452_v17, %v2448_v2  ;;  %v374_v29 = vrot.slane %v372_v18, 5 }
  0x46   : > { %v380_v11 = vrot.slane %v378_v19, 5  ;;  %v384_v31 = vrot.slane %v382_v24, 4  ;;  %v388_v32 = vshll.u32 %v211_v10, 16  ;;  %v2461_v33 = vshrl.u32 %v6032_v20, 16 }
  0x47   : > { %5851 = vmatmul.mubr.msk.bf16.gmra.mrb[20].mxu1 %vm667_vm3, %v5833_v25  ;;  %v2449_v34 = vsel %vm7262_vm4, %v2444_v26, %v2448_v2  ;;  %v2454_v35 = vrot.slane %v2453_v28, 4  ;;  %v375_v36 = vor.u32 %v374_v29, %v371_v23  ;;  %v2464_v38 = vshll.u32 %v6032_v20, 16  ;;  %v7398_v28 = vld [vmem:[%s7241_s27 + $0x64] sm:$0xf] }
  0x48   : > { %815 = vmatprep.mubr.bf16.mxu1 %v7172_v4  ;;  %v385_v39 = vor.u32 %v384_v31, %v380_v11  ;;  %v390_v40 = vrot.slane %v388_v32, 5  ;;  %v2463_v41 = vrot.slane %v2461_v33, 4  ;;  %v2470_v43 = vshll.u32 %v6033_v30, 16  ;;  %v213_v32 = vld [vmem:[%s7241_s27 + $0x68] sm:$0x1] }
  0x49   : > { %v2459_v45 = vsel %vm7262_vm4, %v2454_v35, %v2458_v22  ;;  %v376_v46 = vrot.slane %v375_v36, 4  ;;  %v2466_v47 = vrot.slane %v2464_v38, 5  ;;  %v2474_v13 = vshrl.u32 %v6033_v30, 16  ;;  %v7393_v22 = vld [vmem:[%s7241_s27 + $0x60] sm:$0xf] }
  0x4a   : > { %v6068_v49 = vcombine.low %v2449_v34, %v2459_v45  ;;  %v386_v50 = vrot.slane %v385_v39, 4  ;;  %v2472_v51 = vrot.slane %v2470_v43, 5  ;;  %v2480_v52 = vshll.u32 %v6034_v37, 16  ;;  %v6097_v37 = vld [vmem:[%s7241_s27 + $0xc] sm:$0xe] }
  0x4b   : > { %v381_v53 = vsel %vm7262_vm4, %v376_v46, %v380_v11  ;;  %v2467_v54 = vor.u32 %v2466_v47, %v2463_v41  ;;  %v2476_v55 = vrot.slane %v2474_v13, 4  ;;  %v393_v57 = vshrl.u32 %v186_v44, 16  ;;  %v6098_v43 = vld [vmem:[%s7241_s27 + $0x10] sm:$0xf]  ;;  %v6099_v13 = vld [vmem:[%s7241_s27 + $0x14] sm:$0x1] }
  0x4c   : > { %6086 = vmatmul.mubr.msk.bf16.gmra.mrb[20].mxu0 %vm667_vm3, %v6068_v49  ;;  %v391_v12 = vsel %vm7262_vm4, %v386_v50, %v390_v40  ;;  %v2482_v27 = vrot.slane %v2480_v52, 5  ;;  %v396_v58 = vshll.u32 %v186_v44, 16  ;;  %v402_v59 = vshll.u32 %v187_v48, 16  ;;  %v7415_v52 = vld [vmem:[%s7241_s27 + $0x6c] sm:$0xf] }
  0x4d   : > { %2905 = vmatprep.mubr.bf16.mxu0 %v7172_v4  ;;  %v5834_v61 = vcombine.low %v381_v53, %v391_v12  ;;  %v2468_v62 = vrot.slane %v2467_v54, 4  ;;  %v2477_v63 = vor.u32 %v2476_v55, %v2472_v51  ;;  %v395_v0 = vrot.slane %v393_v57, 4 }
  0x4e   : > { %v398_v2 = vrot.slane %v396_v58, 5  ;;  %v404_v3 = vrot.slane %v402_v59, 5  ;;  %v406_v7 = vshrl.u32 %v187_v48, 16  ;;  %v412_v8 = vshll.u32 %v212_v56, 16 }
  0x4f   : > { %5852 = vmatmul.mubr.msk.bf16.gmra.mrb[24].mxu1 %vm667_vm3, %v5834_v61  ;;  %v2473_v9 = vsel %vm7262_vm4, %v2468_v62, %v2472_v51  ;;  %v2478_v10 = vrot.slane %v2477_v63, 4  ;;  %v2485_v16 = vshrl.u32 %v6035_v60, 16  ;;  %v2488_v17 = vshll.u32 %v6035_v60, 16  ;;  %v7426_v60 = vld [vmem:[%s7241_s27 + $0x70] sm:$0xf] }
  0x50   : > { %825 = vmatprep.mubr.bf16.mxu1 %v7172_v4  ;;  %v399_v18 = vor.u32 %v398_v2, %v395_v0  ;;  %v408_v19 = vrot.slane %v406_v7, 4  ;;  %v414_v20 = vrot.slane %v412_v8, 5  ;;  %v2494_v21 = vshll.u32 %v6036_v1, 16  ;;  %v214_v0 = vld [vmem:[%s7241_s27 + $0x74] sm:$0x1] }
  0x51   : > { %v2483_v23 = vsel %vm7262_vm4, %v2478_v10, %v2482_v27  ;;  %v2487_v24 = vrot.slane %v2485_v16, 4  ;;  %v2490_v25 = vrot.slane %v2488_v17, 5  ;;  %v2498_v26 = vshrl.u32 %v6036_v1, 16  ;;  %v6101_v10 = vld [vmem:[%s7241_s27 + $0x1c] sm:$0xf] }
  0x52   : > { %v6069_v29 = vcombine.low %v2473_v9, %v2483_v23  ;;  %v400_v30 = vrot.slane %v399_v18, 4  ;;  %v409_v11 = vor.u32 %v408_v19, %v404_v3  ;;  %v2496_v31 = vrot.slane %v2494_v21, 5  ;;  %v6100_v9 = vld [vmem:[%s7241_s27 + $0x18] sm:$0xe]  ;;  %v6102_v19 = vld [vmem:[%s7241_s27 + $0x20] sm:$0x1] }
  0x53   : > { %v2491_v33 = vor.u32 %v2490_v25, %v2487_v24  ;;  %v2500_v34 = vrot.slane %v2498_v26, 4  ;;  %v2504_v35 = vshll.u32 %v6037_v15, 16  ;;  %v417_v36 = vshrl.u32 %v7393_v22, 16  ;;  %v7446_v25 = vld [vmem:[%s7241_s27 + $0x78] sm:$0xf] }
  0x54   : > { %6087 = vmatmul.mubr.msk.bf16.gmra.mrb[24].mxu0 %vm667_vm3, %v6069_v29  ;;  %v405_v38 = vsel %vm7262_vm4, %v400_v30, %v404_v3  ;;  %v410_v39 = vrot.slane %v409_v11, 4  ;;  %v420_v40 = vshll.u32 %v7393_v22, 16  ;;  %v426_v41 = vshll.u32 %v7398_v28, 16 }
  0x55   : > { %2915 = vmatprep.mubr.bf16.mxu0 %v7172_v4  ;;  %v2492_v44 = vrot.slane %v2491_v33, 4  ;;  %v2501_v45 = vor.u32 %v2500_v34, %v2496_v31  ;;  %v2506_v46 = vrot.slane %v2504_v35, 5  ;;  %v419_v47 = vrot.slane %v417_v36, 4 }
  0x56   : > { %v415_v48 = vsel %vm7262_vm4, %v410_v39, %v414_v20  ;;  %v422_v49 = vrot.slane %v420_v40, 5  ;;  %v428_v50 = vrot.slane %v426_v41, 5  ;;  %v430_v51 = vshrl.u32 %v7398_v28, 16  ;;  %v215_v41 = vld [vmem:[%s7241_s27 + $0x80] sm:$0x1] }
  0x57   : > { %v5835_v53 = vcombine.low %v405_v38, %v415_v48  ;;  %v2497_v54 = vsel %vm7262_vm4, %v2492_v44, %v2496_v31  ;;  %v2502_v55 = vrot.slane %v2501_v45, 4  ;;  %v436_v56 = vshll.u32 %v213_v32, 16  ;;  %v7452_v31 = vld [vmem:[%s7241_s27 + $0x7c] sm:$0xf] }
  0x58   : > { %v423_v12 = vor.u32 %v422_v49, %v419_v47  ;;  %v432_v27 = vrot.slane %v430_v51, 4  ;;  %v6145_v58 = vrot.slane %v6097_v37, 9  ;;  %v3168_v59 = vrot.slane %v6098_v43, 5 }
  0x59   : > { %5853 = vmatmul.mubr.msk.bf16.gmra.mrb[28].mxu1 %vm667_vm3, %v5835_v53  ;;  %v2507_v61 = vsel %vm7262_vm4, %v2502_v55, %v2506_v46  ;;  %v438_v62 = vrot.slane %v436_v56, 5  ;;  %v3171_v63 = vrot.slane %v6099_v13, 5  ;;  %v441_v1 = vshrl.u32 %v7415_v52, 16 }
  0x5a   : > { %v6070_v2 = vcombine.low %v2497_v54, %v2507_v61  ;;  %835 = vmatprep.mubr.bf16.mxu1 %v7172_v4  ;;  %v424_v3 = vrot.slane %v423_v12, 4  ;;  %v433_v7 = vor.u32 %v432_v27, %v428_v50  ;;  %v3169_v8 = vsel %vm7421_vm7, %v6145_v58, %v3168_v59  ;;  %v6104_v54 = vld [vmem:[%s7241_s27 + $0x28] sm:$0xf]  ;;  %v6103_v58 = vld [vmem:[%s7241_s27 + $0x24] sm:$0xe] }
  0x5b   : > { %v3170_v15 = vrot.slane %v3168_v59, 4  ;;  %v443_v16 = vrot.slane %v441_v1, 4  ;;  %v444_v17 = vshll.u32 %v7415_v52, 16  ;;  %v450_v18 = vshll.u32 %v7426_v60, 16  ;;  %v7472_v59 = vld [vmem:[%s7241_s27 + $0x84] sm:$0xf] }
  0x5c   : > { %6088 = vmatmul.mubr.msk.bf16.gmra.mrb[28].mxu0 %vm667_vm3, %v6070_v2  ;;  %v429_v20 = vsel %vm7262_vm4, %v424_v3, %v428_v50  ;;  %v434_v21 = vrot.slane %v433_v7, 4  ;;  %v454_v23 = vshrl.u32 %v7426_v60, 16  ;;  %v460_v24 = vshll.u32 %v214_v0, 16  ;;  %v6105_v0 = vld [vmem:[%s7241_s27 + $0x2c] sm:$0x1] }
  0x5d   : > { %3423 = vmatprep.mubr.bf16.mxu0 %v7172_v4  ;;  %v3172_v26 = vsel %vm7421_vm7, %v3170_v15, %v3171_v63  ;;  %v446_v29 = vrot.slane %v444_v17, 5  ;;  %v452_v30 = vrot.slane %v450_v18, 5  ;;  %v6146_v11 = vrot.slane %v6100_v9, 9  ;;  %v7479_v1 = vld [vmem:[%s7241_s27 + $0x88] sm:$0xf] }
  0x5e   : > { %v439_v32 = vsel %vm7262_vm4, %v434_v21, %v438_v62  ;;  %v6162_v33 = vcombine.low %v3169_v8, %v3172_v26  ;;  %v456_v34 = vrot.slane %v454_v23, 4  ;;  %v462_v35 = vrot.slane %v460_v24, 5  ;;  %v216_v15 = vld [vmem:[%s7241_s27 + $0x8c] sm:$0x1] }
  0x5f   : > { %v5836_v36 = vcombine.low %v429_v20, %v439_v32  ;;  %v447_v37 = vor.u32 %v446_v29, %v443_v16  ;;  %v3175_v38 = vrot.slane %v6101_v10, 5  ;;  %v3178_v39 = vrot.slane %v6102_v19, 5  ;;  %v6107_v29 = vld [vmem:[%s7241_s27 + $0x34] sm:$0xf] }
  0x60   : > { %v457_v40 = vor.u32 %v456_v34, %v452_v30  ;;  %v465_v43 = vshrl.u32 %v7446_v25, 16  ;;  %v468_v44 = vshll.u32 %v7446_v25, 16  ;;  %v474_v45 = vshll.u32 %v7452_v31, 16 }
  0x61   : > { %5854 = vmatmul.mubr.msk.bf16.gmra.mrb[32].mxu1 %vm667_vm3, %v5836_v36  ;;  %v448_v46 = vrot.slane %v447_v37, 4  ;;  %v3176_v47 = vsel %vm7421_vm7, %v6146_v11, %v3175_v38  ;;  %v3177_v13 = vrot.slane %v3175_v38, 4  ;;  %v478_v48 = vshrl.u32 %v7452_v31, 16  ;;  %v6106_v36 = vld [vmem:[%s7241_s27 + $0x30] sm:$0xe] }
  0x62   : > { %845 = vmatprep.mubr.bf16.mxu1 %v7172_v4  ;;  %v458_v49 = vrot.slane %v457_v40, 4  ;;  %v467_v50 = vrot.slane %v465_v43, 4  ;;  %v470_v51 = vrot.slane %v468_v44, 5  ;;  %v476_v53 = vrot.slane %v474_v45, 5  ;;  %v7500_v37 = vld [vmem:[%s7241_s27 + $0x94] sm:$0xf] }
  0x63   : > { %v453_v55 = vsel %vm7262_vm4, %v448_v46, %v452_v30  ;;  %v3179_v56 = vsel %vm7421_vm7, %v3177_v13, %v3178_v39  ;;  %v480_v12 = vrot.slane %v478_v48, 4  ;;  %v484_v27 = vshll.u32 %v215_v41, 16  ;;  %v6108_v41 = vld [vmem:[%s7241_s27 + $0x38] sm:$0x1] }
  0x64   : > { %6180 = vmatmul.mubr.msk.bf16.vlgmr.msra.gmra.mrb[0].mxu0 %vm667_vm3, %v6162_v33  ;;  %v463_v61 = vsel %vm7262_vm4, %v458_v49, %v462_v35  ;;  %v6163_v62 = vcombine.low %v3176_v47, %v3179_v56  ;;  %v471_v63 = vor.u32 %v470_v51, %v467_v50  ;;  %v3182_v8 = vrot.slane %v6104_v54, 5  ;;  %v7495_v33 = vld [vmem:[%s7241_s27 + $0x90] sm:$0xf]  ;;  %v217_v44 = vld [vmem:[%s7241_s27 + $0x98] sm:$0x1] }
  0x65   : > { %3827 = vmatpush1.bf16.msra.mxu0 %v7248_v14  ;;  %3433 = vmatprep.mubr.bf16.mxu0 %v7172_v4  ;;  %v5837_v2 = vcombine.low %v453_v55, %v463_v61  ;;  %v481_v3 = vor.u32 %v480_v12, %v476_v53  ;;  %v486_v7 = vrot.slane %v484_v27, 5  ;;  %v6147_v10 = vrot.slane %v6103_v58, 9 }
  0x66   : > { %v472_v9 = vrot.slane %v471_v63, 4  ;;  %v489_v16 = vshrl.u32 %v7472_v59, 16  ;;  %v492_v17 = vshll.u32 %v7472_v59, 16  ;;  %v3184_v19 = vrot.slane %v3182_v8, 4 }
  0x67   : > { %v482_v18 = vrot.slane %v481_v3, 4  ;;  %v3185_v20 = vrot.slane %v6105_v0, 5  ;;  %v498_v14 = vshll.u32 %v7479_v1, 16  ;;  %v502_v26 = vshrl.u32 %v7479_v1, 16  ;;  %v7520_v0 = vld [vmem:[%s7241_s27 + $0xa0] sm:$0xf] }
  0x68   : > { %v477_v21 = vsel %vm7262_vm4, %v472_v9, %v476_v53  ;;  %v491_v23 = vrot.slane %v489_v16, 4  ;;  %v494_v24 = vrot.slane %v492_v17, 5  ;;  %v508_v32 = vshll.u32 %v216_v15, 16  ;;  %v7515_v53 = vld [vmem:[%s7241_s27 + $0x9c] sm:$0xf] }
  0x69   : > { %5855 = vmatmul.mubr.msk.bf16.gmra.mrb[36].mxu1 %vm667_vm3, %v5837_v2  ;;  %v487_v30 = vsel %vm7262_vm4, %v482_v18, %v486_v7  ;;  %v500_v11 = vrot.slane %v498_v14, 5  ;;  %v504_v35 = vrot.slane %v502_v26, 4  ;;  %v3183_v39 = vsel %vm7421_vm7, %v6147_v10, %v3182_v8  ;;  %v6110_v7 = vld [vmem:[%s7241_s27 + $0x40] sm:$0xf]  ;;  %v6109_v10 = vld [vmem:[%s7241_s27 + $0x3c] sm:$0xe] }
  0x6a   : > { %855 = vmatprep.mubr.bf16.mxu1 %v7172_v4  ;;  %v495_v34 = vor.u32 %v494_v24, %v491_v23  ;;  %v5838_v38 = vcombine.low %v477_v21, %v487_v30  ;;  %v3186_v40 = vsel %vm7421_vm7, %v3184_v19, %v3185_v20  ;;  %v3189_v43 = vrot.slane %v6107_v29, 5  ;;  %v6111_v15 = vld [vmem:[%s7241_s27 + $0x44] sm:$0x1]  ;;  %v7541_v23 = vld [vmem:[%s7241_s27 + $0xa8] sm:$0xf] }
  0x6b   : > { %v505_v45 = vor.u32 %v504_v35, %v500_v11  ;;  %v510_v46 = vrot.slane %v508_v32, 5  ;;  %v513_v47 = vshrl.u32 %v7495_v33, 16  ;;  %v516_v13 = vshll.u32 %v7495_v33, 16  ;;  %v218_v16 = vld [vmem:[%s7241_s27 + $0xa4] sm:$0x1] }
  0x6c   : > { %6181 = vmatmul.mubr.msk.bf16.gmra.mrb[4].mxu0 %vm667_vm3, %v6163_v62  ;;  %v496_v48 = vrot.slane %v495_v34, 4  ;;  %v6148_v49 = vrot.slane %v6106_v36, 9  ;;  %v522_v50 = vshll.u32 %v7500_v37, 16  ;;  %v526_v51 = vshrl.u32 %v7500_v37, 16 }
  0x6d   : > { %3443 = vmatprep.mubr.bf16.mxu0 %v7172_v4  ;;  %v506_v54 = vrot.slane %v505_v45, 4  ;;  %v3192_v55 = vrot.slane %v6108_v41, 5  ;;  %v515_v56 = vrot.slane %v513_v47, 4  ;;  %v518_v12 = vrot.slane %v516_v13, 5 }
  0x6e   : > { %v3191_v27 = vrot.slane %v3189_v43, 4  ;;  %v7517_v58 = vrot.slane %v522_v50, 5  ;;  %v528_v61 = vrot.slane %v526_v51, 4  ;;  %v532_v62 = vshll.u32 %v217_v44, 16 }
  0x6f   : > { %v6164_v63 = vcombine.low %v3183_v39, %v3186_v40  ;;  %v501_v2 = vsel %vm7262_vm4, %v496_v48, %v500_v11  ;;  %v519_v3 = vor.u32 %v518_v12, %v515_v56  ;;  %v511_v8 = vsel %vm7262_vm4, %v506_v54, %v510_v46  ;;  %v7546_v11 = vld [vmem:[%s7241_s27 + $0xac] sm:$0xf]  ;;  %v6114_v56 = vld [vmem:[%s7241_s27 + $0x50] sm:$0x1] }
  0x70   : > { %v529_v9 = vor.u32 %v528_v61, %v7517_v58  ;;  %v537_v17 = vshrl.u32 %v7515_v53, 16  ;;  %v540_v18 = vshll.u32 %v7515_v53, 16  ;;  %v3190_v19 = vsel %vm7421_vm7, %v6148_v49, %v3189_v43  ;;  %v6113_v40 = vld [vmem:[%s7241_s27 + $0x4c] sm:$0xf] }
  0x71   : > { %5856 = vmatmul.mubr.msk.bf16.gmra.mrb[40].mxu1 %vm667_vm3, %v5838_v38  ;;  %v3193_v20 = vsel %vm7421_vm7, %v3191_v27, %v3192_v55  ;;  %v534_v14 = vrot.slane %v532_v62, 5  ;;  %v546_v21 = vshll.u32 %v7520_v0, 16  ;;  %v3196_v24 = vrot.slane %v6110_v7, 5  ;;  %v6112_v55 = vld [vmem:[%s7241_s27 + $0x48] sm:$0xe] }
  0x72   : > { %865 = vmatprep.mubr.bf16.mxu1 %v7172_v4  ;;  %v539_v26 = vrot.slane %v537_v17, 4  ;;  %v542_v29 = vrot.slane %v540_v18, 5  ;;  %v550_v30 = vshrl.u32 %v7520_v0, 16  ;;  %v5839_v32 = vcombine.low %v501_v2, %v511_v8 }
  0x73   : > { %v520_v34 = vrot.slane %v519_v3, 4  ;;  %v548_v35 = vrot.slane %v546_v21, 5  ;;  %v6165_v36 = vcombine.low %v3190_v19, %v3193_v20  ;;  %v530_v38 = vrot.slane %v529_v9, 4  ;;  %v7574_v19 = vld [vmem:[%s7241_s27 + $0xb8] sm:$0xf] }
  0x74   : > { %6182 = vmatmul.mubr.msk.bf16.gmra.mrb[8].mxu0 %vm667_vm3, %v6164_v63  ;;  %v552_v39 = vrot.slane %v550_v30, 4  ;;  %v6149_v41 = vrot.slane %v6109_v10, 9  ;;  %v3199_v43 = vrot.slane %v6111_v15, 5  ;;  %v543_v44 = vor.u32 %v542_v29, %v539_v26  ;;  %v219_v63 = vld [vmem:[%s7241_s27 + $0xb0] sm:$0x1] }
  0x75   : > { %3453 = vmatprep.mubr.bf16.mxu0 %v7172_v4  ;;  %v556_v45 = vshll.u32 %v218_v16, 16  ;;  %v3198_v46 = vrot.slane %v3196_v24, 4  ;;  %v561_v13 = vshrl.u32 %v7541_v23, 16  ;;  %v564_v48 = vshll.u32 %v7541_v23, 16  ;;  %v7571_v15 = vld [vmem:[%s7241_s27 + $0xb4] sm:$0xf] }
  0x76   : > { %v553_v47 = vor.u32 %v552_v39, %v548_v35  ;;  %v570_v49 = vshll.u32 %v7546_v11, 16  ;;  %v574_v50 = vshrl.u32 %v7546_v11, 16  ;;  %v525_v51 = vsel %vm7262_vm4, %v520_v34, %v7517_v58  ;;  %v7579_v20 = vld.sshfl [vmem:[%s8781_s1 + $0x8] sm:$0x33 pattern:$0x76325410] }
  0x77   : > { %v535_v54 = vsel %vm7262_vm4, %v530_v38, %v534_v14  ;;  %v544_v12 = vrot.slane %v543_v44, 4  ;;  %v558_v61 = vrot.slane %v556_v45, 5  ;;  %v3203_v62 = vrot.slane %v6113_v40, 5  ;;  %v6115_v39 = vld [vmem:[%s7241_s27 + $0x54] sm:$0xe] }
  0x78   : > { %v554_v27 = vrot.slane %v553_v47, 4  ;;  %v3197_v2 = vsel %vm7421_vm7, %v6149_v41, %v3196_v24  ;;  %v3200_v58 = vsel %vm7421_vm7, %v3198_v46, %v3199_v43  ;;  %v563_v3 = vrot.slane %v561_v13, 4  ;;  %v6117_v44 = vld [vmem:[%s7241_s27 + $0x5c] sm:$0x1] }
  0x79   : > { %5857 = vmatmul.mubr.msk.bf16.gmra.mrb[44].mxu1 %vm667_vm3, %v5839_v32  ;;  %v566_v7 = vrot.slane %v564_v48, 5  ;;  %v5840_v8 = vcombine.low %v525_v51, %v535_v54  ;;  %v572_v9 = vrot.slane %v570_v49, 5  ;;  %v576_v10 = vrot.slane %v574_v50, 4  ;;  %v6116_v32 = vld [vmem:[%s7241_s27 + $0x58] sm:$0xf] }
  0x7a   : > { %875 = vmatprep.mubr.bf16.mxu1 %v7172_v4  ;;  %v6166_v16 = vcombine.low %v3197_v2, %v3200_v58  ;;  %v6150_v17 = vrot.slane %v6112_v55, 9  ;;  %v3206_v18 = vrot.slane %v6114_v56, 5  ;;  %v549_v14 = vsel %vm7262_vm4, %v544_v12, %v548_v35  ;;  %v220_v45 = vld [vmem:[%s7241_s27 + $0xbc] sm:$0x1] }
  0x7b   : > { %v559_v21 = vsel %vm7262_vm4, %v554_v27, %v558_v61  ;;  %v3205_v24 = vrot.slane %v3203_v62, 4  ;;  %v580_v26 = vshll.u32 %v219_v63, 16  ;;  %v567_v29 = vor.u32 %v566_v7, %v563_v3  ;;  %v6119_v7 = vld [vmem:[%s7241_s27 + $0x64] sm:$0xf] }
  0x7c   : > { %6183 = vmatmul.mubr.msk.bf16.gmra.mrb[12].mxu0 %vm667_vm3, %v6165_v36  ;;  %v577_v30 = vor.u32 %v576_v10, %v572_v9  ;;  %v585_v34 = vshrl.u32 %v7571_v15, 16  ;;  %v588_v36 = vshll.u32 %v7571_v15, 16  ;;  %v594_v35 = vshll.u32 %v7574_v19, 16  ;;  %v6118_v10 = vld [vmem:[%s7241_s27 + $0x60] sm:$0xe] }
  0x7d   : > { %3463 = vmatprep.mubr.bf16.mxu0 %v7172_v4  ;;  %v598_v38 = vshrl.u32 %v7574_v19, 16  ;;  %v5841_v40 = vcombine.low %v549_v14, %v559_v21  ;;  %v3204_v41 = vsel %vm7421_vm7, %v6150_v17, %v3203_v62  ;;  %v3207_v43 = vsel %vm7421_vm7, %v3205_v24, %v3206_v18  ;;  %v6120_v18 = vld [vmem:[%s7241_s27 + $0x68] sm:$0x1] }
  0x7e   : > { %v1521_v46 = vcombine.high %v7579_v20, %v7579_v20  ;;  %v568_v47 = vrot.slane %v567_v29, 4  ;;  %v578_v13 = vrot.slane %v577_v30, 4  ;;  %v582_v48 = vrot.slane %v580_v26, 5 }
  0x7f   : > { %v3210_v49 = vrot.slane %v6116_v32, 5  ;;  %v587_v50 = vrot.slane %v585_v34, 4  ;;  %v590_v51 = vrot.slane %v588_v36, 5  ;;  %v596_v54 = vrot.slane %v594_v35, 5 }
  0x80   : > { %v600_v55 = vrot.slane %v598_v38, 4  ;;  %5930 = vmatprep.subr.msk.bf16.mxu1 %vm716_vm0, %v1521_v46  ;;  %v6167_v56 = vcombine.low %v3204_v41, %v3207_v43  ;;  %v6151_v12 = vrot.slane %v6115_v39, 9  ;;  %v3213_v61 = vrot.slane %v6117_v44, 5  ;;  %v6122_v38 = vld [vmem:[%s7241_s27 + $0x70] sm:$0xf] }
  0x81   : > { %5858 = vmatmul.mubr.msk.bf16.gmra.mrb[48].mxu1 %vm667_vm3, %v5840_v8  ;;  %v3212_v27 = vrot.slane %v3210_v49, 4  ;;  %v604_v62 = vshll.u32 %v220_v45, 16  ;;  %v573_v63 = vsel %vm7262_vm4, %v568_v47, %v572_v9  ;;  %v583_v2 = vsel %vm7262_vm4, %v578_v13, %v582_v48  ;;  %v7622_v30 = vld.sshfl [vmem:[%s8781_s1 + $0x1c] sm:$0x33 pattern:$0x76325410] }
  0x82   : > { %885 = vmatprep.mubr.bf16.mxu1 %v7172_v4  ;;  %v591_v58 = vor.u32 %v590_v51, %v587_v50  ;;  %v601_v3 = vor.u32 %v600_v55, %v596_v54  ;;  %v3211_v8 = vsel %vm7421_vm7, %v6151_v12, %v3210_v49  ;;  %v3217_v14 = vrot.slane %v6119_v7, 5  ;;  %v6123_v46 = vld [vmem:[%s7241_s27 + $0x74] sm:$0x1] }
  0x83   : > { %v3214_v17 = vsel %vm7421_vm7, %v3212_v27, %v3213_v61  ;;  %v606_v9 = vrot.slane %v604_v62, 5  ;;  %v6152_v29 = vrot.slane %v6118_v10, 9  ;;  %v3220_v34 = vrot.slane %v6120_v18, 5  ;;  %v6125_v61 = vld [vmem:[%s7241_s27 + $0x7c] sm:$0xf] }
  0x84   : > { %6184 = vmatmul.mubr.msk.bf16.gmra.mrb[16].mxu0 %vm667_vm3, %v6166_v16  ;;  %v5842_v16 = vcombine.low %v573_v63, %v583_v2  ;;  %v592_v21 = vrot.slane %v591_v58, 4  ;;  %v602_v24 = vrot.slane %v601_v3, 4  ;;  %v6168_v26 = vcombine.low %v3211_v8, %v3214_v17  ;;  %v7663_v62 = vld.sshfl [vmem:[%s8781_s1 + $0xc] sm:$0x33 pattern:$0x76325410] }
  0x85   : > { %3473 = vmatprep.mubr.bf16.mxu0 %v7172_v4  ;;  %v3219_v32 = vrot.slane %v3217_v14, 4  ;;  %v3218_v39 = vsel %vm7421_vm7, %v6152_v29, %v3217_v14  ;;  %v3224_v44 = vrot.slane %v6122_v38, 5  ;;  %v4573_v45 = vcombine.high %v7622_v30, %v7622_v30  ;;  %v7148_v63 = vld [vmem:[%s7241_s27] sm:$0xf]  ;;  %v7149_v2 = vld [vmem:[%s7241_s27 + $0x4] sm:$0xf] }
  0x86   : > { %v597_v36 = vsel %vm7262_vm4, %v592_v21, %v596_v54  ;;  %v607_v35 = vsel %vm7262_vm4, %v602_v24, %v606_v9  ;;  %v5871_v47 = vcombine.low %v7415_v52, %v7426_v60  ;;  %v5872_v13 = vcombine.low %v7446_v25, %v7452_v31  ;;  %v6124_v10 = vld [vmem:[%s7241_s27 + $0x78] sm:$0xe]  ;;  %v7151_v29 = vld [vmem:[%s7241_s27 + $0x10] sm:$0xf]  ;;  %v6127_v38 = vld [vmem:[%s7241_s27 + $0x84] sm:$0xe] }
  0x87   : > { %v5843_v41 = vcombine.low %v597_v36, %v607_v35  ;;  %v3221_v43 = vsel %vm7421_vm7, %v3219_v32, %v3220_v34  ;;  %6329 = vmatprep.subr.msk.bf16.mxu0 %vm716_vm0, %v4573_v45  ;;  %v5873_v48 = vcombine.low %v7472_v59, %v7479_v1  ;;  %v5874_v50 = vcombine.low %v7495_v33, %v7500_v37  ;;  %v6131_v45 = vld [vmem:[%s7241_s27 + $0x94] sm:$0xf]  ;;  %v6987_v52 = vld [vmem:[%s7241_s27 + $0x3c] sm:$0xff]   ;;  %v6989_v60 = vld [vmem:[%s7241_s27 + $0x48] sm:$0xff]  }
  0x88   : > { %v6169_v49 = vcombine.low %v3218_v39, %v3221_v43  ;;  %v5875_v51 = vcombine.low %v7515_v53, %v7520_v0  ;;  %v5876_v54 = vcombine.low %v7541_v23, %v7546_v11  ;;  %v3227_v12 = vrot.slane %v6123_v46, 5  ;;  %v6129_v39 = vld [vmem:[%s7241_s27 + $0x8c] sm:$0x1]  ;;  %v7152_v46 = vld [vmem:[%s7241_s27 + $0x18] sm:$0xf]  ;;  %v6993_v59 = vld [vmem:[%s7241_s27 + $0x60] sm:$0xff]  }
  0x89   : > { %5859 = vmatmul.mubr.msk.bf16.gmra.mrb[52].mxu1 %vm667_vm3, %v5841_v40  ;;  %v6121_v40 = vld [vmem:[%s7241_s27 + $0x6c] sm:$0xe]  ;;  %v5877_v27 = vcombine.low %v7571_v15, %v7574_v19  ;;  %v5862_v58 = vcombine.low %v7148_v63, %v7149_v2  ;;  %v3231_v8 = vrot.slane %v6125_v61, 5  ;;  %v1571_v17 = vsel %vm716_vm0, %v7579_v20, 0  ;;  %v6130_v63 = vld [vmem:[%s7241_s27 + $0x90] sm:$0xe] }
  0x8a   : > { %895 = vmatprep.mubr.bf16.mxu1 %v7172_v4  ;;  %v6153_v55 = vrot.slane %v6121_v40, 9  ;;  %v1956_v9 = vcombine.high %v7663_v62, %v7663_v62  ;;  %v6154_v14 = vrot.slane %v6124_v10, 9  ;;  %v7150_v20 = vld [vmem:[%s7241_s27 + $0xc] sm:$0xf]  ;;  %v3245_v61 = vrot.slane %v6131_v45, 5  ;;  %v6991_v25 = vld [vmem:[%s7241_s27 + $0x54] sm:$0xff]  }
  0x8b   : > { %v3233_v21 = vrot.slane %v3231_v8, 4  ;;  %v5863_v32 = vcombine.low %v7150_v20, %v7151_v29  ;;  %v6132_v2 = vld [vmem:[%s7241_s27 + $0x98] sm:$0x1]  ;;  %v6134_v10 = vld [vmem:[%s7241_s27 + $0xa0] sm:$0xf] }
  0x8c   : > { %6185 = vmatmul.mubr.msk.bf16.gmra.mrb[20].mxu0 %vm667_vm3, %v6167_v56  ;;  %v3226_v56 = vrot.slane %v3224_v44, 4  ;;  %v3225_v3 = vsel %vm7421_vm7, %v6153_v55, %v3224_v44  ;;  %v3232_v34 = vsel %vm7421_vm7, %v6154_v14, %v3231_v8  ;;  %v3241_v44 = vrot.slane %v6129_v39, 5  ;;  %v6138_v45 = vld [vmem:[%s7241_s27 + $0xb0] sm:$0x1]  ;;  %v1253_v31 = vld [vmem:[%s7241_s27 + $0x4] sm:$0xf] }
  0x8d   : > { %3483 = vmatprep.mubr.bf16.mxu0 %v7172_v4  ;;  %v3248_v8 = vrot.slane %v6132_v2, 5  ;;  %v1353_v1 = vrot.slane %v1253_v31, 5  ;;  %v1252_v33 = vld [vmem:[%s7241_s27] sm:$0xe]  ;;  %v1254_v37 = vld [vmem:[%s7241_s27 + $0x8] sm:$0x1] }
  0x8e   : > { %v3228_v7 = vsel %vm7421_vm7, %v3226_v56, %v3227_v12  ;;  %v5896_v53 = vrot.slane %v1252_v33, 9  ;;  %v1269_v31 = vld [vmem:[%s7241_s27 + $0x44] sm:$0x1] }
  0x8f   : > { %v6170_v18 = vcombine.low %v3225_v3, %v3228_v7  ;;  %v6156_v3 = vrot.slane %v6130_v63, 9  ;;  %v3247_v7 = vrot.slane %v3245_v61, 4  ;;  %v7159_v63 = vld [vmem:[%s7241_s27 + $0x40] sm:$0xf]  ;;  %v1355_v0 = vrot.slane %v1353_v1, 4 }
  0x90   : > { %v1354_v23 = vsel %vm7421_vm7, %v5896_v53, %v1353_v1  ;;  %v1271_v53 = vld [vmem:[%s7241_s27 + $0x4c] sm:$0xf] }
  0x91   : > { %5860 = vmatmul.mubr.msk.bf16.gmra.mrb[56].mxu1 %vm667_vm3, %v5842_v16  ;;  %v6126_v16 = vld [vmem:[%s7241_s27 + $0x80] sm:$0x1]  ;;  %v3249_v14 = vsel %vm7421_vm7, %v3247_v7, %v3248_v8  ;;  %v6139_v8 = vld [vmem:[%s7241_s27 + $0xb4] sm:$0xe] }
  0x92   : > { %905 = vmatprep.mubr.bf16.mxu1 %v7172_v4  ;;  %v3234_v24 = vrot.slane %v6126_v16, 5  ;;  %v7154_v16 = vld [vmem:[%s7241_s27 + $0x24] sm:$0xf] }
  0x94   : > { %6186 = vmatmul.mubr.msk.bf16.gmra.mrb[24].mxu0 %vm667_vm3, %v6168_v26  ;;  %v6128_v26 = vld [vmem:[%s7241_s27 + $0x88] sm:$0xf]  ;;  %v3235_v36 = vsel %vm7421_vm7, %v3233_v21, %v3234_v24  ;;  %v3252_v21 = vrot.slane %v6134_v10, 5  ;;  %v6133_v24 = vld [vmem:[%s7241_s27 + $0x9c] sm:$0xe] }
  0x95   : > { %3493 = vmatprep.mubr.bf16.mxu0 %v7172_v4  ;;  %v3238_v35 = vrot.slane %v6128_v26, 5  ;;  %v6171_v40 = vcombine.low %v3232_v34, %v3235_v36  ;;  %v6135_v26 = vld [vmem:[%s7241_s27 + $0xa4] sm:$0x1]  ;;  %v6157_v29 = vrot.slane %v6133_v24, 9  ;;  %v6137_v36 = vld [vmem:[%s7241_s27 + $0xac] sm:$0xf] }
  0x96   : > { %v3255_v34 = vrot.slane %v6135_v26, 5  ;;  %v6141_v10 = vld [vmem:[%s7241_s27 + $0xbc] sm:$0x1]  ;;  %v7161_v24 = vld [vmem:[%s7241_s27 + $0x4c] sm:$0xf] }
  0x97   : > { %v3240_v43 = vrot.slane %v3238_v35, 4 }
  0x99   : > { %5861 = vmatmul.mubr.msk.bf16.gmra.mrb[60].mxu1 %vm667_vm3, %v5843_v41  ;;  %v6155_v41 = vrot.slane %v6127_v38, 9  ;;  %v3242_v12 = vsel %vm7421_vm7, %v3240_v43, %v3241_v44  ;;  %v7157_v38 = vld [vmem:[%s7241_s27 + $0x34] sm:$0xf]  ;;  %v3259_v43 = vrot.slane %v6137_v36, 5  ;;  %v6136_v44 = vld [vmem:[%s7241_s27 + $0xa8] sm:$0xe] }
  0x9a   : > { %1091 = vmatprep.mubr.bf16.mxu1 %v7172_v4  ;;  %v6144_v36 = vld [vmem:[%s7241_s27 + $0xc8] sm:$0x1] }
  0x9b   : > { %v3239_v56 = vsel %vm7421_vm7, %v6155_v41, %v3238_v35  ;;  %v7156_v35 = vld [vmem:[%s7241_s27 + $0x30] sm:$0xf] }
  0x9c   : > { %6187 = vmatmul.mubr.msk.bf16.gmra.mrb[28].mxu0 %vm667_vm3, %v6169_v49  ;;  %v7153_v49 = vld [vmem:[%s7241_s27 + $0x1c] sm:$0xf]  ;;  %v5866_v39 = vcombine.low %v7156_v35, %v7157_v38 }
  0x9d   : > { %3503 = vmatprep.mubr.bf16.mxu0 %v7172_v4  ;;  %v5864_v55 = vcombine.low %v7152_v46, %v7153_v49  ;;  %v6158_v49 = vrot.slane %v6136_v44, 9 }
  0xa1   : > { %5880 = vmatmul.mubr.msk.bf16.vlgmr.msra.gmra.mrb[0].mxu1 %vm667_vm3, %v5862_v58  ;;  %v6172_v58 = vcombine.low %v3239_v56, %v3242_v12  ;;  %v3262_v56 = vrot.slane %v6138_v45, 5  ;;  %v6140_v12 = vld [vmem:[%s7241_s27 + $0xb8] sm:$0xf] }
  0xa2   : > { %1577 = vmatpush1.bf16.msra.mxu1 %v1571_v17  ;;  %1101 = vmatprep.mubr.bf16.mxu1 %v7172_v4  ;;  %v7155_v17 = vld [vmem:[%s7241_s27 + $0x28] sm:$0xf]  ;;  %v3266_v7 = vrot.slane %v6140_v12, 5  ;;  %v6981_v12 = vld [vmem:[%s7241_s27 + $0x18] sm:$0xff]  }
  0xa3   : > { %5997 = vmatprep.subr.msk.bf16.mxu1 %vm716_vm0, %v1956_v9  ;;  %v5865_v9 = vcombine.low %v7154_v16, %v7155_v17  ;;  %v6159_v17 = vrot.slane %v6139_v8, 9 }
  0xa4   : > { %6188 = vmatmul.mubr.msk.bf16.gmra.mrb[32].mxu0 %vm667_vm3, %v6170_v18  ;;  %v3246_v18 = vsel %vm7421_vm7, %v6156_v3, %v3245_v61  ;;  %v7158_v61 = vld [vmem:[%s7241_s27 + $0x3c] sm:$0xf] }
  0xa5   : > { %3513 = vmatprep.mubr.bf16.mxu0 %v7172_v4  ;;  %v6173_v20 = vcombine.low %v3246_v18, %v3249_v14  ;;  %v5867_v2 = vcombine.low %v7158_v61, %v7159_v63  ;;  %v3269_v18 = vrot.slane %v6141_v10, 5  ;;  %v6143_v14 = vld [vmem:[%s7241_s27 + $0xc4] sm:$0xf]  ;;  %v4623_v61 = vsel %vm716_vm0, %v7622_v30, 0 }
  0xa6   : > { %v1356_v30 = vrot.slane %v1254_v37, 5  ;;  %v1391_v37 = vrot.slane %v1269_v31, 5 }
  0xa8   : > { %v1357_v11 = vsel %vm7421_vm7, %v1355_v0, %v1356_v30  ;;  %v7000_v0 = vld [vmem:[%s7241_s27 + $0xa8] sm:$0xff]  }
  0xa9   : > { %5881 = vmatmul.mubr.msk.bf16.gmra.mrb[4].mxu1 %vm667_vm3, %v5863_v32  ;;  %v3254_v32 = vrot.slane %v3252_v21, 4  ;;  %v5913_v15 = vcombine.low %v1354_v23, %v1357_v11  ;;  %v1270_v23 = vld [vmem:[%s7241_s27 + $0x48] sm:$0xe]  ;;  %v1272_v11 = vld [vmem:[%s7241_s27 + $0x50] sm:$0x1] }
  0xaa   : > { %1111 = vmatprep.mubr.bf16.mxu1 %v7172_v4 }
  0xab   : > { %v3256_v41 = vsel %vm7421_vm7, %v3254_v32, %v3255_v34  ;;  %v3273_v32 = vrot.slane %v6143_v14, 5  ;;  %v6142_v34 = vld [vmem:[%s7241_s27 + $0xc0] sm:$0xe] }
  0xac   : > { %6189 = vmatmul.mubr.msk.bf16.gmra.mrb[36].mxu0 %vm667_vm3, %v6171_v40  ;;  %v3253_v40 = vsel %vm7421_vm7, %v6157_v29, %v3252_v21  ;;  %v7160_v21 = vld [vmem:[%s7241_s27 + $0x48] sm:$0xf]  ;;  %v6160_v38 = vrot.slane %v6142_v34, 9 }
  0xad   : > { %3523 = vmatprep.mubr.bf16.mxu0 %v7172_v4  ;;  %v6174_v46 = vcombine.low %v3253_v40, %v3256_v41  ;;  %v5868_v26 = vcombine.low %v7160_v21, %v7161_v24  ;;  %v3276_v40 = vrot.slane %v6144_v36, 5  ;;  %v7162_v41 = vld [vmem:[%s7241_s27 + $0x54] sm:$0xf]  ;;  %v1262_v21 = vld [vmem:[%s7241_s27 + $0x28] sm:$0xf] }
  0xae   : > { %v3274_v45 = vsel %vm7421_vm7, %v6160_v38, %v3273_v32  ;;  %v6997_v24 = vld [vmem:[%s7241_s27 + $0x84] sm:$0xff]  }
  0xb1   : > { %5882 = vmatmul.mubr.msk.bf16.gmra.mrb[8].mxu1 %vm667_vm3, %v5864_v55  ;;  %v3261_v55 = vrot.slane %v3259_v43, 4 }
  0xb2   : > { %1121 = vmatprep.mubr.bf16.mxu1 %v7172_v4 }
  0xb3   : > { %v3263_v3 = vsel %vm7421_vm7, %v3261_v55, %v3262_v56  ;;  %v5870_v55 = vcombine.low %v7393_v22, %v7398_v28  ;;  %v7776_v56 = vld.sshfl [vmem:[%s8781_s1 + $0x20] sm:$0x33 pattern:$0x76325410]  ;;  %v6983_v22 = vld [vmem:[%s7241_s27 + $0x24] sm:$0xff]   ;;  %v6985_v28 = vld [vmem:[%s7241_s27 + $0x30] sm:$0xff]  }
  0xb4   : > { %6190 = vmatmul.mubr.msk.bf16.gmra.mrb[40].mxu0 %vm667_vm3, %v6172_v58  ;;  %v3260_v58 = vsel %vm7421_vm7, %v6158_v49, %v3259_v43  ;;  %v7163_v43 = vld [vmem:[%s7241_s27 + $0x58] sm:$0xf]  ;;  %v5151_v63 = vcombine.high %v7776_v56, %v7776_v56 }
  0xb5   : > { %3533 = vmatprep.mubr.bf16.mxu0 %v7172_v4  ;;  %v6175_v16 = vcombine.low %v3260_v58, %v3263_v3  ;;  %v5869_v44 = vcombine.low %v7162_v41, %v7163_v43  ;;  %v1259_v58 = vld [vmem:[%s7241_s27 + $0x1c] sm:$0xf] }
  0xb6   : > { %v6996_v3 = vld [vmem:[%s7241_s27 + $0x78] sm:$0xff]   ;;  %v1367_v10 = vrot.slane %v1259_v58, 5 }
  0xb7   : > { %v1275_v58 = vld [vmem:[%s7241_s27 + $0x5c] sm:$0x1] }
  0xb9   : > { %5883 = vmatmul.mubr.msk.bf16.gmra.mrb[12].mxu1 %vm667_vm3, %v5865_v9  ;;  %v3268_v9 = vrot.slane %v3266_v7, 4 }
  0xba   : > { %1131 = vmatprep.mubr.bf16.mxu1 %v7172_v4 }
  0xbb   : > { %v3270_v29 = vsel %vm7421_vm7, %v3268_v9, %v3269_v18  ;;  %v1369_v18 = vrot.slane %v1367_v10, 4 }
  0xbc   : > { %6191 = vmatmul.mubr.msk.bf16.gmra.mrb[44].mxu0 %vm667_vm3, %v6173_v20  ;;  %v3267_v20 = vsel %vm7421_vm7, %v6159_v17, %v3266_v7  ;;  %v1260_v17 = vld [vmem:[%s7241_s27 + $0x20] sm:$0x1] }
  0xbd   : > { %3543 = vmatprep.mubr.bf16.mxu0 %v7172_v4  ;;  %v6176_v35 = vcombine.low %v3267_v20, %v3270_v29  ;;  %v1370_v14 = vrot.slane %v1260_v17, 5  ;;  %v1374_v20 = vrot.slane %v1262_v21, 5  ;;  %v1261_v29 = vld [vmem:[%s7241_s27 + $0x24] sm:$0xe] }
  0xbe   : > { %v5899_v36 = vrot.slane %v1261_v29, 9 }
  0xc0   : > { %v1375_v41 = vsel %vm7421_vm7, %v5899_v36, %v1374_v20  ;;  %v6265_v36 = vld [vmem:[%s7241_s27 + $0x20] sm:$0x1] }
  0xc1   : > { %5884 = vmatmul.mubr.msk.bf16.gmra.mrb[16].mxu1 %vm667_vm3, %v5866_v39  ;;  %v3275_v39 = vrot.slane %v3273_v32, 4  ;;  %v1263_v32 = vld [vmem:[%s7241_s27 + $0x2c] sm:$0x1] }
  0xc2   : > { %1141 = vmatprep.mubr.bf16.mxu1 %v7172_v4  ;;  %v1377_v38 = vrot.slane %v1263_v32, 5 }
  0xc4   : > { %6192 = vmatmul.mubr.msk.bf16.gmra.mrb[48].mxu0 %vm667_vm3, %v6174_v46  ;;  %v3277_v46 = vsel %vm7421_vm7, %v3275_v39, %v3276_v40  ;;  %v1265_v39 = vld [vmem:[%s7241_s27 + $0x34] sm:$0xf] }
  0xc5   : > { %3553 = vmatprep.mubr.bf16.mxu0 %v7172_v4  ;;  %v6177_v49 = vcombine.low %v3274_v45, %v3277_v46  ;;  %v6998_v40 = vld [vmem:[%s7241_s27 + $0x90] sm:$0xff]   ;;  %v1266_v46 = vld [vmem:[%s7241_s27 + $0x38] sm:$0x1] }
  0xc6   : > { %v1264_v45 = vld [vmem:[%s7241_s27 + $0x30] sm:$0xe] }
  0xc9   : > { %5885 = vmatmul.mubr.msk.bf16.gmra.mrb[20].mxu1 %vm667_vm3, %v5867_v2  ;;  %v2006_v2 = vsel %vm716_vm0, %v7663_v62, 0 }
  0xca   : > { %1151 = vmatprep.mubr.bf16.mxu1 %v7172_v4 }
  0xcc   : > { %6193 = vmatmul.mubr.msk.bf16.gmra.mrb[52].mxu0 %vm667_vm3, %v6175_v16  ;;  %v1258_v16 = vld [vmem:[%s7241_s27 + $0x18] sm:$0xe] }
  0xcd   : > { %3563 = vmatprep.mubr.bf16.mxu0 %v7172_v4  ;;  %v5898_v9 = vrot.slane %v1258_v16, 9 }
  0xd1   : > { %5886 = vmatmul.mubr.msk.bf16.gmra.mrb[24].mxu1 %vm667_vm3, %v5868_v26  ;;  %v1368_v26 = vsel %vm7421_vm7, %v5898_v9, %v1367_v10 }
  0xd2   : > { %1161 = vmatprep.mubr.bf16.mxu1 %v7172_v4 }
  0xd4   : > { %6194 = vmatmul.mubr.msk.bf16.gmra.mrb[56].mxu0 %vm667_vm3, %v6176_v35  ;;  %v1376_v35 = vrot.slane %v1374_v20, 4  ;;  %v7002_v20 = vld [vmem:[%s7241_s27 + $0xc0] sm:$0xff]  }
  0xd5   : > { %3573 = vmatprep.mubr.bf16.mxu0 %v7172_v4 }
  0xd6   : > { %v1378_v43 = vsel %vm7421_vm7, %v1376_v35, %v1377_v38 }
  0xd9   : > { %5887 = vmatmul.mubr.msk.bf16.gmra.mrb[28].mxu1 %vm667_vm3, %v5869_v44  ;;  %v1381_v44 = vrot.slane %v1265_v39, 5 }
  0xda   : > { %1171 = vmatprep.mubr.bf16.mxu1 %v7172_v4 }
  0xdc   : > { %6195 = vmatmul.mubr.msk.bf16.gmra.mrb[60].mxu0 %vm667_vm3, %v6177_v49  ;;  %v5916_v49 = vcombine.low %v1375_v41, %v1378_v43  ;;  %v1276_v41 = vld [vmem:[%s7241_s27 + $0x60] sm:$0xe] }
  0xdd   : > { %3858 = vmatprep.mubr.bf16.mxu0 %v7172_v4 }
  0xe1   : > { %5888 = vmatmul.mubr.msk.bf16.gmra.mrb[32].mxu1 %vm667_vm3, %v5870_v55  ;;  %v5900_v55 = vrot.slane %v1264_v45, 9 }
  0xe2   : > { %1181 = vmatprep.mubr.bf16.mxu1 %v7172_v4 }
  0xe4   : > { %6247 = vmatmul.mubr.msk.bf16.vlgmr.msra.gmra.mrb[0].mxu0 %vm667_vm3, %v6981_v12  ;;  %v1383_v12 = vrot.slane %v1381_v44, 4 }
  0xe5   : > { %4629 = vmatpush1.bf16.msra.mxu0 %v4623_v61  ;;  %3868 = vmatprep.mubr.bf16.mxu0 %v7172_v4  ;;  %v1384_v61 = vrot.slane %v1266_v46, 5  ;;  %v1278_v46 = vld [vmem:[%s7241_s27 + $0x68] sm:$0x1] }
  0xe6   : > { %6428 = vmatprep.subr.msk.bf16.mxu0 %vm716_vm0, %v5151_v63  ;;  %v1268_v63 = vld [vmem:[%s7241_s27 + $0x40] sm:$0xf] }
  0xe9   : > { %5889 = vmatmul.mubr.msk.bf16.gmra.mrb[36].mxu1 %vm667_vm3, %v5871_v47  ;;  %v1256_v47 = vld [vmem:[%s7241_s27 + $0x10] sm:$0xf] }
  0xea   : > { %1191 = vmatprep.mubr.bf16.mxu1 %v7172_v4 }
  0xec   : > { %6248 = vmatmul.mubr.msk.bf16.gmra.mrb[4].mxu0 %vm667_vm3, %v6983_v22  ;;  %v6999_v22 = vld [vmem:[%s7241_s27 + $0x9c] sm:$0xff]  }
  0xed   : > { %3878 = vmatprep.mubr.bf16.mxu0 %v7172_v4 }
  0xf1   : > { %5890 = vmatmul.mubr.msk.bf16.gmra.mrb[40].mxu1 %vm667_vm3, %v5872_v13  ;;  %v6995_v13 = vld [vmem:[%s7241_s27 + $0x6c] sm:$0xff]  }
  0xf2   : > { %1201 = vmatprep.mubr.bf16.mxu1 %v7172_v4 }
  0xf4   : > { %6249 = vmatmul.mubr.msk.bf16.gmra.mrb[8].mxu0 %vm667_vm3, %v6985_v28  ;;  %v1382_v28 = vsel %vm7421_vm7, %v5900_v55, %v1381_v44 }
  0xf5   : > { %3888 = vmatprep.mubr.bf16.mxu0 %v7172_v4 }
  0xf9   : > { %5891 = vmatmul.mubr.msk.bf16.gmra.mrb[44].mxu1 %vm667_vm3, %v5873_v48  ;;  %v1360_v48 = vrot.slane %v1256_v47, 5 }
  0xfa   : > { %1211 = vmatprep.mubr.bf16.mxu1 %v7172_v4 }
  0xfc   : > { %6250 = vmatmul.mubr.msk.bf16.gmra.mrb[12].mxu0 %vm667_vm3, %v6987_v52  ;;  %v1385_v52 = vsel %vm7421_vm7, %v1383_v12, %v1384_v61  ;;  %v5904_v61 = vrot.slane %v1276_v41, 9 }
  0xfd   : > { %3898 = vmatprep.mubr.bf16.mxu0 %v7172_v4 }
 0x101   : > { %5892 = vmatmul.mubr.msk.bf16.gmra.mrb[48].mxu1 %vm667_vm3, %v5874_v50  ;;  %v1255_v50 = vld [vmem:[%s7241_s27 + $0xc] sm:$0xe] }
 0x102   : > { %1221 = vmatprep.mubr.bf16.mxu1 %v7172_v4  ;;  %v5897_v19 = vrot.slane %v1255_v50, 9 }
 0x104   : > { %6251 = vmatmul.mubr.msk.bf16.gmra.mrb[16].mxu0 %vm667_vm3, %v6989_v60  ;;  %v1361_v7 = vsel %vm7421_vm7, %v5897_v19, %v1360_v48  ;;  %v1388_v60 = vrot.slane %v1268_v63, 5  ;;  %v1398_v19 = vrot.slane %v1272_v11, 5 }
 0x105   : > { %3908 = vmatprep.mubr.bf16.mxu0 %v7172_v4 }
 0x106   : > { %v1390_v33 = vrot.slane %v1388_v60, 4 }
 0x108   : > { %v1392_v47 = vsel %vm7421_vm7, %v1390_v33, %v1391_v37 }
 0x109   : > { %5893 = vmatmul.mubr.msk.bf16.gmra.mrb[52].mxu1 %vm667_vm3, %v5875_v51  ;;  %v1257_v51 = vld [vmem:[%s7241_s27 + $0x14] sm:$0x1] }
 0x10a   : > { %1231 = vmatprep.mubr.bf16.mxu1 %v7172_v4 }
 0x10c   : > { %6252 = vmatmul.mubr.msk.bf16.gmra.mrb[20].mxu0 %vm667_vm3, %v6991_v25  ;;  %v1267_v25 = vld [vmem:[%s7241_s27 + $0x3c] sm:$0xe] }
 0x10d   : > { %3918 = vmatprep.mubr.bf16.mxu0 %v7172_v4  ;;  %v5901_v1 = vrot.slane %v1267_v25, 9 }
 0x10f   : > { %v1389_v30 = vsel %vm7421_vm7, %v5901_v1, %v1388_v60  ;;  %v1412_v60 = vrot.slane %v1278_v46, 5  ;;  %v6268_v1 = vld [vmem:[%s7241_s27 + $0x2c] sm:$0x1] }
 0x110   : > { %v5918_v50 = vcombine.low %v1389_v30, %v1392_v47  ;;  %v7003_v30 = vld [vmem:[%s7241_s27 + $0xcc] sm:$0xff]  }
 0x111   : > { %5894 = vmatmul.mubr.msk.bf16.gmra.mrb[56].mxu1 %vm667_vm3, %v5876_v54  ;;  %v1362_v54 = vrot.slane %v1360_v48, 4  ;;  %v1274_v48 = vld [vmem:[%s7241_s27 + $0x58] sm:$0xf] }
 0x112   : > { %1241 = vmatprep.mubr.bf16.mxu1 %v7172_v4 }
 0x114   : > { %6253 = vmatmul.mubr.msk.bf16.gmra.mrb[24].mxu0 %vm667_vm3, %v6993_v59  ;;  %v5917_v59 = vcombine.low %v1382_v28, %v1385_v52  ;;  %v4151_v28 = vshll.u32 %v6265_v36, 16 }
 0x115   : > { %3928 = vmatprep.mubr.bf16.mxu0 %v7172_v4 }
 0x116   : > { %v4153_v11 = vrot.slane %v4151_v28, 5 }
 0x119   : > { %5895 = vmatmul.mubr.msk.bf16.gmra.mrb[60].mxu1 %vm667_vm3, %v5877_v27  ;;  %v1363_v27 = vrot.slane %v1257_v51, 5  ;;  %v5902_v51 = vrot.slane %v1270_v23, 9 }
 0x11a   : > { %1608 = vmatprep.mubr.bf16.mxu1 %v7172_v4 }
 0x11b   : > { %v1364_v8 = vsel %vm7421_vm7, %v1362_v54, %v1363_v27  ;;  %v1402_v54 = vrot.slane %v1274_v48, 5  ;;  %v7001_v27 = vld [vmem:[%s7241_s27 + $0xb4] sm:$0xff]  }
 0x11c   : > { %6254 = vmatmul.mubr.msk.bf16.gmra.mrb[28].mxu0 %vm667_vm3, %v6995_v13  ;;  %v5914_v62 = vcombine.low %v1361_v7, %v1364_v8  ;;  %v1395_v13 = vrot.slane %v1271_v53, 5  ;;  %v6264_v7 = vld [vmem:[%s7241_s27 + $0x1c] sm:$0xf]  ;;  %v6269_v53 = vld [vmem:[%s7241_s27 + $0x30] sm:$0xf] }
 0x11d   : > { %3938 = vmatprep.mubr.bf16.mxu0 %v7172_v4  ;;  %v1404_v17 = vrot.slane %v1402_v54, 4  ;;  %v4145_v21 = vshrl.u32 %v6264_v7, 16 }
 0x11e   : > { %v1396_v8 = vsel %vm7421_vm7, %v5902_v51, %v1395_v13 }
 0x121   : > { %5931 = vmatmul.mubr.msk.bf16.vlgmr.msra.gmra.mrb[0].mxu1 %vm667_vm3, %v5913_v15  ;;  %v1397_v15 = vrot.slane %v1395_v13, 4 }
 0x122   : > { %2012 = vmatpush1.bf16.msra.mxu1 %v2006_v2  ;;  %1618 = vmatprep.mubr.bf16.mxu1 %v7172_v4  ;;  %v1273_v2 = vld [vmem:[%s7241_s27 + $0x54] sm:$0xe] }
 0x123   : > { %6448 = vmatprep.subr.msk.bf16.mxu1 %vm716_vm0, %v7210_v5  ;;  %v1371_v5 = vsel %vm7421_vm7, %v1369_v18, %v1370_v14  ;;  %v1399_v10 = vsel %vm7421_vm7, %v1397_v15, %v1398_v19  ;;  %v5903_v16 = vrot.slane %v1273_v2, 9  ;;  %v4141_v14 = vshll.u32 %v6264_v7, 16 }
 0x124   : > { %6255 = vmatmul.mubr.msk.bf16.gmra.mrb[32].mxu0 %vm667_vm3, %v6996_v3  ;;  %v5915_v34 = vcombine.low %v1368_v26, %v1371_v5  ;;  %v6263_v3 = vld [vmem:[%s7241_s27 + $0x18] sm:$0xf]  ;;  %v1277_v26 = vld [vmem:[%s7241_s27 + $0x64] sm:$0xf]  ;;  %v4175_v19 = vshll.u32 %v6268_v1, 16  ;;  %v4180_v2 = vshrl.u32 %v6269_v53, 16 }
 0x125   : > { %3948 = vmatprep.mubr.bf16.mxu0 %v7172_v4  ;;  %v4132_v9 = vshrl.u32 %v6263_v3, 16  ;;  %v4135_v18 = vshll.u32 %v6263_v3, 16  ;;  %v6266_v5 = vld [vmem:[%s7241_s27 + $0x24] sm:$0xf]  ;;  %v1403_v29 = vsel %vm7421_vm7, %v5903_v16, %v1402_v54  ;;  %v7941_v39 = vrot.slane %v4141_v14, 5 }
 0x126   : > { %v1409_v43 = vrot.slane %v1277_v26, 5  ;;  %v4156_v44 = vshrl.u32 %v6266_v5, 16  ;;  %v4159_v45 = vshll.u32 %v6266_v5, 16  ;;  %v1281_v54 = vld [vmem:[%s7241_s27 + $0x74] sm:$0x1]  ;;  %v4182_v26 = vrot.slane %v4180_v2, 4 }
 0x127   : > { %v4134_v35 = vrot.slane %v4132_v9, 4  ;;  %v4137_v38 = vrot.slane %v4135_v18, 5  ;;  %v1419_v18 = vrot.slane %v1281_v54, 5  ;;  %v1286_v1 = vld [vmem:[%s7241_s27 + $0x88] sm:$0xf] }
 0x128   : > { %v1411_v52 = vrot.slane %v1409_v43, 4  ;;  %v4158_v25 = vrot.slane %v4156_v44, 4  ;;  %v4161_v31 = vrot.slane %v4159_v45, 5  ;;  %v1410_v47 = vsel %vm7421_vm7, %v5904_v61, %v1409_v43  ;;  %v6272_v43 = vld [vmem:[%s7241_s27 + $0x3c] sm:$0xf] }
 0x129   : > { %5932 = vmatmul.mubr.msk.bf16.gmra.mrb[4].mxu1 %vm667_vm3, %v5914_v62  ;;  %v1405_v62 = vrot.slane %v1275_v58, 5  ;;  %v4138_v63 = vor.u32 %v4137_v38, %v4134_v35  ;;  %v4183_v58 = vshll.u32 %v6269_v53, 16  ;;  %v6271_v38 = vld [vmem:[%s7241_s27 + $0x38] sm:$0x1]  ;;  %v6273_v44 = vld [vmem:[%s7241_s27 + $0x40] sm:$0xf] }
 0x12a   : > { %1628 = vmatprep.mubr.bf16.mxu1 %v7172_v4  ;;  %v1413_v48 = vsel %vm7421_vm7, %v1411_v52, %v1412_v60  ;;  %v4162_v15 = vor.u32 %v4161_v31, %v4158_v25  ;;  %v4207_v28 = vshll.u32 %v6272_v43, 16  ;;  %v4213_v52 = vshll.u32 %v6273_v44, 16 }
 0x12b   : > { %v1406_v32 = vsel %vm7421_vm7, %v1404_v17, %v1405_v62  ;;  %v4139_v13 = vrot.slane %v4138_v63, 4  ;;  %v1283_v62 = vld [vmem:[%s7241_s27 + $0x7c] sm:$0xf]  ;;  %v4185_v5 = vrot.slane %v4183_v58, 5  ;;  %v4199_v63 = vshll.u32 %v6271_v38, 16 }
 0x12c   : > { %6256 = vmatmul.mubr.msk.bf16.gmra.mrb[36].mxu0 %vm667_vm3, %v6997_v24  ;;  %v5919_v24 = vcombine.low %v1396_v8, %v1399_v10  ;;  %v5920_v12 = vcombine.low %v1403_v29, %v1406_v32  ;;  %v5921_v8 = vcombine.low %v1410_v47, %v1413_v48  ;;  %v4163_v14 = vrot.slane %v4162_v15, 4  ;;  %v1282_v29 = vld [vmem:[%s7241_s27 + $0x78] sm:$0xe]  ;;  %v1284_v32 = vld [vmem:[%s7241_s27 + $0x80] sm:$0x1] }
 0x12d   : > { %3958 = vmatprep.mubr.bf16.mxu0 %v7172_v4  ;;  %v4144_v10 = vsel %vm7262_vm4, %v4139_v13, %v7941_v39  ;;  %v4217_v60 = vshrl.u32 %v6273_v44, 16  ;;  %v6276_v47 = vld [vmem:[%s7241_s27 + $0x4c] sm:$0xf]  ;;  %v6274_v13 = vld [vmem:[%s7241_s27 + $0x44] sm:$0x1]  ;;  %v8005_v48 = vrot.slane %v4213_v52, 5 }
 0x12e   : > { %v1430_v15 = vrot.slane %v1286_v1, 5  ;;  %v4237_v2 = vshll.u32 %v6276_v47, 16  ;;  %v4241_v58 = vshrl.u32 %v6276_v47, 16  ;;  %v6279_v38 = vld [vmem:[%s7241_s27 + $0x58] sm:$0xf] }
 0x131   : > { %5933 = vmatmul.mubr.msk.bf16.gmra.mrb[8].mxu1 %vm667_vm3, %v5915_v34  ;;  %v6267_v34 = vld [vmem:[%s7241_s27 + $0x28] sm:$0xf] }
 0x132   : > { %1638 = vmatprep.mubr.bf16.mxu1 %v7172_v4  ;;  %v4169_v55 = vshrl.u32 %v6267_v34, 16 }
 0x134   : > { %6257 = vmatmul.mubr.msk.bf16.gmra.mrb[40].mxu0 %vm667_vm3, %v6998_v40  ;;  %v4147_v40 = vrot.slane %v4145_v21, 4  ;;  %v4171_v37 = vrot.slane %v4169_v55, 4  ;;  %v4177_v21 = vrot.slane %v4175_v19, 5 }
 0x135   : > { %3968 = vmatprep.mubr.bf16.mxu0 %v7172_v4 }
 0x139   : > { %5934 = vmatmul.mubr.msk.bf16.gmra.mrb[12].mxu1 %vm667_vm3, %v5916_v49  ;;  %v4165_v49 = vshll.u32 %v6267_v34, 16  ;;  %v1423_v34 = vrot.slane %v1283_v62, 5  ;;  %v4223_v62 = vshll.u32 %v6274_v13, 16 }
 0x13a   : > { %1648 = vmatprep.mubr.bf16.mxu1 %v7172_v4 }
 0x13b   : > { %v7952_v33 = vrot.slane %v4165_v49, 5  ;;  %v5906_v49 = vrot.slane %v1282_v29, 9  ;;  %v1425_v55 = vrot.slane %v1423_v34, 4  ;;  %v6278_v29 = vld [vmem:[%s7241_s27 + $0x54] sm:$0xf] }
 0x13c   : > { %6258 = vmatmul.mubr.msk.bf16.gmra.mrb[44].mxu0 %vm667_vm3, %v6999_v22  ;;  %v4148_v22 = vor.u32 %v4147_v40, %v7941_v39  ;;  %v5201_v39 = vsel %vm716_vm0, %v7776_v56, 0  ;;  %v1426_v56 = vrot.slane %v1284_v32, 5 }
 0x13d   : > { %3978 = vmatprep.mubr.bf16.mxu0 %v7172_v4  ;;  %v4168_v45 = vsel %vm7262_vm4, %v4163_v14, %v7952_v33 }
 0x13e   : > { %v4149_v23 = vrot.slane %v4148_v22, 4  ;;  %v4204_v22 = vshrl.u32 %v6272_v43, 16 }
 0x140   : > { %v4154_v16 = vsel %vm7262_vm4, %v4149_v23, %v4153_v11  ;;  %v4206_v23 = vrot.slane %v4204_v22, 4  ;;  %v4209_v11 = vrot.slane %v4207_v28, 5 }
 0x141   : > { %5935 = vmatmul.mubr.msk.bf16.gmra.mrb[16].mxu1 %vm667_vm3, %v5917_v59  ;;  %v1280_v59 = vld [vmem:[%s7241_s27 + $0x70] sm:$0xf]  ;;  %v6312_v35 = vcombine.low %v4144_v10, %v4154_v16 }
 0x142   : > { %1658 = vmatprep.mubr.bf16.mxu1 %v7172_v4  ;;  %v1416_v51 = vrot.slane %v1280_v59, 5  ;;  %v1424_v59 = vsel %vm7421_vm7, %v5906_v49, %v1423_v34  ;;  %v4210_v16 = vor.u32 %v4209_v11, %v4206_v23  ;;  %v1291_v23 = vld [vmem:[%s7241_s27 + $0x9c] sm:$0xe] }
 0x144   : > { %6259 = vmatmul.mubr.msk.bf16.gmra.mrb[48].mxu0 %vm667_vm3, %v7000_v0  ;;  %v6270_v0 = vld [vmem:[%s7241_s27 + $0x34] sm:$0xf]  ;;  %v1418_v9 = vrot.slane %v1416_v51, 4  ;;  %v4211_v34 = vrot.slane %v4210_v16, 4 }
 0x145   : > { %3988 = vmatprep.mubr.bf16.mxu0 %v7172_v4  ;;  %v4189_v3 = vshll.u32 %v6270_v0, 16  ;;  %v4193_v7 = vshrl.u32 %v6270_v0, 16 }
 0x146   : > { %v1420_v41 = vsel %vm7421_vm7, %v1418_v9, %v1419_v18  ;;  %v1432_v9 = vrot.slane %v1430_v15, 4  ;;  %v4216_v22 = vsel %vm7262_vm4, %v4211_v34, %v8005_v48 }
 0x147   : > { %v4195_v36 = vrot.slane %v4193_v7, 4 }
 0x149   : > { %5936 = vmatmul.mubr.msk.bf16.gmra.mrb[20].mxu1 %vm667_vm3, %v5918_v50  ;;  %v1279_v50 = vld [vmem:[%s7241_s27 + $0x6c] sm:$0xe] }
 0x14a   : > { %1668 = vmatprep.mubr.bf16.mxu1 %v7172_v4  ;;  %v5905_v17 = vrot.slane %v1279_v50, 9  ;;  %v4219_v50 = vrot.slane %v4217_v60, 4 }
 0x14c   : > { %6260 = vmatmul.mubr.msk.bf16.gmra.mrb[52].mxu0 %vm667_vm3, %v7001_v27  ;;  %v4172_v27 = vor.u32 %v4171_v37, %v7952_v33  ;;  %v1417_v40 = vsel %vm7421_vm7, %v5905_v17, %v1416_v51  ;;  %v6275_v33 = vld [vmem:[%s7241_s27 + $0x48] sm:$0xf]  ;;  %v1427_v37 = vsel %vm7421_vm7, %v1425_v55, %v1426_v56  ;;  %v1285_v51 = vld [vmem:[%s7241_s27 + $0x84] sm:$0xe]  ;;  %v4220_v17 = vor.u32 %v4219_v50, %v8005_v48  ;;  %v6281_v48 = vld [vmem:[%s7241_s27 + $0x60] sm:$0xf] }
 0x14d   : > { %3998 = vmatprep.mubr.bf16.mxu0 %v7172_v4  ;;  %v5922_v25 = vcombine.low %v1417_v40, %v1420_v41  ;;  %v4228_v19 = vshrl.u32 %v6275_v33, 16  ;;  %v4231_v54 = vshll.u32 %v6275_v33, 16  ;;  %v5907_v10 = vrot.slane %v1285_v51, 9  ;;  %v1288_v41 = vld [vmem:[%s7241_s27 + $0x90] sm:$0xe] }
 0x14e   : > { %v4252_v56 = vshrl.u32 %v6278_v29, 16  ;;  %v4255_v55 = vshll.u32 %v6278_v29, 16  ;;  %v5908_v52 = vrot.slane %v1288_v41, 9  ;;  %v6284_v41 = vld [vmem:[%s7241_s27 + $0x6c] sm:$0xf] }
 0x14f   : > { %v4230_v14 = vrot.slane %v4228_v19, 4  ;;  %v6282_v19 = vld [vmem:[%s7241_s27 + $0x64] sm:$0xf] }
 0x151   : > { %5937 = vmatmul.mubr.msk.bf16.gmra.mrb[24].mxu1 %vm667_vm3, %v5919_v24  ;;  %v4173_v24 = vrot.slane %v4172_v27, 4  ;;  %v1287_v27 = vld [vmem:[%s7241_s27 + $0x8c] sm:$0x1] }
 0x152   : > { %1678 = vmatprep.mubr.bf16.mxu1 %v7172_v4  ;;  %v1433_v18 = vrot.slane %v1287_v27, 5 }
 0x153   : > { %v4178_v46 = vsel %vm7262_vm4, %v4173_v24, %v4177_v21  ;;  %v4233_v21 = vrot.slane %v4231_v54, 5  ;;  %v1289_v24 = vld [vmem:[%s7241_s27 + $0x94] sm:$0xf] }
 0x154   : > { %6261 = vmatmul.mubr.msk.bf16.gmra.mrb[56].mxu0 %vm667_vm3, %v7002_v20  ;;  %v7974_v20 = vrot.slane %v4189_v3, 5  ;;  %v6313_v31 = vcombine.low %v4168_v45, %v4178_v46  ;;  %v5923_v3 = vcombine.low %v1424_v59, %v1427_v37  ;;  %v1434_v40 = vsel %vm7421_vm7, %v1432_v9, %v1433_v18  ;;  %v1290_v45 = vld [vmem:[%s7241_s27 + $0x98] sm:$0x1]  ;;  %v1292_v59 = vld [vmem:[%s7241_s27 + $0xa0] sm:$0xf] }
 0x155   : > { %4008 = vmatprep.mubr.bf16.mxu0 %v7172_v4  ;;  %v1437_v43 = vrot.slane %v1289_v24, 5  ;;  %v4234_v44 = vor.u32 %v4233_v21, %v4230_v14  ;;  %v4254_v37 = vrot.slane %v4252_v56, 4  ;;  %v1444_v11 = vrot.slane %v1292_v59, 5  ;;  %v1295_v24 = vld [vmem:[%s7241_s27 + $0xac] sm:$0xf] }
 0x156   : > { %v4196_v61 = vor.u32 %v4195_v36, %v7974_v20  ;;  %v4221_v36 = vrot.slane %v4220_v17, 4  ;;  %v4289_v9 = vshrl.u32 %v6282_v19, 16 }
 0x157   : > { %v1439_v60 = vrot.slane %v1437_v43, 4  ;;  %v1438_v50 = vsel %vm7421_vm7, %v5908_v52, %v1437_v43  ;;  %v1446_v16 = vrot.slane %v1444_v11, 4 }
 0x158   : > { %v4197_v0 = vrot.slane %v4196_v61, 4  ;;  %v4265_v61 = vshrl.u32 %v6279_v38, 16 }
 0x159   : > { %5938 = vmatmul.mubr.msk.bf16.gmra.mrb[28].mxu1 %vm667_vm3, %v5920_v12  ;;  %v4186_v12 = vor.u32 %v4185_v5, %v4182_v26  ;;  %v8020_v26 = vrot.slane %v4237_v2, 5  ;;  %v4243_v5 = vrot.slane %v4241_v58, 4 }
 0x15a   : > { %1688 = vmatprep.mubr.bf16.mxu1 %v7172_v4  ;;  %v4267_v47 = vrot.slane %v4265_v61, 4 }
 0x15b   : > { %v4187_v53 = vrot.slane %v4186_v12, 4  ;;  %v4244_v46 = vor.u32 %v4243_v5, %v8020_v26  ;;  %v4261_v12 = vshll.u32 %v6279_v38, 16  ;;  %v4291_v38 = vrot.slane %v4289_v9, 4 }
 0x15c   : > { %6262 = vmatmul.mubr.msk.bf16.gmra.mrb[60].mxu0 %vm667_vm3, %v7003_v30  ;;  %v4201_v30 = vrot.slane %v4199_v63, 5 }
 0x15d   : > { %4660 = vmatprep.mubr.bf16.mxu0 %v7172_v4  ;;  %v4192_v7 = vsel %vm7262_vm4, %v4187_v53, %v7974_v20  ;;  %v6277_v20 = vld [vmem:[%s7241_s27 + $0x50] sm:$0x1]  ;;  %v4245_v1 = vrot.slane %v4244_v46, 4  ;;  %v4257_v53 = vrot.slane %v4255_v55, 5 }
 0x15e   : > { %v4247_v49 = vshll.u32 %v6277_v20, 16 }
 0x15f   : > { %v4258_v2 = vor.u32 %v4257_v53, %v4254_v37  ;;  %v6287_v37 = vld [vmem:[%s7241_s27 + $0x78] sm:$0xf]  ;;  %v6288_v53 = vld [vmem:[%s7241_s27 + $0x7c] sm:$0xf] }
 0x160   : > { %v4249_v33 = vrot.slane %v4247_v49, 5 }
 0x161   : > { %5939 = vmatmul.mubr.msk.bf16.gmra.mrb[32].mxu1 %vm667_vm3, %v5921_v8  ;;  %v4202_v8 = vsel %vm7262_vm4, %v4197_v0, %v4201_v30  ;;  %v6280_v0 = vld [vmem:[%s7241_s27 + $0x5c] sm:$0x1]  ;;  %v8043_v30 = vrot.slane %v4261_v12, 5  ;;  %v4259_v21 = vrot.slane %v4258_v2, 4  ;;  %v4333_v2 = vshll.u32 %v6288_v53, 16 }
 0x162   : > { %1698 = vmatprep.mubr.bf16.mxu1 %v7172_v4  ;;  %v6314_v32 = vcombine.low %v4192_v7, %v4202_v8  ;;  %v4250_v27 = vsel %vm7262_vm4, %v4245_v1, %v4249_v33  ;;  %v4271_v58 = vshll.u32 %v6280_v0, 16  ;;  %v4276_v8 = vshrl.u32 %v6281_v48, 16 }
 0x163   : > { %v4268_v7 = vor.u32 %v4267_v47, %v8043_v30  ;;  %v4264_v43 = vsel %vm7262_vm4, %v4259_v21, %v8043_v30  ;;  %v6286_v47 = vld [vmem:[%s7241_s27 + $0x74] sm:$0x1] }
 0x164   : > { %6330 = vmatmul.mubr.msk.bf16.vlgmr.msra.gmra.mrb[0].mxu0 %vm667_vm3, %v6312_v35  ;;  %v4225_v35 = vrot.slane %v4223_v62, 5  ;;  %v4285_v62 = vshll.u32 %v6282_v19, 16  ;;  %v4273_v5 = vrot.slane %v4271_v58, 5  ;;  %v4278_v20 = vrot.slane %v4276_v8, 4  ;;  %v1299_v19 = vld [vmem:[%s7241_s27 + $0xbc] sm:$0x1] }
 0x165   : > { %5207 = vmatpush1.bf16.msra.mxu0 %v5201_v39  ;;  %4670 = vmatprep.mubr.bf16.mxu0 %v7172_v4  ;;  %v1431_v39 = vsel %vm7421_vm7, %v5907_v10, %v1430_v15  ;;  %v1293_v15 = vld [vmem:[%s7241_s27 + $0xa4] sm:$0x1]  ;;  %v4279_v10 = vshll.u32 %v6281_v48, 16  ;;  %v1297_v48 = vld [vmem:[%s7241_s27 + $0xb4] sm:$0xe]  ;;  %v4337_v58 = vshrl.u32 %v6288_v53, 16 }
 0x166   : > { %v5924_v63 = vcombine.low %v1431_v39, %v1434_v40  ;;  %v4226_v28 = vsel %vm7262_vm4, %v4221_v36, %v4225_v35  ;;  %v1447_v17 = vrot.slane %v1293_v15, 5  ;;  %v6283_v36 = vld [vmem:[%s7241_s27 + $0x68] sm:$0x1]  ;;  %v8069_v35 = vrot.slane %v4285_v62, 5  ;;  %v1294_v39 = vld [vmem:[%s7241_s27 + $0xa8] sm:$0xe] }
 0x167   : > { %v6315_v13 = vcombine.low %v4216_v22, %v4226_v28  ;;  %v4281_v29 = vrot.slane %v4279_v10, 5  ;;  %v1451_v40 = vrot.slane %v1295_v24, 5  ;;  %v4295_v55 = vshll.u32 %v6283_v36, 16 }
 0x168   : > { %v1448_v34 = vsel %vm7421_vm7, %v1446_v16, %v1447_v17  ;;  %v5910_v12 = vrot.slane %v1294_v39, 9  ;;  %v4292_v61 = vor.u32 %v4291_v38, %v8069_v35  ;;  %v4303_v22 = vshll.u32 %v6284_v41, 16 }
 0x169   : > { %5940 = vmatmul.mubr.msk.bf16.gmra.mrb[36].mxu1 %vm667_vm3, %v5922_v25  ;;  %v1440_v25 = vrot.slane %v1290_v45, 5  ;;  %v6285_v45 = vld [vmem:[%s7241_s27 + $0x70] sm:$0xf]  ;;  %v4282_v56 = vor.u32 %v4281_v29, %v4278_v20  ;;  %v1453_v28 = vrot.slane %v1451_v40, 4  ;;  %v4297_v33 = vrot.slane %v4295_v55, 5 }
 0x16a   : > { %1708 = vmatprep.mubr.bf16.mxu1 %v7172_v4  ;;  %v1452_v0 = vsel %vm7421_vm7, %v5910_v12, %v1451_v40  ;;  %v4293_v30 = vrot.slane %v4292_v61, 4  ;;  %v4319_v16 = vshll.u32 %v6286_v47, 16  ;;  %v5911_v17 = vrot.slane %v1297_v48, 9  ;;  %v6290_v29 = vld [vmem:[%s7241_s27 + $0x84] sm:$0xf] }
 0x16b   : > { %v1441_v51 = vsel %vm7421_vm7, %v1439_v60, %v1440_v25  ;;  %v4309_v60 = vshll.u32 %v6285_v45, 16  ;;  %v4313_v25 = vshrl.u32 %v6285_v45, 16  ;;  %v4283_v1 = vrot.slane %v4282_v56, 4 }
 0x16c   : > { %6331 = vmatmul.mubr.msk.bf16.gmra.mrb[4].mxu0 %vm667_vm3, %v6313_v31  ;;  %v4235_v31 = vrot.slane %v4234_v44, 4  ;;  %v5925_v18 = vcombine.low %v1438_v50, %v1441_v51  ;;  %v1296_v44 = vld [vmem:[%s7241_s27 + $0xb0] sm:$0x1]  ;;  %v4298_v8 = vsel %vm7262_vm4, %v4293_v30, %v4297_v33  ;;  %v1461_v9 = vrot.slane %v1299_v19, 5  ;;  %v6294_v33 = vld [vmem:[%s7241_s27 + $0x94] sm:$0xf] }
 0x16d   : > { %4680 = vmatprep.mubr.bf16.mxu0 %v7172_v4  ;;  %v1454_v52 = vrot.slane %v1296_v44, 5  ;;  %v4311_v51 = vrot.slane %v4309_v60, 5  ;;  %v4315_v15 = vrot.slane %v4313_v25, 4  ;;  %v4335_v24 = vrot.slane %v4333_v2, 5 }
 0x16e   : > { %v4240_v54 = vsel %vm7262_vm4, %v4235_v31, %v8020_v26  ;;  %v4269_v26 = vrot.slane %v4268_v7, 4  ;;  %v1298_v31 = vld [vmem:[%s7241_s27 + $0xb8] sm:$0xf]  ;;  %v4321_v38 = vrot.slane %v4319_v16, 5  ;;  %v4348_v44 = vshrl.u32 %v6290_v29, 16 }
 0x16f   : > { %v6316_v14 = vcombine.low %v4240_v54, %v4250_v27  ;;  %v1458_v50 = vrot.slane %v1298_v31, 5  ;;  %v4324_v54 = vshrl.u32 %v6287_v37, 16  ;;  %v4327_v27 = vshll.u32 %v6287_v37, 16 }
 0x170   : > { %v4274_v49 = vsel %vm7262_vm4, %v4269_v26, %v4273_v5  ;;  %v4339_v26 = vrot.slane %v4337_v58, 4  ;;  %v6289_v5 = vld [vmem:[%s7241_s27 + $0x80] sm:$0x1]  ;;  %v4351_v45 = vshll.u32 %v6290_v29, 16  ;;  %v4385_v48 = vshrl.u32 %v6294_v33, 16 }
 0x171   : > { %5941 = vmatmul.mubr.msk.bf16.gmra.mrb[40].mxu1 %vm667_vm3, %v5923_v3  ;;  %v5909_v3 = vrot.slane %v1291_v23, 9  ;;  %v6317_v59 = vcombine.low %v4264_v43, %v4274_v49  ;;  %v4305_v23 = vrot.slane %v4303_v22, 5  ;;  %v1460_v62 = vrot.slane %v1458_v50, 4 }
 0x172   : > { %1718 = vmatprep.mubr.bf16.mxu1 %v7172_v4  ;;  %v4329_v21 = vrot.slane %v4327_v27, 5  ;;  %v4343_v43 = vshll.u32 %v6289_v5, 16  ;;  %v6299_v5 = vld [vmem:[%s7241_s27 + $0xa8] sm:$0xf] }
 0x173   : > { %v1462_v39 = vsel %vm7421_vm7, %v1460_v62, %v1461_v9 }
 0x174   : > { %6332 = vmatmul.mubr.msk.bf16.gmra.mrb[8].mxu0 %vm667_vm3, %v6314_v32  ;;  %v1445_v32 = vsel %vm7421_vm7, %v5909_v3, %v1444_v11  ;;  %v1455_v11 = vsel %vm7421_vm7, %v1453_v28, %v1454_v52  ;;  %v4288_v3 = vsel %vm7262_vm4, %v4283_v1, %v8069_v35  ;;  %v4345_v22 = vrot.slane %v4343_v43, 5  ;;  %v6293_v1 = vld [vmem:[%s7241_s27 + $0x90] sm:$0xf] }
 0x175   : > { %4690 = vmatprep.mubr.bf16.mxu0 %v7172_v4  ;;  %v5926_v46 = vcombine.low %v1445_v32, %v1448_v34  ;;  %v5927_v7 = vcombine.low %v1452_v0, %v1455_v11  ;;  %v6318_v20 = vcombine.low %v4288_v3, %v4298_v8  ;;  %v6291_v32 = vld [vmem:[%s7241_s27 + $0x88] sm:$0xf]  ;;  %v1459_v34 = vsel %vm7421_vm7, %v5911_v17, %v1458_v50  ;;  %v7004_v50 = vld [vmem:[%s7241_s27 + $0xc] sm:$0xff]   ;;  %v6296_v8 = vld [vmem:[%s7241_s27 + $0x9c] sm:$0xf] }
 0x176   : > { %v4361_v49 = vshrl.u32 %v6291_v32, 16  ;;  %v5928_v56 = vcombine.low %v1459_v34, %v1462_v39  ;;  %v4350_v28 = vrot.slane %v4348_v44, 4  ;;  %v4353_v52 = vrot.slane %v4351_v45, 5 }
 0x177   : > { %v4381_v11 = vshll.u32 %v6294_v33, 16  ;;  %v4387_v3 = vrot.slane %v4385_v48, 4  ;;  %v4420_v43 = vshrl.u32 %v6299_v5, 16  ;;  %v4423_v44 = vshll.u32 %v6299_v5, 16 }
 0x178   : > { %v4363_v25 = vrot.slane %v4361_v49, 4  ;;  %v4354_v0 = vor.u32 %v4353_v52, %v4350_v28 }
 0x179   : > { %5942 = vmatmul.mubr.msk.bf16.gmra.mrb[44].mxu1 %vm667_vm3, %v5924_v63  ;;  %v4300_v63 = vshrl.u32 %v6284_v41, 16  ;;  %v4340_v41 = vor.u32 %v4339_v26, %v4335_v24  ;;  %v4383_v58 = vrot.slane %v4381_v11, 5  ;;  %v4425_v28 = vrot.slane %v4423_v44, 5  ;;  %v6309_v44 = vld [vmem:[%s7241_s27 + $0xd0] sm:$0xf] }
 0x17a   : > { %1728 = vmatprep.mubr.bf16.mxu1 %v7172_v4 }
 0x17b   : > { %v4388_v9 = vor.u32 %v4387_v3, %v4383_v58 }
 0x17c   : > { %6333 = vmatmul.mubr.msk.bf16.gmra.mrb[12].mxu0 %vm667_vm3, %v6315_v13  ;;  %v4302_v13 = vrot.slane %v4300_v63, 4  ;;  %v4341_v63 = vrot.slane %v4340_v41, 4  ;;  %v6298_v41 = vld [vmem:[%s7241_s27 + $0xa4] sm:$0x1] }
 0x17d   : > { %4700 = vmatprep.mubr.bf16.mxu0 %v7172_v4  ;;  %v4389_v34 = vrot.slane %v4388_v9, 4 }
 0x17e   : > { %v4306_v10 = vor.u32 %v4305_v23, %v4302_v13  ;;  %v4346_v53 = vsel %vm7262_vm4, %v4341_v63, %v4345_v22  ;;  %v4372_v13 = vshrl.u32 %v6293_v1, 16  ;;  %v4375_v23 = vshll.u32 %v6293_v1, 16  ;;  %v6303_v1 = vld [vmem:[%s7241_s27 + $0xb8] sm:$0xf] }
 0x17f   : > { %v4415_v63 = vshll.u32 %v6298_v41, 16  ;;  %v4422_v22 = vrot.slane %v4420_v43, 4  ;;  %v4453_v11 = vshll.u32 %v6303_v1, 16  ;;  %v4457_v48 = vshrl.u32 %v6303_v1, 16  ;;  %v6307_v41 = vld [vmem:[%s7241_s27 + $0xc8] sm:$0x1] }
 0x180   : > { %v4307_v36 = vrot.slane %v4306_v10, 4  ;;  %v4374_v27 = vrot.slane %v4372_v13, 4  ;;  %v4377_v2 = vrot.slane %v4375_v23, 5  ;;  %v6297_v10 = vld [vmem:[%s7241_s27 + $0xa0] sm:$0xf] }
 0x181   : > { %5943 = vmatmul.mubr.msk.bf16.gmra.mrb[48].mxu1 %vm667_vm3, %v5925_v18  ;;  %v4316_v18 = vor.u32 %v4315_v15, %v4311_v51  ;;  %v4355_v15 = vrot.slane %v4354_v0, 4  ;;  %v4409_v26 = vshrl.u32 %v6297_v10, 16  ;;  %v4426_v0 = vor.u32 %v4425_v28, %v4422_v22  ;;  %v6308_v43 = vld [vmem:[%s7241_s27 + $0xcc] sm:$0xf] }
 0x182   : > { %1738 = vmatprep.mubr.bf16.mxu1 %v7172_v4  ;;  %v4312_v55 = vsel %vm7262_vm4, %v4307_v36, %v4311_v51  ;;  %v4378_v62 = vor.u32 %v4377_v2, %v4374_v27  ;;  %v4455_v3 = vrot.slane %v4453_v11, 5  ;;  %v4501_v22 = vshll.u32 %v6309_v44, 16 }
 0x183   : > { %v4317_v35 = vrot.slane %v4316_v18, 4  ;;  %v4505_v28 = vshrl.u32 %v6309_v44, 16 }
 0x184   : > { %6334 = vmatmul.mubr.msk.bf16.gmra.mrb[16].mxu0 %vm667_vm3, %v6316_v14  ;;  %v4326_v14 = vrot.slane %v4324_v54, 4 }
 0x185   : > { %4710 = vmatprep.mubr.bf16.mxu0 %v7172_v4  ;;  %v4322_v12 = vsel %vm7262_vm4, %v4317_v35, %v4321_v38 }
 0x186   : > { %v4330_v40 = vor.u32 %v4329_v21, %v4326_v14  ;;  %v6319_v31 = vcombine.low %v4312_v55, %v4322_v12  ;;  %v4396_v14 = vshrl.u32 %v6296_v8, 16  ;;  %v4399_v21 = vshll.u32 %v6296_v8, 16 }
 0x188   : > { %v4331_v61 = vrot.slane %v4330_v40, 4  ;;  %v4398_v35 = vrot.slane %v4396_v14, 4  ;;  %v4401_v38 = vrot.slane %v4399_v21, 5  ;;  %v4411_v40 = vrot.slane %v4409_v26, 4 }
 0x189   : > { %5944 = vmatmul.mubr.msk.bf16.gmra.mrb[52].mxu1 %vm667_vm3, %v5926_v46  ;;  %v4357_v46 = vshll.u32 %v6291_v32, 16  ;;  %v4379_v32 = vrot.slane %v4378_v62, 4 }
 0x18a   : > { %1748 = vmatprep.mubr.bf16.mxu1 %v7172_v4  ;;  %v4336_v37 = vsel %vm7262_vm4, %v4331_v61, %v4335_v24  ;;  %v4405_v24 = vshll.u32 %v6297_v10, 16  ;;  %v4402_v12 = vor.u32 %v4401_v38, %v4398_v35  ;;  %v6304_v10 = vld [vmem:[%s7241_s27 + $0xbc] sm:$0x1] }
 0x18b   : > { %v4359_v60 = vrot.slane %v4357_v46, 5  ;;  %v6320_v51 = vcombine.low %v4336_v37, %v4346_v53  ;;  %v4384_v49 = vsel %vm7262_vm4, %v4379_v32, %v4383_v58  ;;  %v4417_v53 = vrot.slane %v4415_v63, 5 }
 0x18c   : > { %6335 = vmatmul.mubr.msk.bf16.gmra.mrb[20].mxu0 %vm667_vm3, %v6317_v59  ;;  %v6292_v59 = vld [vmem:[%s7241_s27 + $0x8c] sm:$0x1]  ;;  %v4407_v39 = vrot.slane %v4405_v24, 5  ;;  %v4403_v33 = vrot.slane %v4402_v12, 4  ;;  %v4463_v14 = vshll.u32 %v6304_v10, 16  ;;  %v4495_v63 = vshll.u32 %v6308_v43, 16 }
 0x18d   : > { %4720 = vmatprep.mubr.bf16.mxu0 %v7172_v4  ;;  %v4364_v30 = vor.u32 %v4363_v25, %v4359_v60  ;;  %v4367_v47 = vshll.u32 %v6292_v59, 16  ;;  %v4360_v16 = vsel %vm7262_vm4, %v4355_v15, %v4359_v60  ;;  %v6301_v25 = vld [vmem:[%s7241_s27 + $0xb0] sm:$0x1]  ;;  %v6302_v59 = vld [vmem:[%s7241_s27 + $0xb4] sm:$0xf]  ;;  %v7009_v12 = vld [vmem:[%s7241_s27 + $0x48] sm:$0xff]  }
 0x18e   : > { %v4412_v61 = vor.u32 %v4411_v40, %v4407_v39  ;;  %v4444_v13 = vshrl.u32 %v6302_v59, 16  ;;  %v4447_v23 = vshll.u32 %v6302_v59, 16  ;;  %v4497_v1 = vrot.slane %v4495_v63, 5  ;;  %v6357_v63 = vld [vmem:[%s7241_s27 + $0x44] sm:$0x1] }
 0x18f   : > { %v4365_v19 = vrot.slane %v4364_v30, 4  ;;  %v4369_v54 = vrot.slane %v4367_v47, 5  ;;  %v4439_v47 = vshll.u32 %v6301_v25, 16 }
 0x190   : > { %v4413_v37 = vrot.slane %v4412_v61, 4  ;;  %v4446_v2 = vrot.slane %v4444_v13, 4  ;;  %v4449_v58 = vrot.slane %v4447_v23, 5  ;;  %v4492_v61 = vshrl.u32 %v6308_v43, 16 }
 0x191   : > { %5945 = vmatmul.mubr.msk.bf16.gmra.mrb[56].mxu1 %vm667_vm3, %v5927_v7  ;;  %v6295_v7 = vld [vmem:[%s7241_s27 + $0x98] sm:$0x1]  ;;  %v4370_v17 = vsel %vm7262_vm4, %v4365_v19, %v4369_v54  ;;  %v4427_v19 = vrot.slane %v4426_v0, 4  ;;  %v4441_v27 = vrot.slane %v4439_v47, 5 }
 0x192   : > { %1758 = vmatprep.mubr.bf16.mxu1 %v7172_v4  ;;  %v4391_v18 = vshll.u32 %v6295_v7, 16  ;;  %v6321_v29 = vcombine.low %v4360_v16, %v4370_v17  ;;  %v4418_v15 = vsel %vm7262_vm4, %v4413_v37, %v4417_v53  ;;  %v4459_v7 = vrot.slane %v4457_v48, 4  ;;  %v6305_v16 = vld [vmem:[%s7241_s27 + $0xc0] sm:$0xf]  ;;  %v6306_v17 = vld [vmem:[%s7241_s27 + $0xc4] sm:$0xf] }
 0x193   : > { %v4468_v21 = vshrl.u32 %v6305_v16, 16  ;;  %v4471_v24 = vshll.u32 %v6305_v16, 16  ;;  %v4477_v26 = vshll.u32 %v6306_v17, 16  ;;  %v4481_v5 = vshrl.u32 %v6306_v17, 16  ;;  %v6310_v53 = vld [vmem:[%s7241_s27 + $0xd4] sm:$0x1] }
 0x194   : > { %6336 = vmatmul.mubr.msk.bf16.gmra.mrb[24].mxu0 %vm667_vm3, %v6318_v20  ;;  %v6300_v20 = vld [vmem:[%s7241_s27 + $0xac] sm:$0xf]  ;;  %v4393_v36 = vrot.slane %v4391_v18, 5  ;;  %v4450_v18 = vor.u32 %v4449_v58, %v4446_v2  ;;  %v4494_v59 = vrot.slane %v4492_v61, 4  ;;  %v4507_v37 = vrot.slane %v4505_v28, 4 }
 0x195   : > { %4730 = vmatprep.mubr.bf16.mxu0 %v7172_v4  ;;  %v4429_v45 = vshll.u32 %v6300_v20, 16  ;;  %v4433_v46 = vshrl.u32 %v6300_v20, 16  ;;  %v7008_v20 = vld [vmem:[%s7241_s27 + $0x3c] sm:$0xff]   ;;  %v4470_v35 = vrot.slane %v4468_v21, 4  ;;  %v4473_v38 = vrot.slane %v4471_v24, 5 }
 0x196   : > { %v4394_v55 = vsel %vm7262_vm4, %v4389_v34, %v4393_v36  ;;  %v4451_v32 = vrot.slane %v4450_v18, 4  ;;  %v4465_v36 = vrot.slane %v4463_v14, 5  ;;  %v4483_v40 = vrot.slane %v4481_v5, 4  ;;  %v6349_v21 = vld [vmem:[%s7241_s27 + $0x24] sm:$0xe] }
 0x197   : > { %v4431_v52 = vrot.slane %v4429_v45, 5  ;;  %v4435_v60 = vrot.slane %v4433_v46, 4  ;;  %v4498_v13 = vor.u32 %v4497_v1, %v4494_v59  ;;  %v4511_v11 = vshll.u32 %v6310_v53, 16  ;;  %v6351_v24 = vld [vmem:[%s7241_s27 + $0x2c] sm:$0x1] }
 0x198   : > { %v4456_v45 = vsel %vm7262_vm4, %v4451_v32, %v4455_v3  ;;  %v6395_v5 = vrot.slane %v6349_v21, 9  ;;  %v6353_v32 = vld [vmem:[%s7241_s27 + $0x34] sm:$0xf]  ;;  %v6355_v61 = vld [vmem:[%s7241_s27 + $0x3c] sm:$0xe] }
 0x199   : > { %5946 = vmatmul.mubr.msk.bf16.gmra.mrb[60].mxu1 %vm667_vm3, %v5928_v56  ;;  %v7006_v56 = vld [vmem:[%s7241_s27 + $0x24] sm:$0xff]   ;;  %v4436_v30 = vor.u32 %v4435_v60, %v4431_v52  ;;  %v4432_v62 = vsel %vm7262_vm4, %v4427_v19, %v4431_v52  ;;  %v6347_v19 = vld [vmem:[%s7241_s27 + $0x1c] sm:$0xf]  ;;  %v6397_v28 = vrot.slane %v6355_v61, 9  ;;  %v6360_v53 = vld [vmem:[%s7241_s27 + $0x50] sm:$0x1] }
 0x19a   : > { %2043 = vmatprep.mubr.bf16.mxu1 %v7172_v4  ;;  %v4983_v58 = vrot.slane %v6347_v19, 5  ;;  %v6363_v19 = vld [vmem:[%s7241_s27 + $0x5c] sm:$0x1] }
 0x19b   : > { %v4437_v54 = vrot.slane %v4436_v30, 4  ;;  %v7010_v30 = vld [vmem:[%s7241_s27 + $0x54] sm:$0xff]  }
 0x19c   : > { %6337 = vmatmul.mubr.msk.bf16.gmra.mrb[28].mxu0 %vm667_vm3, %v6319_v31  ;;  %v6322_v31 = vcombine.low %v4384_v49, %v4394_v55  ;;  %v4474_v49 = vor.u32 %v4473_v38, %v4470_v35  ;;  %v4487_v55 = vshll.u32 %v6307_v41, 16  ;;  %v4985_v16 = vrot.slane %v4983_v58, 4 }
 0x19d   : > { %4740 = vmatprep.mubr.bf16.mxu0 %v7172_v4  ;;  %v4442_v9 = vsel %vm7262_vm4, %v4437_v54, %v4441_v27  ;;  %v7011_v54 = vld [vmem:[%s7241_s27 + $0x60] sm:$0xff]   ;;  %v4997_v38 = vrot.slane %v6353_v32, 5 }
 0x19e   : > { %v4475_v60 = vrot.slane %v4474_v49, 4  ;;  %v7014_v49 = vld [vmem:[%s7241_s27 + $0x84] sm:$0xff]  }
 0x19f   : > { %v4999_v44 = vrot.slane %v4997_v38, 4 }
 0x1a1   : > { %5998 = vmatmul.mubr.msk.bf16.vlgmr.msra.gmra.mrb[0].mxu1 %vm667_vm3, %v7004_v50  ;;  %v7007_v50 = vld [vmem:[%s7241_s27 + $0x30] sm:$0xff]  }
 0x1a2   : > { %6449 = vmatpush1.bf16.msra.mxu1 %v7213_v6  ;;  %2053 = vmatprep.mubr.bf16.mxu1 %v7172_v4  ;;  %v7005_v6 = vld [vmem:[%s7241_s27 + $0x18] sm:$0xff]  }
 0x1a4   : > { %6338 = vmatmul.mubr.msk.bf16.gmra.mrb[32].mxu0 %vm667_vm3, %v6320_v51  ;;  %v4408_v51 = vsel %vm7262_vm4, %v4403_v33, %v4407_v39  ;;  %v4479_v39 = vrot.slane %v4477_v26, 5  ;;  %v4503_v33 = vrot.slane %v4501_v22, 5 }
 0x1a5   : > { %4750 = vmatprep.mubr.bf16.mxu0 %v7172_v4  ;;  %v6323_v8 = vcombine.low %v4408_v51, %v4418_v15  ;;  %v4513_v15 = vrot.slane %v4511_v11, 5  ;;  %v7016_v11 = vld [vmem:[%s7241_s27 + $0x9c] sm:$0xff]  }
 0x1a6   : > { %v4480_v0 = vsel %vm7262_vm4, %v4475_v60, %v4479_v39  ;;  %v4508_v23 = vor.u32 %v4507_v37, %v4503_v33  ;;  %v5007_v60 = vrot.slane %v6357_v63, 5  ;;  %v6358_v37 = vld [vmem:[%s7241_s27 + $0x48] sm:$0xe] }
 0x1a8   : > { %v4509_v51 = vrot.slane %v4508_v23, 4  ;;  %v6362_v23 = vld [vmem:[%s7241_s27 + $0x58] sm:$0xf] }
 0x1a9   : > { %5999 = vmatmul.mubr.msk.bf16.gmra.mrb[4].mxu1 %vm667_vm3, %v7005_v6  ;;  %v4460_v6 = vor.u32 %v4459_v7, %v4455_v3  ;;  %v6346_v3 = vld [vmem:[%s7241_s27 + $0x18] sm:$0xe]  ;;  %v6348_v7 = vld [vmem:[%s7241_s27 + $0x20] sm:$0x1] }
 0x1aa   : > { %2063 = vmatprep.mubr.bf16.mxu1 %v7172_v4  ;;  %v4514_v2 = vsel %vm7262_vm4, %v4509_v51, %v4513_v15  ;;  %v6394_v10 = vrot.slane %v6346_v3, 9  ;;  %v4986_v17 = vrot.slane %v6348_v7, 5  ;;  %v5018_v51 = vrot.slane %v6362_v23, 5  ;;  %v6361_v15 = vld [vmem:[%s7241_s27 + $0x54] sm:$0xe] }
 0x1ab   : > { %v4461_v34 = vrot.slane %v4460_v6, 4  ;;  %v5021_v3 = vrot.slane %v6363_v19, 5  ;;  %v6364_v7 = vld [vmem:[%s7241_s27 + $0x60] sm:$0xe]  ;;  %v6043_v19 = vld [vmem:[%s7241_s27 + $0x80] sm:$0x1] }
 0x1ac   : > { %6339 = vmatmul.mubr.msk.bf16.gmra.mrb[36].mxu0 %vm667_vm3, %v6321_v29  ;;  %v6324_v29 = vcombine.low %v4432_v62, %v4442_v9  ;;  %v6350_v62 = vld [vmem:[%s7241_s27 + $0x28] sm:$0xf]  ;;  %v7012_v9 = vld [vmem:[%s7241_s27 + $0x6c] sm:$0xff]   ;;  %v4984_v18 = vsel %vm7421_vm7, %v6394_v10, %v4983_v58  ;;  %v4987_v6 = vsel %vm7421_vm7, %v4985_v16, %v4986_v17  ;;  %v5020_v58 = vrot.slane %v5018_v51, 4 }
 0x1ad   : > { %4760 = vmatprep.mubr.bf16.mxu0 %v7172_v4  ;;  %v4466_v46 = vsel %vm7262_vm4, %v4461_v34, %v4465_v36  ;;  %v4990_v14 = vrot.slane %v6350_v62, 5  ;;  %v6411_v26 = vcombine.low %v4984_v18, %v4987_v6  ;;  %v7013_v34 = vld [vmem:[%s7241_s27 + $0x78] sm:$0xff]   ;;  %v6366_v10 = vld [vmem:[%s7241_s27 + $0x68] sm:$0x1]  ;;  %v6038_v16 = vld [vmem:[%s7241_s27 + $0x6c] sm:$0xf] }
 0x1ae   : > { %v6325_v52 = vcombine.low %v4456_v45, %v4466_v46  ;;  %v6356_v46 = vld [vmem:[%s7241_s27 + $0x40] sm:$0xf]  ;;  %v7017_v17 = vld [vmem:[%s7241_s27 + $0xa8] sm:$0xff]   ;;  %v6039_v18 = vld [vmem:[%s7241_s27 + $0x70] sm:$0xf]  ;;  %v6400_v6 = vrot.slane %v6364_v7, 9 }
 0x1af   : > { %v4991_v36 = vsel %vm7421_vm7, %v6395_v5, %v4990_v14  ;;  %v5028_v21 = vrot.slane %v6366_v10, 5  ;;  %v2522_v32 = vshrl.u32 %v6039_v18, 16 }
 0x1b1   : > { %6000 = vmatmul.mubr.msk.bf16.gmra.mrb[8].mxu1 %vm667_vm3, %v7006_v56  ;;  %v4484_v56 = vor.u32 %v4483_v40, %v4479_v39  ;;  %v6352_v39 = vld [vmem:[%s7241_s27 + $0x30] sm:$0xe]  ;;  %v6354_v40 = vld [vmem:[%s7241_s27 + $0x38] sm:$0x1] }
 0x1b2   : > { %2073 = vmatprep.mubr.bf16.mxu1 %v7172_v4  ;;  %v6396_v43 = vrot.slane %v6352_v39, 9  ;;  %v5000_v45 = vrot.slane %v6354_v40, 5  ;;  %v6367_v40 = vld [vmem:[%s7241_s27 + $0x6c] sm:$0xe] }
 0x1b3   : > { %v4485_v25 = vrot.slane %v4484_v56, 4 }
 0x1b4   : > { %6340 = vmatmul.mubr.msk.bf16.gmra.mrb[40].mxu0 %vm667_vm3, %v6322_v31  ;;  %v4489_v31 = vrot.slane %v4487_v55, 5  ;;  %v4998_v56 = vsel %vm7421_vm7, %v6396_v43, %v4997_v38  ;;  %v5001_v55 = vsel %vm7421_vm7, %v4999_v44, %v5000_v45  ;;  %v2524_v44 = vrot.slane %v2522_v32, 4  ;;  %v7018_v45 = vld [vmem:[%s7241_s27 + $0xb4] sm:$0xff]  }
 0x1b5   : > { %4770 = vmatprep.mubr.bf16.mxu0 %v7172_v4  ;;  %v6413_v22 = vcombine.low %v4998_v56, %v5001_v55  ;;  %v6042_v55 = vld [vmem:[%s7241_s27 + $0x7c] sm:$0xf] }
 0x1b6   : > { %v4490_v47 = vsel %vm7262_vm4, %v4485_v25, %v4489_v31  ;;  %v6359_v25 = vld [vmem:[%s7241_s27 + $0x4c] sm:$0xf]  ;;  %v7015_v31 = vld [vmem:[%s7241_s27 + $0x90] sm:$0xff]  }
 0x1b7   : > { %v6326_v48 = vcombine.low %v4480_v0, %v4490_v47 }
 0x1b9   : > { %6001 = vmatmul.mubr.msk.bf16.gmra.mrb[12].mxu1 %vm667_vm3, %v7007_v50  ;;  %v4499_v50 = vrot.slane %v4498_v13, 4  ;;  %v5014_v13 = vrot.slane %v6360_v53, 5 }
 0x1ba   : > { %2083 = vmatprep.mubr.bf16.mxu1 %v7172_v4 }
 0x1bb   : > { %v4504_v27 = vsel %vm7262_vm4, %v4499_v50, %v4503_v33  ;;  %v5011_v33 = vrot.slane %v6359_v25, 5 }
 0x1bc   : > { %6341 = vmatmul.mubr.msk.bf16.gmra.mrb[44].mxu0 %vm667_vm3, %v6323_v8  ;;  %v6327_v8 = vcombine.low %v4504_v27, %v4514_v2  ;;  %v6365_v27 = vld [vmem:[%s7241_s27 + $0x64] sm:$0xf]  ;;  %v6399_v2 = vrot.slane %v6361_v15, 9 }
 0x1bd   : > { %4780 = vmatprep.mubr.bf16.mxu0 %v7172_v4  ;;  %v5013_v47 = vrot.slane %v5011_v33, 4 }
 0x1be   : > { %v5019_v62 = vsel %vm7421_vm7, %v6399_v2, %v5018_v51 }
 0x1bf   : > { %v5015_v50 = vsel %vm7421_vm7, %v5013_v47, %v5014_v13  ;;  %v6370_v13 = vld [vmem:[%s7241_s27 + $0x78] sm:$0xe] }
 0x1c0   : > { %v6402_v2 = vrot.slane %v6370_v13, 9 }
 0x1c1   : > { %6002 = vmatmul.mubr.msk.bf16.gmra.mrb[16].mxu1 %vm667_vm3, %v7008_v20  ;;  %v4992_v20 = vrot.slane %v4990_v14, 4 }
 0x1c2   : > { %2093 = vmatprep.mubr.bf16.mxu1 %v7172_v4 }
 0x1c4   : > { %6342 = vmatmul.mubr.msk.bf16.gmra.mrb[48].mxu0 %vm667_vm3, %v6324_v29  ;;  %v4993_v29 = vrot.slane %v6351_v24, 5  ;;  %v2509_v24 = vshrl.u32 %v6038_v16, 16 }
 0x1c5   : > { %4790 = vmatprep.mubr.bf16.mxu0 %v7172_v4 }
 0x1c6   : > { %v4994_v35 = vsel %vm7421_vm7, %v4992_v20, %v4993_v29  ;;  %v6368_v20 = vld [vmem:[%s7241_s27 + $0x70] sm:$0xf]  ;;  %v2518_v29 = vshll.u32 %v6039_v18, 16  ;;  %v2511_v38 = vrot.slane %v2509_v24, 4 }
 0x1c7   : > { %v6412_v41 = vcombine.low %v4991_v36, %v4994_v35  ;;  %v5032_v35 = vrot.slane %v6368_v20, 5 }
 0x1c8   : > { %v2520_v43 = vrot.slane %v2518_v29, 5  ;;  %v6373_v29 = vld [vmem:[%s7241_s27 + $0x84] sm:$0xe] }
 0x1c9   : > { %6003 = vmatmul.mubr.msk.bf16.gmra.mrb[20].mxu1 %vm667_vm3, %v7009_v12  ;;  %v5004_v12 = vrot.slane %v6356_v46, 5  ;;  %v6040_v46 = vld [vmem:[%s7241_s27 + $0x74] sm:$0x1]  ;;  %v5034_v61 = vrot.slane %v5032_v35, 4 }
 0x1ca   : > { %2103 = vmatprep.mubr.bf16.mxu1 %v7172_v4 }
 0x1cb   : > { %v5005_v59 = vsel %vm7421_vm7, %v6397_v28, %v5004_v12  ;;  %v2525_v28 = vor.u32 %v2524_v44, %v2520_v43 }
 0x1cc   : > { %6343 = vmatmul.mubr.msk.bf16.gmra.mrb[52].mxu0 %vm667_vm3, %v6325_v52  ;;  %v5006_v52 = vrot.slane %v5004_v12, 4  ;;  %v6401_v12 = vrot.slane %v6367_v40, 9 }
 0x1cd   : > { %4800 = vmatprep.mubr.bf16.mxu0 %v7172_v4 }
 0x1ce   : > { %v5008_v1 = vsel %vm7421_vm7, %v5006_v52, %v5007_v60  ;;  %v2528_v52 = vshll.u32 %v6040_v46, 16  ;;  %v6371_v60 = vld [vmem:[%s7241_s27 + $0x7c] sm:$0xf]  ;;  %v6048_v46 = vld [vmem:[%s7241_s27 + $0x94] sm:$0xf] }
 0x1cf   : > { %v6414_v0 = vcombine.low %v5005_v59, %v5008_v1  ;;  %v2542_v59 = vshll.u32 %v6042_v55, 16  ;;  %v2546_v1 = vshrl.u32 %v6042_v55, 16 }
 0x1d0   : > { %v2530_v47 = vrot.slane %v2528_v52, 5 }
 0x1d1   : > { %6004 = vmatmul.mubr.msk.bf16.gmra.mrb[24].mxu1 %vm667_vm3, %v7010_v30  ;;  %v6398_v30 = vrot.slane %v6358_v37, 9  ;;  %v8315_v51 = vrot.slane %v2542_v59, 5  ;;  %v2548_v15 = vrot.slane %v2546_v1, 4  ;;  %v2594_v59 = vshrl.u32 %v6048_v46, 16 }
 0x1d2   : > { %2113 = vmatprep.mubr.bf16.mxu1 %v7172_v4 }
 0x1d4   : > { %6344 = vmatmul.mubr.msk.bf16.gmra.mrb[56].mxu0 %vm667_vm3, %v6326_v48  ;;  %v5012_v48 = vsel %vm7421_vm7, %v6398_v30, %v5011_v33  ;;  %v5033_v33 = vsel %vm7421_vm7, %v6401_v12, %v5032_v35  ;;  %v2526_v30 = vrot.slane %v2525_v28, 4  ;;  %v6375_v35 = vld [vmem:[%s7241_s27 + $0x8c] sm:$0x1] }
 0x1d5   : > { %4810 = vmatprep.mubr.bf16.mxu0 %v7172_v4  ;;  %v5049_v12 = vrot.slane %v6375_v35, 5  ;;  %v6052_v35 = vld [vmem:[%s7241_s27 + $0xa4] sm:$0x1] }
 0x1d9   : > { %6005 = vmatmul.mubr.msk.bf16.gmra.mrb[28].mxu1 %vm667_vm3, %v7011_v54  ;;  %v6415_v54 = vcombine.low %v5012_v48, %v5015_v50  ;;  %v7019_v48 = vld [vmem:[%s7241_s27 + $0xc0] sm:$0xff]  }
 0x1da   : > { %2123 = vmatprep.mubr.bf16.mxu1 %v7172_v4  ;;  %v6372_v50 = vld [vmem:[%s7241_s27 + $0x80] sm:$0x1] }
 0x1db   : > { %v5042_v10 = vrot.slane %v6372_v50, 5 }
 0x1dc   : > { %6345 = vmatmul.mubr.msk.bf16.gmra.mrb[60].mxu0 %vm667_vm3, %v6327_v8  ;;  %v5025_v8 = vrot.slane %v6365_v27, 5 }
 0x1dd   : > { %5238 = vmatprep.mubr.bf16.mxu0 %v7172_v4 }
 0x1de   : > { %v5027_v14 = vrot.slane %v5025_v8, 4 }
 0x1e0   : > { %v5029_v36 = vsel %vm7421_vm7, %v5027_v14, %v5028_v21 }
 0x1e1   : > { %6006 = vmatmul.mubr.msk.bf16.gmra.mrb[32].mxu1 %vm667_vm3, %v7012_v9  ;;  %v5022_v9 = vsel %vm7421_vm7, %v5020_v58, %v5021_v3  ;;  %v6045_v3 = vld [vmem:[%s7241_s27 + $0x88] sm:$0xf] }
 0x1e2   : > { %2133 = vmatprep.mubr.bf16.mxu1 %v7172_v4  ;;  %v6416_v5 = vcombine.low %v5019_v62, %v5022_v9  ;;  %v2552_v62 = vshll.u32 %v6043_v19, 16  ;;  %v6374_v9 = vld [vmem:[%s7241_s27 + $0x88] sm:$0xf]  ;;  %v2566_v14 = vshll.u32 %v6045_v3, 16  ;;  %v2570_v21 = vshrl.u32 %v6045_v3, 16 }
 0x1e3   : > { %v5046_v32 = vrot.slane %v6374_v9, 5 }
 0x1e4   : > { %6429 = vmatmul.mubr.msk.bf16.vlgmr.msra.gmra.mrb[0].mxu0 %vm667_vm3, %v6411_v26  ;;  %v2512_v26 = vshll.u32 %v6038_v16, 16  ;;  %v8336_v40 = vrot.slane %v2566_v14, 5 }
 0x1e5   : > { %5248 = vmatprep.mubr.bf16.mxu0 %v7172_v4  ;;  %v5048_v55 = vrot.slane %v5046_v32, 4 }
 0x1e6   : > { %v2514_v39 = vrot.slane %v2512_v26, 5 }
 0x1e9   : > { %6007 = vmatmul.mubr.msk.bf16.gmra.mrb[36].mxu1 %vm667_vm3, %v7013_v34  ;;  %v5026_v34 = vsel %vm7421_vm7, %v6400_v6, %v5025_v8  ;;  %v2531_v8 = vsel %vm7262_vm4, %v2526_v30, %v2530_v47  ;;  %v6051_v30 = vld [vmem:[%s7241_s27 + $0xa0] sm:$0xf] }
 0x1ea   : > { %2143 = vmatprep.mubr.bf16.mxu1 %v7172_v4  ;;  %v6417_v56 = vcombine.low %v5026_v34, %v5029_v36  ;;  %v2554_v36 = vrot.slane %v2552_v62, 5  ;;  %v2614_v3 = vshll.u32 %v6051_v30, 16 }
 0x1ec   : > { %6430 = vmatmul.mubr.msk.bf16.gmra.mrb[4].mxu0 %vm667_vm3, %v6412_v41  ;;  %v6369_v41 = vld [vmem:[%s7241_s27 + $0x74] sm:$0x1] }
 0x1ed   : > { %5258 = vmatprep.mubr.bf16.mxu0 %v7172_v4  ;;  %v5035_v63 = vrot.slane %v6369_v41, 5  ;;  %v2572_v41 = vrot.slane %v2570_v21, 4  ;;  %v6379_v21 = vld [vmem:[%s7241_s27 + $0x9c] sm:$0xe] }
 0x1ef   : > { %v5036_v37 = vsel %vm7421_vm7, %v5034_v61, %v5035_v63  ;;  %v6377_v61 = vld [vmem:[%s7241_s27 + $0x94] sm:$0xf] }
 0x1f0   : > { %v6418_v27 = vcombine.low %v5033_v33, %v5036_v37  ;;  %v5053_v1 = vrot.slane %v6377_v61, 5  ;;  %v5050_v37 = vsel %vm7421_vm7, %v5048_v55, %v5049_v12  ;;  %v2624_v61 = vshll.u32 %v6052_v35, 16 }
 0x1f1   : > { %6008 = vmatmul.mubr.msk.bf16.gmra.mrb[40].mxu1 %vm667_vm3, %v7014_v49  ;;  %v6041_v49 = vld [vmem:[%s7241_s27 + $0x78] sm:$0xf] }
 0x1f2   : > { %2153 = vmatprep.mubr.bf16.mxu1 %v7172_v4  ;;  %v2533_v25 = vshrl.u32 %v6041_v49, 16 }
 0x1f4   : > { %6431 = vmatmul.mubr.msk.bf16.gmra.mrb[8].mxu0 %vm667_vm3, %v6413_v22  ;;  %v2515_v22 = vor.u32 %v2514_v39, %v2511_v38  ;;  %v2535_v23 = vrot.slane %v2533_v25, 4 }
 0x1f5   : > { %5268 = vmatprep.mubr.bf16.mxu0 %v7172_v4 }
 0x1f6   : > { %v2516_v53 = vrot.slane %v2515_v22, 4 }
 0x1f8   : > { %v2521_v7 = vsel %vm7262_vm4, %v2516_v53, %v2520_v43  ;;  %v6047_v43 = vld [vmem:[%s7241_s27 + $0x90] sm:$0xf] }
 0x1f9   : > { %6009 = vmatmul.mubr.msk.bf16.gmra.mrb[44].mxu1 %vm667_vm3, %v7015_v31  ;;  %v2536_v31 = vshll.u32 %v6041_v49, 16  ;;  %v6071_v26 = vcombine.low %v2521_v7, %v2531_v8  ;;  %v2581_v28 = vshrl.u32 %v6047_v43, 16  ;;  %v2584_v52 = vshll.u32 %v6047_v43, 16  ;;  %v6376_v53 = vld [vmem:[%s7241_s27 + $0x90] sm:$0xe] }
 0x1fa   : > { %2163 = vmatprep.mubr.bf16.mxu1 %v7172_v4  ;;  %v2618_v7 = vshrl.u32 %v6051_v30, 16  ;;  %v6054_v43 = vld [vmem:[%s7241_s27 + $0xac] sm:$0xf] }
 0x1fc   : > { %6432 = vmatmul.mubr.msk.bf16.gmra.mrb[12].mxu0 %vm667_vm3, %v6414_v0  ;;  %v5039_v0 = vrot.slane %v6371_v60, 5  ;;  %v2573_v60 = vor.u32 %v2572_v41, %v8336_v40  ;;  %v6053_v41 = vld [vmem:[%s7241_s27 + $0xa8] sm:$0xf] }
 0x1fd   : > { %5278 = vmatprep.mubr.bf16.mxu0 %v7172_v4 }
 0x1fe   : > { %v5041_v58 = vrot.slane %v5039_v0, 4  ;;  %v5040_v24 = vsel %vm7421_vm7, %v6402_v2, %v5039_v0  ;;  %v6050_v0 = vld [vmem:[%s7241_s27 + $0x9c] sm:$0xf]  ;;  %v2574_v50 = vrot.slane %v2573_v60, 4  ;;  %v2642_v60 = vshrl.u32 %v6054_v43, 16 }
 0x1ff   : > { %v2605_v2 = vshrl.u32 %v6050_v0, 16 }
 0x201   : > { %6010 = vmatmul.mubr.msk.bf16.gmra.mrb[48].mxu1 %vm667_vm3, %v7016_v11  ;;  %v2538_v11 = vrot.slane %v2536_v31, 5  ;;  %v2590_v31 = vshll.u32 %v6048_v46, 16 }
 0x202   : > { %2173 = vmatprep.mubr.bf16.mxu1 %v7172_v4 }
 0x203   : > { %v2539_v16 = vor.u32 %v2538_v11, %v2535_v23  ;;  %v6378_v23 = vld [vmem:[%s7241_s27 + $0x98] sm:$0x1]  ;;  %v2583_v11 = vrot.slane %v2581_v28, 4  ;;  %v8361_v19 = vrot.slane %v2590_v31, 5  ;;  %v2632_v28 = vshll.u32 %v6053_v41, 16 }
 0x204   : > { %6433 = vmatmul.mubr.msk.bf16.gmra.mrb[16].mxu0 %vm667_vm3, %v6415_v54  ;;  %v6044_v54 = vld [vmem:[%s7241_s27 + $0x84] sm:$0xf] }
 0x205   : > { %5288 = vmatprep.mubr.bf16.mxu0 %v7172_v4  ;;  %v2557_v18 = vshrl.u32 %v6044_v54, 16  ;;  %v2560_v6 = vshll.u32 %v6044_v54, 16  ;;  %v2540_v20 = vrot.slane %v2539_v16, 4  ;;  %v2596_v54 = vrot.slane %v2594_v59, 4 }
 0x206   : > { %v5055_v16 = vrot.slane %v5053_v1, 4 }
 0x207   : > { %v2559_v38 = vrot.slane %v2557_v18, 4  ;;  %v2562_v39 = vrot.slane %v2560_v6, 5  ;;  %v2545_v49 = vsel %vm7262_vm4, %v2540_v20, %v8315_v51  ;;  %v2597_v14 = vor.u32 %v2596_v54, %v8361_v19  ;;  %v6057_v54 = vld [vmem:[%s7241_s27 + $0xb8] sm:$0xf] }
 0x209   : > { %6011 = vmatmul.mubr.msk.bf16.gmra.mrb[52].mxu1 %vm667_vm3, %v7017_v17  ;;  %v2549_v17 = vor.u32 %v2548_v15, %v8315_v51  ;;  %v2563_v22 = vor.u32 %v2562_v39, %v2559_v38  ;;  %v6049_v15 = vld [vmem:[%s7241_s27 + $0x98] sm:$0x1] }
 0x20a   : > { %2183 = vmatprep.mubr.bf16.mxu1 %v7172_v4  ;;  %v2600_v9 = vshll.u32 %v6049_v15, 16 }
 0x20b   : > { %v2550_v34 = vrot.slane %v2549_v17, 4  ;;  %v2564_v13 = vrot.slane %v2563_v22, 4  ;;  %v5056_v17 = vrot.slane %v6378_v23, 5  ;;  %v2629_v22 = vshrl.u32 %v6053_v41, 16 }
 0x20c   : > { %6434 = vmatmul.mubr.msk.bf16.gmra.mrb[20].mxu0 %vm667_vm3, %v6416_v5  ;;  %v5043_v5 = vsel %vm7421_vm7, %v5041_v58, %v5042_v10  ;;  %v2608_v58 = vshll.u32 %v6050_v0, 16  ;;  %v6404_v10 = vrot.slane %v6376_v53, 9  ;;  %v2626_v53 = vrot.slane %v2624_v61, 5  ;;  %v6382_v0 = vld [vmem:[%s7241_s27 + $0xa8] sm:$0xe] }
 0x20d   : > { %5298 = vmatprep.mubr.bf16.mxu0 %v7172_v4  ;;  %v6419_v44 = vcombine.low %v5040_v24, %v5043_v5  ;;  %v2555_v63 = vsel %vm7262_vm4, %v2550_v34, %v2554_v36  ;;  %v2569_v18 = vsel %vm7262_vm4, %v2564_v13, %v8336_v40  ;;  %v2607_v5 = vrot.slane %v2605_v2, 4 }
 0x20e   : > { %v6072_v47 = vcombine.low %v2545_v49, %v2555_v63  ;;  %v2610_v20 = vrot.slane %v2608_v58, 5  ;;  %v5054_v34 = vsel %vm7421_vm7, %v6404_v10, %v5053_v1  ;;  %v5057_v36 = vsel %vm7421_vm7, %v5055_v16, %v5056_v17  ;;  %v6383_v63 = vld [vmem:[%s7241_s27 + $0xac] sm:$0xf]  ;;  %v6386_v17 = vld [vmem:[%s7241_s27 + $0xb8] sm:$0xf] }
 0x20f   : > { %v2602_v40 = vrot.slane %v2600_v9, 5  ;;  %v5067_v30 = vrot.slane %v6383_v63, 5  ;;  %v2631_v13 = vrot.slane %v2629_v22, 4  ;;  %v2634_v23 = vrot.slane %v2632_v28, 5  ;;  %v6389_v22 = vld [vmem:[%s7241_s27 + $0xc4] sm:$0xf] }
 0x210   : > { %v2611_v55 = vor.u32 %v2610_v20, %v2607_v5  ;;  %v6406_v2 = vrot.slane %v6382_v0, 9  ;;  %v6388_v0 = vld [vmem:[%s7241_s27 + $0xc0] sm:$0xe] }
 0x211   : > { %6012 = vmatmul.mubr.msk.bf16.gmra.mrb[56].mxu1 %vm667_vm3, %v7018_v45  ;;  %v6046_v45 = vld [vmem:[%s7241_s27 + $0x8c] sm:$0x1]  ;;  %v5069_v58 = vrot.slane %v5067_v30, 4 }
 0x212   : > { %2193 = vmatprep.mubr.bf16.mxu1 %v7172_v4  ;;  %v2576_v25 = vshll.u32 %v6046_v45, 16  ;;  %v6405_v45 = vrot.slane %v6379_v21, 9  ;;  %v5068_v21 = vsel %vm7421_vm7, %v6406_v2, %v5067_v30  ;;  %v5081_v30 = vrot.slane %v6389_v22, 5 }
 0x214   : > { %6435 = vmatmul.mubr.msk.bf16.gmra.mrb[24].mxu0 %vm667_vm3, %v6417_v56  ;;  %v6403_v56 = vrot.slane %v6373_v29, 9  ;;  %v2578_v51 = vrot.slane %v2576_v25, 5  ;;  %v8374_v29 = vrot.slane %v2614_v3, 5 }
 0x215   : > { %5308 = vmatprep.mubr.bf16.mxu0 %v7172_v4 }
 0x216   : > { %v5047_v33 = vsel %vm7421_vm7, %v6403_v56, %v5046_v32  ;;  %v2579_v6 = vsel %vm7262_vm4, %v2574_v50, %v2578_v51  ;;  %v2620_v32 = vrot.slane %v2618_v7, 4  ;;  %v6421_v56 = vcombine.low %v5054_v34, %v5057_v36  ;;  %v6055_v51 = vld [vmem:[%s7241_s27 + $0xb0] sm:$0x1]  ;;  %v6387_v34 = vld [vmem:[%s7241_s27 + $0xbc] sm:$0x1] }
 0x217   : > { %v6420_v8 = vcombine.low %v5047_v33, %v5050_v37  ;;  %v6073_v38 = vcombine.low %v2569_v18, %v2579_v6  ;;  %v2612_v33 = vrot.slane %v2611_v55, 4  ;;  %v2648_v16 = vshll.u32 %v6055_v51, 16 }
 0x218   : > { %v2621_v12 = vor.u32 %v2620_v32, %v8374_v29  ;;  %v2662_v18 = vshll.u32 %v6057_v54, 16  ;;  %v2666_v6 = vshrl.u32 %v6057_v54, 16  ;;  %v5074_v32 = vrot.slane %v6386_v17, 5 }
 0x219   : > { %6013 = vmatmul.mubr.msk.bf16.gmra.mrb[60].mxu1 %vm667_vm3, %v7019_v48  ;;  %v2586_v48 = vrot.slane %v2584_v52, 5  ;;  %v2638_v52 = vshll.u32 %v6054_v43, 16  ;;  %v2650_v20 = vrot.slane %v2648_v16, 5  ;;  %v6059_v43 = vld [vmem:[%s7241_s27 + $0xc0] sm:$0xf]  ;;  %v5083_v54 = vrot.slane %v5081_v30, 4 }
 0x21a   : > { %2925 = vmatprep.mubr.bf16.mxu1 %v7172_v4  ;;  %v2622_v37 = vrot.slane %v2621_v12, 4  ;;  %v2677_v28 = vshrl.u32 %v6059_v43, 16 }
 0x21b   : > { %v2587_v62 = vor.u32 %v2586_v48, %v2583_v11  ;;  %v2640_v11 = vrot.slane %v2638_v52, 5  ;;  %v2644_v48 = vrot.slane %v2642_v60, 4  ;;  %v2680_v52 = vshll.u32 %v6059_v43, 16 }
 0x21c   : > { %6436 = vmatmul.mubr.msk.bf16.gmra.mrb[28].mxu0 %vm667_vm3, %v6418_v27  ;;  %v6380_v27 = vld [vmem:[%s7241_s27 + $0xa0] sm:$0xf]  ;;  %v2627_v7 = vsel %vm7262_vm4, %v2622_v37, %v2626_v53 }
 0x21d   : > { %5318 = vmatprep.mubr.bf16.mxu0 %v7172_v4  ;;  %v5060_v24 = vrot.slane %v6380_v27, 5  ;;  %v2588_v39 = vrot.slane %v2587_v62, 4  ;;  %v2617_v27 = vsel %vm7262_vm4, %v2612_v33, %v8374_v29  ;;  %v2645_v10 = vor.u32 %v2644_v48, %v2640_v11  ;;  %v6385_v29 = vld [vmem:[%s7241_s27 + $0xb4] sm:$0xe] }
 0x21f   : > { %v5062_v46 = vrot.slane %v5060_v24, 4  ;;  %v2593_v25 = vsel %vm7262_vm4, %v2588_v39, %v8361_v19  ;;  %v5061_v59 = vsel %vm7421_vm7, %v6405_v45, %v5060_v24  ;;  %v6056_v19 = vld [vmem:[%s7241_s27 + $0xb4] sm:$0xf]  ;;  %v2646_v5 = vrot.slane %v2645_v10, 4 }
 0x220   : > { %v2653_v62 = vshrl.u32 %v6056_v19, 16  ;;  %v2656_v9 = vshll.u32 %v6056_v19, 16  ;;  %v2668_v39 = vrot.slane %v2666_v6, 4  ;;  %v6408_v19 = vrot.slane %v6388_v0, 9 }
 0x221   : > { %6089 = vmatmul.mubr.msk.bf16.vlgmr.msra.gmra.mrb[32].mxu1 %vm667_vm3, %v6071_v26  ;;  %v6381_v26 = vld [vmem:[%s7241_s27 + $0xa4] sm:$0x1]  ;;  %v2651_v55 = vsel %vm7262_vm4, %v2646_v5, %v2650_v20 }
 0x222   : > { %2935 = vmatprep.mubr.bf16.mxu1 %v7172_v4  ;;  %v5063_v49 = vrot.slane %v6381_v26, 5  ;;  %v2655_v36 = vrot.slane %v2653_v62, 4  ;;  %v2658_v35 = vrot.slane %v2656_v9, 5  ;;  %v5082_v16 = vsel %vm7421_vm7, %v6408_v19, %v5081_v30  ;;  %v6391_v62 = vld [vmem:[%s7241_s27 + $0xcc] sm:$0xe] }
 0x223   : > { %v5465_v30 = vlaneseq }
 0x224   : > { %6437 = vmatmul.mubr.msk.bf16.gmra.mrb[32].mxu0 %vm667_vm3, %v6419_v44  ;;  %v2598_v44 = vrot.slane %v2597_v14, 4  ;;  %v5064_v1 = vsel %vm7421_vm7, %v5062_v46, %v5063_v49  ;;  %v6075_v14 = vcombine.low %v2617_v27, %v2627_v7  ;;  %v6407_v46 = vrot.slane %v6385_v29, 9 }
 0x225   : > { %5328 = vmatprep.mubr.bf16.mxu0 %v7172_v4  ;;  %v6422_v15 = vcombine.low %v5061_v59, %v5064_v1  ;;  %v5076_v49 = vrot.slane %v5074_v32, 4  ;;  %v2659_v12 = vor.u32 %v2658_v35, %v2655_v36 }
 0x226   : > { %v2603_v31 = vsel %vm7262_vm4, %v2598_v44, %v2602_v40  ;;  %v6058_v40 = vld [vmem:[%s7241_s27 + $0xbc] sm:$0x1]  ;;  %v6060_v44 = vld [vmem:[%s7241_s27 + $0xc4] sm:$0xf]  ;;  %v5075_v59 = vsel %vm7421_vm7, %v6407_v46, %v5074_v32 }
 0x227   : > { %v6074_v50 = vcombine.low %v2593_v25, %v2603_v31  ;;  %v2672_v63 = vshll.u32 %v6058_v40, 16  ;;  %v2686_v60 = vshll.u32 %v6060_v44, 16  ;;  %v2690_v25 = vshrl.u32 %v6060_v44, 16 }
 0x228   : > { %v2660_v33 = vrot.slane %v2659_v12, 4 }
 0x229   : > { %6090 = vmatmul.mubr.msk.bf16.gmra.mrb[36].mxu1 %vm667_vm3, %v6072_v47  ;;  %v6384_v47 = vld [vmem:[%s7241_s27 + $0xb0] sm:$0x1]  ;;  %v2674_v53 = vrot.slane %v2672_v63, 5  ;;  %v2692_v48 = vrot.slane %v2690_v25, 4 }
 0x22a   : > { %2945 = vmatprep.mubr.bf16.mxu1 %v7172_v4  ;;  %v5070_v3 = vrot.slane %v6384_v47, 5  ;;  %v6390_v47 = vld [vmem:[%s7241_s27 + $0xc8] sm:$0x1] }
 0x22b   : > { %v5084_v27 = vrot.slane %v6390_v47, 5 }
 0x22c   : > { %6438 = vmatmul.mubr.msk.bf16.gmra.mrb[36].mxu0 %vm667_vm3, %v6420_v8  ;;  %v2635_v8 = vor.u32 %v2634_v23, %v2631_v13  ;;  %v5071_v24 = vsel %vm7421_vm7, %v5069_v58, %v5070_v3  ;;  %v2679_v13 = vrot.slane %v2677_v28, 4  ;;  %v2682_v23 = vrot.slane %v2680_v52, 5 }
 0x22d   : > { %5338 = vmatprep.mubr.bf16.mxu0 %v7172_v4  ;;  %v6423_v41 = vcombine.low %v5068_v21, %v5071_v24  ;;  %v5085_v17 = vsel %vm7421_vm7, %v5083_v54, %v5084_v27  ;;  %v6393_v21 = vld [vmem:[%s7241_s27 + $0xd4] sm:$0x1] }
 0x22e   : > { %v2636_v26 = vrot.slane %v2635_v8, 4  ;;  %v2683_v58 = vor.u32 %v2682_v23, %v2679_v13  ;;  %v6392_v8 = vld [vmem:[%s7241_s27 + $0xd0] sm:$0xf]  ;;  %v6425_v24 = vcombine.low %v5082_v16, %v5085_v17  ;;  %v5091_v20 = vrot.slane %v6393_v21, 5 }
 0x22f   : > { %v5088_v9 = vrot.slane %v6392_v8, 5 }
 0x230   : > { %v2641_v45 = vsel %vm7262_vm4, %v2636_v26, %v2640_v11  ;;  %v2688_v11 = vrot.slane %v2686_v60, 5  ;;  %v6409_v26 = vrot.slane %v6391_v62, 9 }
 0x231   : > { %6091 = vmatmul.mubr.msk.bf16.gmra.mrb[40].mxu1 %vm667_vm3, %v6073_v38  ;;  %v2664_v38 = vrot.slane %v2662_v18, 5  ;;  %v6076_v31 = vcombine.low %v2641_v45, %v2651_v55  ;;  %v2684_v18 = vrot.slane %v2683_v58, 4  ;;  %v5090_v5 = vrot.slane %v5088_v9, 4 }
 0x232   : > { %2955 = vmatprep.mubr.bf16.mxu1 %v7172_v4  ;;  %v2693_v3 = vor.u32 %v2692_v48, %v2688_v11  ;;  %v5089_v36 = vsel %vm7421_vm7, %v6409_v26, %v5088_v9  ;;  %v8513_v48 = vshrl.u32 %v5465_v30, 7 }
 0x233   : > { %v2669_v61 = vor.u32 %v2668_v39, %v2664_v38  ;;  %v2689_v29 = vsel %vm7262_vm4, %v2684_v18, %v2688_v11  ;;  %v5092_v35 = vsel %vm7421_vm7, %v5090_v5, %v5091_v20 }
 0x234   : > { %6439 = vmatmul.mubr.msk.bf16.gmra.mrb[40].mxu0 %vm667_vm3, %v6421_v56  ;;  %v5077_v56 = vrot.slane %v6387_v34, 5  ;;  %v2694_v6 = vrot.slane %v2693_v3, 4 }
 0x235   : > { %5348 = vmatprep.mubr.bf16.mxu0 %v7172_v4  ;;  %v2670_v37 = vrot.slane %v2669_v61, 4 }
 0x236   : > { %v5078_v1 = vsel %vm7421_vm7, %v5076_v49, %v5077_v56 }
 0x237   : > { %v6424_v51 = vcombine.low %v5075_v59, %v5078_v1  ;;  %v2675_v2 = vsel %vm7262_vm4, %v2670_v37, %v2674_v53 }
 0x239   : > { %6092 = vmatmul.mubr.msk.bf16.gmra.mrb[44].mxu1 %vm667_vm3, %v6074_v50  ;;  %v6061_v50 = vld [vmem:[%s7241_s27 + $0xc8] sm:$0x1] }
 0x23a   : > { %2965 = vmatprep.mubr.bf16.mxu1 %v7172_v4  ;;  %v2696_v7 = vshll.u32 %v6061_v50, 16  ;;  %v5471_v50 = vsub.s32 1, %v8513_v48 }
 0x23c   : > { %6440 = vmatmul.mubr.msk.bf16.gmra.mrb[44].mxu0 %vm667_vm3, %v6422_v15  ;;  %v2665_v15 = vsel %vm7262_vm4, %v2660_v33, %v2664_v38  ;;  %v6426_v38 = vcombine.low %v5089_v36, %v5092_v35 }
 0x23d   : > { %5358 = vmatprep.mubr.bf16.mxu0 %v7172_v4  ;;  %v6077_v10 = vcombine.low %v2665_v15, %v2675_v2 }
 0x241   : > { %6093 = vmatmul.mubr.msk.bf16.gmra.mrb[48].mxu1 %vm667_vm3, %v6075_v14  ;;  %v2698_v14 = vrot.slane %v2696_v7, 5 }
 0x242   : > { %2975 = vmatprep.mubr.bf16.mxu1 %v7172_v4 }
 0x243   : > { %v2699_v32 = vsel %vm7262_vm4, %v2694_v6, %v2698_v14 }
 0x244   : > { %6441 = vmatmul.mubr.msk.bf16.gmra.mrb[48].mxu0 %vm667_vm3, %v6423_v41  ;;  %v6078_v34 = vcombine.low %v2689_v29, %v2699_v32 }
 0x245   : > { %5368 = vmatprep.mubr.bf16.mxu0 %v7172_v4 }
 0x249   : > { %6094 = vmatmul.mubr.msk.bf16.gmra.mrb[52].mxu1 %vm667_vm3, %v6076_v31 }
 0x24a   : > { %2985 = vmatprep.mubr.bf16.mxu1 %v7172_v4 }
 0x24c   : > { %6442 = vmatmul.mubr.msk.bf16.gmra.mrb[52].mxu0 %vm667_vm3, %v6424_v51  ;;  %v8519_v51 = vld [vmem:[%s8782_s2] sm:$0x3] }
 0x24d   : > { %5378 = vmatprep.mubr.bf16.mxu0 %v7172_v4  ;;  %v8522_v19 = vrot.slane %v8519_v51, %v5471_v50 }
 0x251   : > { %6095 = vmatmul.mubr.msk.bf16.gmra.mrb[56].mxu1 %vm667_vm3, %v6077_v10 }
 0x252   : > { %2995 = vmatprep.mubr.bf16.mxu1 %v7172_v4 }
 0x254   : > { %6443 = vmatmul.mubr.msk.bf16.gmra.mrb[56].mxu0 %vm667_vm3, %v6425_v24 }
 0x255   : > { %5388 = vmatprep.mubr.bf16.mxu0 %v7172_v4 }
 0x259   : > { %6096 = vmatmul.mubr.msk.bf16.gmra.mrb[60].mxu1 %vm667_vm3, %v6078_v34 }
 0x25c   : > { %6444 = vmatmul.mubr.msk.bf16.gmra.mrb[60].mxu0 %vm667_vm3, %v6426_v38 }
 0x274   : > { %v2045_v39 = vpop.f32.mrb[0].mxu1 }
 0x275   : > { %v2047_v40 = vpop.f32.mrb[1].mxu1 }
 0x276   : > { %v2049_v42 = vpop.f32.mrb[2].mxu1 }
 0x277   : > { %v2051_v41 = vpop.f32.mrb[3].mxu1 }
 0x27c   : > { %v2055_v43 = vpop.f32.mrb[4].mxu1 }
 0x27d   : > { %v2057_v44 = vpop.f32.mrb[5].mxu1 }
 0x27e   : > { %v2059_v45 = vpop.f32.mrb[6].mxu1 }
 0x27f   : > { %v2061_v4 = vpop.f32.mrb[7].mxu1 }
 0x284   : > { %v2065_v46 = vpop.f32.mrb[8].mxu1 }
 0x285   : > { %v2067_v49 = vpop.f32.mrb[9].mxu1 }
 0x286   : > { %v8469_v56 = vpop.f32.mrb[10].mxu1 }
 0x287   : > { %v8471_v55 = vpop.f32.mrb[11].mxu1 }
 0x28c   : > { %v8473_v57 = vpop.f32.mrb[12].mxu1 }
 0x28d   : > { %v8475_v12 = vpop.f32.mrb[13].mxu1 }
 0x28e   : > { %v8477_v61 = vpop.f32.mrb[14].mxu1 }
 0x28f   : > { %v8479_v63 = vpop.f32.mrb[15].mxu1 }
 0x294   : > { %v8481_v22 = vpop.f32.mrb[16].mxu1 }
 0x295   : > { %v8483_v28 = vpop.f32.mrb[17].mxu1 }
 0x296   : > { %v8485_v52 = vpop.f32.mrb[18].mxu1 }
 0x297   : > { %v8487_v60 = vpop.f32.mrb[19].mxu1 }
 0x29c   : > { %v8489_v25 = vpop.f32.mrb[20].mxu1 }
 0x29d   : > { %v8491_v31 = vpop.f32.mrb[21].mxu1 }
 0x29e   : > { %v8493_v59 = vpop.f32.mrb[22].mxu1 }
 0x29f   : > { %v8495_v1 = vpop.f32.mrb[23].mxu1 }
 0x2a4   : > { %v8497_v33 = vpop.f32.mrb[24].mxu1 }
 0x2a5   : > { %v8499_v37 = vpop.f32.mrb[25].mxu1 }
 0x2a6   : > { %v8501_v53 = vpop.f32.mrb[26].mxu1 }
 0x2a7   : > { %v8503_v0 = vpop.f32.mrb[27].mxu1 }
 0x2ac   : > { %v8505_v47 = vpop.f32.mrb[28].mxu1 }
 0x2ad   : > { %v8507_v13 = vpop.f32.mrb[29].mxu1 }
 0x2ae   : > { %v8509_v23 = vpop.f32.mrb[30].mxu1 }
 0x2af   : > { %v8511_v11 = vpop.f32.mrb[31].mxu1 }
 0x2b7   : > { %v5240_v15 = vpop.f32.mrb[0].mxu0 }
 0x2b8   : > { %v8524_v54 = vadd.f32 %v5240_v15, %v2045_v39  ;;  %v5242_v27 = vpop.f32.mrb[1].mxu0 }
 0x2b9   : > { %v6451_v2 = vadd.f32 %v5242_v27, %v2047_v40  ;;  %v5244_v58 = vpop.f32.mrb[2].mxu0 }
 0x2ba   : > { %v8526_v3 = vadd.f32 %v5244_v58, %v2049_v42  ;;  %v5246_v7 = vpop.f32.mrb[3].mxu0 }
 0x2bb   : > { %v5476_v8 = vadd.f32 %v6451_v2, %v8522_v19  ;;  %v6453_v10 = vadd.f32 %v5246_v7, %v2051_v41 }
 0x2bd   : > { %v5539_v16 = vsub.f32 0.0, %v5476_v8  ;;  %v5478_v17 = vadd.f32 %v6453_v10, %v8522_v19 }
 0x2bf   : > { %v5571_v62 = vmul.f32 1.442695, %v5539_v16  ;;  %v5540_v9 = vsub.f32 0.0, %v5478_v17  ;;  %v5250_v18 = vpop.f32.mrb[4].mxu0 }
 0x2c0   : > { %v8530_v6 = vadd.f32 %v5250_v18, %v2055_v43  ;;  %v5252_v14 = vpop.f32.mrb[5].mxu0 }
 0x2c1   : > { %7020 = vpow2.f32 %v5571_v62  ;;  %v5573_v21 = vmul.f32 1.442695, %v5540_v9  ;;  %v6455_v24 = vadd.f32 %v5252_v14, %v2057_v44  ;;  %v5254_v26 = vpop.f32.mrb[6].mxu0 }
 0x2c2   : > { %v8532_v5 = vadd.f32 %v5254_v26, %v2059_v45  ;;  %v5256_v20 = vpop.f32.mrb[7].mxu0 }
 0x2c3   : > { %7022 = vpow2.f32 %v5573_v21  ;;  %v5480_v29 = vadd.f32 %v6455_v24, %v8522_v19  ;;  %v6457_v32 = vadd.f32 %v5256_v20, %v2061_v4 }
 0x2c5   : > { %v5541_v34 = vsub.f32 0.0, %v5480_v29  ;;  %v5482_v36 = vadd.f32 %v6457_v32, %v8522_v19 }
 0x2c7   : > { %v5575_v35 = vmul.f32 1.442695, %v5541_v34  ;;  %v5542_v38 = vsub.f32 0.0, %v5482_v36  ;;  %v5260_v39 = vpop.f32.mrb[8].mxu0 }
 0x2c8   : > { %v8536_v40 = vadd.f32 %v5260_v39, %v2065_v46  ;;  %v5262_v42 = vpop.f32.mrb[9].mxu0 }
 0x2c9   : > { %7024 = vpow2.f32 %v5575_v35  ;;  %v5577_v41 = vmul.f32 1.442695, %v5542_v38  ;;  %v6459_v43 = vadd.f32 %v5262_v42, %v2067_v49  ;;  %v5264_v44 = vpop.f32.mrb[10].mxu0  ;;  %v5467_v49 = vsub.s32 0, %v8513_v48 }
 0x2ca   : > { %v8539_v45 = vadd.f32 %v5264_v44, %v8469_v56  ;;  %v5266_v30 = vpop.f32.mrb[11].mxu0 }
 0x2cb   : > { %v7021_v50 = vpop.eup %7020  ;;  %7026 = vpow2.f32 %v5577_v41  ;;  %v5484_v4 = vadd.f32 %v6459_v43, %v8522_v19  ;;  %v6461_v15 = vadd.f32 %v5266_v30, %v8471_v55  ;;  %v8553_v48 = vrot.slane %v8519_v51, %v5467_v49 }
 0x2cc   : > { %v5635_v27 = vadd.f32 1.0, %v7021_v50 }
 0x2cd   : > { %v7023_v2 = vpop.eup %7022  ;;  %v5543_v58 = vsub.f32 0.0, %v5484_v4  ;;  %v5486_v46 = vadd.f32 %v6461_v15, %v8522_v19 }
 0x2ce   : > { %7028 = vrcp.f32 %v5635_v27  ;;  %v5636_v7 = vadd.f32 1.0, %v7023_v2 }
 0x2cf   : > { %v5579_v8 = vmul.f32 1.442695, %v5543_v58  ;;  %v5544_v10 = vsub.f32 0.0, %v5486_v46  ;;  %v5270_v56 = vpop.f32.mrb[12].mxu0  ;;  %v5479_v46 = vadd.f32 %v8530_v6, %v8553_v48 }
 0x2d0   : > { %7030 = vrcp.f32 %v5636_v7  ;;  %v8546_v16 = vadd.f32 %v5270_v56, %v8473_v57  ;;  %v5272_v17 = vpop.f32.mrb[13].mxu0 }
 0x2d1   : > { %7032 = vpow2.f32 %v5579_v8  ;;  %v5581_v55 = vmul.f32 1.442695, %v5544_v10  ;;  %v6463_v62 = vadd.f32 %v5272_v17, %v8475_v12  ;;  %v5274_v9 = vpop.f32.mrb[14].mxu0 }
 0x2d2   : > { %v8550_v18 = vadd.f32 %v5274_v9, %v8477_v61  ;;  %v5276_v14 = vpop.f32.mrb[15].mxu0  ;;  %v5475_v61 = vadd.f32 %v8524_v54, %v8553_v48 }
 0x2d3   : > { %v7025_v21 = vpop.eup %7024  ;;  %7034 = vpow2.f32 %v5581_v55  ;;  %v5488_v24 = vadd.f32 %v6463_v62, %v8522_v19  ;;  %v6465_v57 = vadd.f32 %v5276_v14, %v8479_v63  ;;  %v5477_v63 = vadd.f32 %v8526_v3, %v8553_v48 }
 0x2d4   : > { %v5637_v26 = vadd.f32 1.0, %v7025_v21 }
 0x2d5   : > { %v7027_v20 = vpop.eup %7026  ;;  %v5545_v29 = vsub.f32 0.0, %v5488_v24  ;;  %v5490_v12 = vadd.f32 %v6465_v57, %v8522_v19 }
 0x2d6   : > { %7036 = vrcp.f32 %v5637_v26  ;;  %v5638_v32 = vadd.f32 1.0, %v7027_v20 }
 0x2d7   : > { %v5583_v34 = vmul.f32 1.442695, %v5545_v29  ;;  %v5546_v36 = vsub.f32 0.0, %v5490_v12  ;;  %v5280_v51 = vpop.f32.mrb[16].mxu0 }
 0x2d8   : > { %v7029_v35 = vpop.eup %7028  ;;  %7038 = vrcp.f32 %v5638_v32  ;;  %v8569_v38 = vadd.f32 %v5280_v51, %v8481_v22  ;;  %v5282_v39 = vpop.f32.mrb[17].mxu0  ;;  %v5483_v32 = vadd.f32 %v8536_v40, %v8553_v48 }
 0x2d9   : > { %v5699_v54 = vmul.f32 %v7029_v35, %v5475_v61  ;;  %7040 = vpow2.f32 %v5583_v34  ;;  %v5585_v42 = vmul.f32 1.442695, %v5546_v36  ;;  %v6467_v41 = vadd.f32 %v5282_v39, %v8483_v28  ;;  %v5284_v43 = vpop.f32.mrb[18].mxu0 }
 0x2da   : > { %v7031_v44 = vpop.eup %7030  ;;  %v8573_v30 = vadd.f32 %v5284_v43, %v8485_v52  ;;  %v5286_v50 = vpop.f32.mrb[19].mxu0 }
 0x2db   : > { %v7033_v4 = vpop.eup %7032  ;;  %5732 = vst.msk [vmem:[%s8564_s16] sm:$0xff] %vm5731_vm8, %v5699_v54  ;;  %v5700_v3 = vmul.f32 %v7031_v44, %v5477_v63  ;;  %7042 = vpow2.f32 %v5585_v42  ;;  %v5492_v22 = vadd.f32 %v6467_v41, %v8522_v19  ;;  %v6469_v15 = vadd.f32 %v5286_v50, %v8487_v60 }
 0x2dc   : > { %v5639_v27 = vadd.f32 1.0, %v7033_v4  ;;  %v5481_v60 = vadd.f32 %v8532_v5, %v8553_v48 }
 0x2dd   : > { %v7035_v2 = vpop.eup %7034  ;;  %5733 = vst.msk [vmem:[%s8564_s16 + $0x8] sm:$0xff] %vm5731_vm8, %v5700_v3  ;;  %v5547_v28 = vsub.f32 0.0, %v5492_v22  ;;  %v5494_v58 = vadd.f32 %v6469_v15, %v8522_v19 }
 0x2de   : > { %7044 = vrcp.f32 %v5639_v27  ;;  %v5640_v52 = vadd.f32 1.0, %v7035_v2  ;;  %v5487_v27 = vadd.f32 %v8546_v16, %v8553_v48 }
 0x2df   : > { %v5587_v7 = vmul.f32 1.442695, %v5547_v28  ;;  %v5548_v49 = vsub.f32 0.0, %v5494_v58  ;;  %v5290_v8 = vpop.f32.mrb[20].mxu0 }
 0x2e0   : > { %v7037_v10 = vpop.eup %7036  ;;  %7046 = vrcp.f32 %v5640_v52  ;;  %v8587_v56 = vadd.f32 %v5290_v8, %v8489_v25  ;;  %v5292_v17 = vpop.f32.mrb[21].mxu0 }
 0x2e1   : > { %v5701_v55 = vmul.f32 %v7037_v10, %v5479_v46  ;;  %7048 = vpow2.f32 %v5587_v7  ;;  %v5589_v62 = vmul.f32 1.442695, %v5548_v49  ;;  %v6471_v9 = vadd.f32 %v5292_v17, %v8491_v31  ;;  %v5294_v6 = vpop.f32.mrb[22].mxu0 }
 0x2e2   : > { %v7039_v14 = vpop.eup %7038  ;;  %v8591_v21 = vadd.f32 %v5294_v6, %v8493_v59  ;;  %v5296_v24 = vpop.f32.mrb[23].mxu0 }
 0x2e3   : > { %v7041_v57 = vpop.eup %7040  ;;  %5734 = vst.msk [vmem:[%s8564_s16 + $0x10] sm:$0xff] %vm5731_vm8, %v5701_v55  ;;  %v5702_v5 = vmul.f32 %v7039_v14, %v5481_v60  ;;  %7050 = vpow2.f32 %v5589_v62  ;;  %v5496_v25 = vadd.f32 %v6471_v9, %v8522_v19  ;;  %v6473_v26 = vadd.f32 %v5296_v24, %v8495_v1 }
 0x2e4   : > { %v5641_v20 = vadd.f32 1.0, %v7041_v57  ;;  %v5485_v1 = vadd.f32 %v8539_v45, %v8553_v48 }
 0x2e5   : > { %v7043_v29 = vpop.eup %7042  ;;  %5735 = vst.msk [vmem:[%s8564_s16 + $0x18] sm:$0xff] %vm5731_vm8, %v5702_v5  ;;  %v5549_v31 = vsub.f32 0.0, %v5496_v25  ;;  %v5498_v12 = vadd.f32 %v6473_v26, %v8522_v19  ;;  %v5491_v26 = vadd.f32 %v8569_v38, %v8553_v48 }
 0x2e6   : > { %7052 = vrcp.f32 %v5641_v20  ;;  %v5642_v59 = vadd.f32 1.0, %v7043_v29 }
 0x2e7   : > { %v5591_v61 = vmul.f32 1.442695, %v5549_v31  ;;  %v5550_v34 = vsub.f32 0.0, %v5498_v12  ;;  %v5300_v36 = vpop.f32.mrb[24].mxu0 }
 0x2e8   : > { %v7045_v51 = vpop.eup %7044  ;;  %7054 = vrcp.f32 %v5642_v59  ;;  %v8605_v35 = vadd.f32 %v5300_v36, %v8497_v33  ;;  %v5302_v63 = vpop.f32.mrb[25].mxu0  ;;  %v5493_v59 = vadd.f32 %v8573_v30, %v8553_v48 }
 0x2e9   : > { %v5703_v39 = vmul.f32 %v7045_v51, %v5483_v32  ;;  %7056 = vpow2.f32 %v5591_v61  ;;  %v5593_v54 = vmul.f32 1.442695, %v5550_v34  ;;  %v6475_v42 = vadd.f32 %v5302_v63, %v8499_v37  ;;  %v5304_v40 = vpop.f32.mrb[26].mxu0 }
 0x2ea   : > { %v7047_v41 = vpop.eup %7046  ;;  %v8609_v43 = vadd.f32 %v5304_v40, %v8501_v53  ;;  %v5306_v44 = vpop.f32.mrb[27].mxu0 }
 0x2eb   : > { %v7049_v50 = vpop.eup %7048  ;;  %5736 = vst.msk [vmem:[%s8564_s16 + $0x20] sm:$0xff] %vm5731_vm8, %v5703_v39  ;;  %v5704_v45 = vmul.f32 %v7047_v41, %v5485_v1  ;;  %7058 = vpow2.f32 %v5593_v54  ;;  %v5500_v33 = vadd.f32 %v6475_v42, %v8522_v19  ;;  %v6477_v4 = vadd.f32 %v5306_v44, %v8503_v0 }
 0x2ec   : > { %v5643_v3 = vadd.f32 1.0, %v7049_v50  ;;  %v5489_v0 = vadd.f32 %v8550_v18, %v8553_v48 }
 0x2ed   : > { %v7051_v22 = vpop.eup %7050  ;;  %5737 = vst.msk [vmem:[%s8564_s16 + $0x28] sm:$0xff] %vm5731_vm8, %v5704_v45  ;;  %v5551_v37 = vsub.f32 0.0, %v5500_v33  ;;  %v5502_v15 = vadd.f32 %v6477_v4, %v8522_v19 }
 0x2ee   : > { %7060 = vrcp.f32 %v5643_v3  ;;  %v5644_v53 = vadd.f32 1.0, %v7051_v22 }
 0x2ef   : > { %v5595_v2 = vmul.f32 1.442695, %v5551_v37  ;;  %v5552_v28 = vsub.f32 0.0, %v5502_v15  ;;  %v5310_v58 = vpop.f32.mrb[28].mxu0  ;;  %v5495_v37 = vadd.f32 %v8587_v56, %v8553_v48 }
 0x2f0   : > { %v7053_v52 = vpop.eup %7052  ;;  %7062 = vrcp.f32 %v5644_v53  ;;  %v8623_v46 = vadd.f32 %v5310_v58, %v8505_v47  ;;  %v5312_v7 = vpop.f32.mrb[29].mxu0  ;;  %v5497_v58 = vadd.f32 %v8591_v21, %v8553_v48 }
 0x2f1   : > { %v5705_v49 = vmul.f32 %v7053_v52, %v5487_v27  ;;  %7064 = vpow2.f32 %v5595_v2  ;;  %v5597_v8 = vmul.f32 1.442695, %v5552_v28  ;;  %v6479_v10 = vadd.f32 %v5312_v7, %v8507_v13  ;;  %v5314_v16 = vpop.f32.mrb[30].mxu0 }
 0x2f2   : > { %v7055_v60 = vpop.eup %7054  ;;  %v8627_v17 = vadd.f32 %v5314_v16, %v8509_v23  ;;  %v5316_v55 = vpop.f32.mrb[31].mxu0 }
 0x2f3   : > { %v7057_v62 = vpop.eup %7056  ;;  %5738 = vst.msk [vmem:[%s8564_s16 + $0x30] sm:$0xff] %vm5731_vm8, %v5705_v49  ;;  %v5706_v18 = vmul.f32 %v7055_v60, %v5489_v0  ;;  %7066 = vpow2.f32 %v5597_v8  ;;  %v5504_v47 = vadd.f32 %v6479_v10, %v8522_v19  ;;  %v6481_v9 = vadd.f32 %v5316_v55, %v8511_v11 }
 0x2f4   : > { %v5645_v6 = vadd.f32 1.0, %v7057_v62  ;;  %v2927_v14 = vpop.f32.mrb[32].mxu1 }
 0x2f5   : > { %v7059_v24 = vpop.eup %7058  ;;  %5739 = vst.msk [vmem:[%s8564_s16 + $0x38] sm:$0xff] %vm5731_vm8, %v5706_v18  ;;  %v5553_v13 = vsub.f32 0.0, %v5504_v47  ;;  %v5506_v57 = vadd.f32 %v6481_v9, %v8522_v19  ;;  %v2929_v23 = vpop.f32.mrb[33].mxu1 }
 0x2f6   : > { %7068 = vrcp.f32 %v5645_v6  ;;  %v5646_v5 = vadd.f32 1.0, %v7059_v24  ;;  %v2931_v25 = vpop.f32.mrb[34].mxu1 }
 0x2f7   : > { %v5599_v20 = vmul.f32 1.442695, %v5553_v13  ;;  %v5554_v29 = vsub.f32 0.0, %v5506_v57  ;;  %v5320_v31 = vpop.f32.mrb[32].mxu0  ;;  %v2933_v11 = vpop.f32.mrb[35].mxu1 }
 0x2f8   : > { %v7061_v12 = vpop.eup %7060  ;;  %7070 = vrcp.f32 %v5646_v5  ;;  %v8640_v32 = vadd.f32 %v5320_v31, %v2927_v14  ;;  %v5322_v61 = vpop.f32.mrb[33].mxu0  ;;  %v5499_v5 = vadd.f32 %v8605_v35, %v8553_v48 }
 0x2f9   : > { %v5707_v34 = vmul.f32 %v7061_v12, %v5491_v26  ;;  %7072 = vpow2.f32 %v5599_v20  ;;  %v5601_v36 = vmul.f32 1.442695, %v5554_v29  ;;  %v6483_v51 = vadd.f32 %v5322_v61, %v2929_v23  ;;  %v5324_v1 = vpop.f32.mrb[34].mxu0 }
 0x2fa   : > { %v7063_v38 = vpop.eup %7062  ;;  %v8642_v63 = vadd.f32 %v5324_v1, %v2931_v25  ;;  %v5326_v39 = vpop.f32.mrb[35].mxu0 }
 0x2fb   : > { %v7065_v54 = vpop.eup %7064  ;;  %5740 = vst.msk [vmem:[%s8564_s16 + $0x40] sm:$0xff] %vm5731_vm8, %v5707_v34  ;;  %v5708_v42 = vmul.f32 %v7063_v38, %v5493_v59  ;;  %7074 = vpow2.f32 %v5601_v36  ;;  %v5508_v30 = vadd.f32 %v6483_v51, %v8522_v19  ;;  %v6485_v40 = vadd.f32 %v5326_v39, %v2933_v11 }
 0x2fc   : > { %v5647_v41 = vadd.f32 1.0, %v7065_v54  ;;  %v2937_v44 = vpop.f32.mrb[36].mxu1  ;;  %v5501_v11 = vadd.f32 %v8609_v43, %v8553_v48 }
 0x2fd   : > { %v7067_v50 = vpop.eup %7066  ;;  %5741 = vst.msk [vmem:[%s8564_s16 + $0x48] sm:$0xff] %vm5731_vm8, %v5708_v42  ;;  %v5555_v45 = vsub.f32 0.0, %v5508_v30  ;;  %v5510_v33 = vadd.f32 %v6485_v40, %v8522_v19  ;;  %v2939_v4 = vpop.f32.mrb[37].mxu1 }
 0x2fe   : > { %7076 = vrcp.f32 %v5647_v41  ;;  %v5648_v3 = vadd.f32 1.0, %v7067_v50  ;;  %v2941_v22 = vpop.f32.mrb[38].mxu1 }
 0x2ff   : > { %v5603_v15 = vmul.f32 1.442695, %v5555_v45  ;;  %v5556_v53 = vsub.f32 0.0, %v5510_v33  ;;  %v5330_v27 = vpop.f32.mrb[36].mxu0  ;;  %v2943_v2 = vpop.f32.mrb[39].mxu1 }
 0x300   : > { %v7069_v28 = vpop.eup %7068  ;;  %7078 = vrcp.f32 %v5648_v3  ;;  %v8654_v52 = vadd.f32 %v5330_v27, %v2937_v44  ;;  %v5332_v0 = vpop.f32.mrb[37].mxu0  ;;  %v5503_v3 = vadd.f32 %v8623_v46, %v8553_v48 }
 0x301   : > { %v5709_v7 = vmul.f32 %v7069_v28, %v5495_v37  ;;  %7080 = vpow2.f32 %v5603_v15  ;;  %v5605_v49 = vmul.f32 1.442695, %v5556_v53  ;;  %v6487_v8 = vadd.f32 %v5332_v0, %v2939_v4  ;;  %v5334_v10 = vpop.f32.mrb[38].mxu0 }
 0x302   : > { %v7071_v56 = vpop.eup %7070  ;;  %v8656_v16 = vadd.f32 %v5334_v10, %v2941_v22  ;;  %v5336_v60 = vpop.f32.mrb[39].mxu0 }
 0x303   : > { %v7073_v55 = vpop.eup %7072  ;;  %5742 = vst.msk [vmem:[%s8564_s16 + $0x50] sm:$0xff] %vm5731_vm8, %v5709_v7  ;;  %v5710_v62 = vmul.f32 %v7071_v56, %v5497_v58  ;;  %7082 = vpow2.f32 %v5605_v49  ;;  %v5512_v21 = vadd.f32 %v6487_v8, %v8522_v19  ;;  %v6489_v18 = vadd.f32 %v5336_v60, %v2943_v2 }
 0x304   : > { %v5649_v47 = vadd.f32 1.0, %v7073_v55  ;;  %v2947_v9 = vpop.f32.mrb[40].mxu1  ;;  %v5505_v2 = vadd.f32 %v8627_v17, %v8553_v48 }
 0x305   : > { %v7075_v6 = vpop.eup %7074  ;;  %5743 = vst.msk [vmem:[%s8564_s16 + $0x58] sm:$0xff] %vm5731_vm8, %v5710_v62  ;;  %v5557_v14 = vsub.f32 0.0, %v5512_v21  ;;  %v5514_v24 = vadd.f32 %v6489_v18, %v8522_v19  ;;  %v2949_v13 = vpop.f32.mrb[41].mxu1 }
 0x306   : > { %7084 = vrcp.f32 %v5649_v47  ;;  %v5650_v57 = vadd.f32 1.0, %v7075_v6  ;;  %v2951_v23 = vpop.f32.mrb[42].mxu1 }
 0x307   : > { %v5607_v25 = vmul.f32 1.442695, %v5557_v14  ;;  %v5558_v26 = vsub.f32 0.0, %v5514_v24  ;;  %v5340_v20 = vpop.f32.mrb[40].mxu0  ;;  %v2953_v29 = vpop.f32.mrb[43].mxu1 }
 0x308   : > { %v7077_v31 = vpop.eup %7076  ;;  %7086 = vrcp.f32 %v5650_v57  ;;  %v8668_v12 = vadd.f32 %v5340_v20, %v2947_v9  ;;  %v5342_v59 = vpop.f32.mrb[41].mxu0  ;;  %v5507_v57 = vadd.f32 %v8640_v32, %v8553_v48 }
 0x309   : > { %v5711_v61 = vmul.f32 %v7077_v31, %v5499_v5  ;;  %7088 = vpow2.f32 %v5607_v25  ;;  %v5609_v34 = vmul.f32 1.442695, %v5558_v26  ;;  %v6491_v36 = vadd.f32 %v5342_v59, %v2949_v13  ;;  %v5344_v51 = vpop.f32.mrb[42].mxu0 }
 0x30a   : > { %v7079_v35 = vpop.eup %7078  ;;  %v8670_v1 = vadd.f32 %v5344_v51, %v2951_v23  ;;  %v5346_v38 = vpop.f32.mrb[43].mxu0 }
 0x30b   : > { %v7081_v39 = vpop.eup %7080  ;;  %5744 = vst.msk [vmem:[%s8564_s16 + $0x60] sm:$0xff] %vm5731_vm8, %v5711_v61  ;;  %v5712_v54 = vmul.f32 %v7079_v35, %v5501_v11  ;;  %7090 = vpow2.f32 %v5609_v34  ;;  %v5516_v43 = vadd.f32 %v6491_v36, %v8522_v19  ;;  %v6493_v42 = vadd.f32 %v5346_v38, %v2953_v29 }
 0x30c   : > { %v5651_v30 = vadd.f32 1.0, %v7081_v39  ;;  %v2957_v40 = vpop.f32.mrb[44].mxu1  ;;  %v5509_v29 = vadd.f32 %v8642_v63, %v8553_v48 }
 0x30d   : > { %v7083_v41 = vpop.eup %7082  ;;  %5745 = vst.msk [vmem:[%s8564_s16 + $0x68] sm:$0xff] %vm5731_vm8, %v5712_v54  ;;  %v5559_v44 = vsub.f32 0.0, %v5516_v43  ;;  %v5518_v50 = vadd.f32 %v6493_v42, %v8522_v19  ;;  %v2959_v45 = vpop.f32.mrb[45].mxu1 }
 0x30e   : > { %7092 = vrcp.f32 %v5651_v30  ;;  %v5652_v33 = vadd.f32 1.0, %v7083_v41  ;;  %v2961_v4 = vpop.f32.mrb[46].mxu1 }
 0x30f   : > { %v5611_v22 = vmul.f32 1.442695, %v5559_v44  ;;  %v5560_v37 = vsub.f32 0.0, %v5518_v50  ;;  %v5350_v15 = vpop.f32.mrb[44].mxu0  ;;  %v2963_v53 = vpop.f32.mrb[47].mxu1 }
 0x310   : > { %v7085_v27 = vpop.eup %7084  ;;  %7094 = vrcp.f32 %v5652_v33  ;;  %v8682_v28 = vadd.f32 %v5350_v15, %v2957_v40  ;;  %v5352_v58 = vpop.f32.mrb[45].mxu0  ;;  %v5511_v33 = vadd.f32 %v8654_v52, %v8553_v48 }
 0x311   : > { %v5713_v0 = vmul.f32 %v7085_v27, %v5503_v3  ;;  %7096 = vpow2.f32 %v5611_v22  ;;  %v5613_v7 = vmul.f32 1.442695, %v5560_v37  ;;  %v6495_v49 = vadd.f32 %v5352_v58, %v2959_v45  ;;  %v5354_v8 = vpop.f32.mrb[46].mxu0 }
 0x312   : > { %v7087_v46 = vpop.eup %7086  ;;  %v8684_v10 = vadd.f32 %v5354_v8, %v2961_v4  ;;  %v5356_v56 = vpop.f32.mrb[47].mxu0 }
 0x313   : > { %v7089_v60 = vpop.eup %7088  ;;  %5746 = vst.msk [vmem:[%s8564_s16 + $0x70] sm:$0xff] %vm5731_vm8, %v5713_v0  ;;  %v5714_v55 = vmul.f32 %v7087_v46, %v5505_v2  ;;  %7098 = vpow2.f32 %v5613_v7  ;;  %v5520_v17 = vadd.f32 %v6495_v49, %v8522_v19  ;;  %v6497_v62 = vadd.f32 %v5356_v56, %v2963_v53 }
 0x314   : > { %v5653_v21 = vadd.f32 1.0, %v7089_v60  ;;  %v2967_v18 = vpop.f32.mrb[48].mxu1  ;;  %v5513_v53 = vadd.f32 %v8656_v16, %v8553_v48 }
 0x315   : > { %v7091_v47 = vpop.eup %7090  ;;  %5747 = vst.msk [vmem:[%s8564_s16 + $0x78] sm:$0xff] %vm5731_vm8, %v5714_v55  ;;  %v5561_v9 = vsub.f32 0.0, %v5520_v17  ;;  %v5522_v6 = vadd.f32 %v6497_v62, %v8522_v19  ;;  %v2969_v14 = vpop.f32.mrb[49].mxu1 }
 0x316   : > { %7100 = vrcp.f32 %v5653_v21  ;;  %v5654_v24 = vadd.f32 1.0, %v7091_v47  ;;  %v2971_v13 = vpop.f32.mrb[50].mxu1 }
 0x317   : > { %v5615_v23 = vmul.f32 1.442695, %v5561_v9  ;;  %v5562_v5 = vsub.f32 0.0, %v5522_v6  ;;  %v5360_v25 = vpop.f32.mrb[48].mxu0  ;;  %v2973_v26 = vpop.f32.mrb[51].mxu1 }
 0x318   : > { %v7093_v20 = vpop.eup %7092  ;;  %7102 = vrcp.f32 %v5654_v24  ;;  %v8696_v31 = vadd.f32 %v5360_v25, %v2967_v18  ;;  %v5362_v11 = vpop.f32.mrb[49].mxu0  ;;  %v5515_v24 = vadd.f32 %v8668_v12, %v8553_v48 }
 0x319   : > { %v5715_v59 = vmul.f32 %v7093_v20, %v5507_v57  ;;  %7104 = vpow2.f32 %v5615_v23  ;;  %v5617_v61 = vmul.f32 1.442695, %v5562_v5  ;;  %v6499_v34 = vadd.f32 %v5362_v11, %v2969_v14  ;;  %v5364_v36 = vpop.f32.mrb[50].mxu0 }
 0x31a   : > { %v7095_v32 = vpop.eup %7094  ;;  %v8698_v51 = vadd.f32 %v5364_v36, %v2971_v13  ;;  %v5366_v35 = vpop.f32.mrb[51].mxu0 }
 0x31b   : > { %v7097_v38 = vpop.eup %7096  ;;  %5748 = vst.msk [vmem:[%s8564_s16 + $0x80] sm:$0xff] %vm5731_vm8, %v5715_v59  ;;  %v5716_v39 = vmul.f32 %v7095_v32, %v5509_v29  ;;  %7106 = vpow2.f32 %v5617_v61  ;;  %v5524_v63 = vadd.f32 %v6499_v34, %v8522_v19  ;;  %v6501_v54 = vadd.f32 %v5366_v35, %v2973_v26 }
 0x31c   : > { %v5655_v43 = vadd.f32 1.0, %v7097_v38  ;;  %v2977_v42 = vpop.f32.mrb[52].mxu1  ;;  %v5517_v26 = vadd.f32 %v8670_v1, %v8553_v48 }
 0x31d   : > { %v7099_v30 = vpop.eup %7098  ;;  %5749 = vst.msk [vmem:[%s8564_s16 + $0x88] sm:$0xff] %vm5731_vm8, %v5716_v39  ;;  %v5563_v40 = vsub.f32 0.0, %v5524_v63  ;;  %v5526_v41 = vadd.f32 %v6501_v54, %v8522_v19  ;;  %v2979_v44 = vpop.f32.mrb[53].mxu1 }
 0x31e   : > { %7108 = vrcp.f32 %v5655_v43  ;;  %v5656_v50 = vadd.f32 1.0, %v7099_v30  ;;  %v2981_v45 = vpop.f32.mrb[54].mxu1 }
 0x31f   : > { %v5619_v4 = vmul.f32 1.442695, %v5563_v40  ;;  %v5564_v3 = vsub.f32 0.0, %v5526_v41  ;;  %v5370_v22 = vpop.f32.mrb[52].mxu0  ;;  %v2983_v37 = vpop.f32.mrb[55].mxu1 }
 0x320   : > { %v7101_v15 = vpop.eup %7100  ;;  %7110 = vrcp.f32 %v5656_v50  ;;  %v8710_v27 = vadd.f32 %v5370_v22, %v2977_v42  ;;  %v5372_v2 = vpop.f32.mrb[53].mxu0  ;;  %v5519_v50 = vadd.f32 %v8682_v28, %v8553_v48 }
 0x321   : > { %v5717_v58 = vmul.f32 %v7101_v15, %v5511_v33  ;;  %7112 = vpow2.f32 %v5619_v4  ;;  %v5621_v0 = vmul.f32 1.442695, %v5564_v3  ;;  %v6503_v7 = vadd.f32 %v5372_v2, %v2979_v44  ;;  %v5374_v49 = vpop.f32.mrb[54].mxu0 }
 0x322   : > { %v7103_v52 = vpop.eup %7102  ;;  %v8712_v8 = vadd.f32 %v5374_v49, %v2981_v45  ;;  %v5376_v46 = vpop.f32.mrb[55].mxu0 }
 0x323   : > { %v7105_v56 = vpop.eup %7104  ;;  %5750 = vst.msk [vmem:[%s8564_s16 + $0x90] sm:$0xff] %vm5731_vm8, %v5717_v58  ;;  %v5718_v60 = vmul.f32 %v7103_v52, %v5513_v53  ;;  %7114 = vpow2.f32 %v5621_v0  ;;  %v5528_v16 = vadd.f32 %v6503_v7, %v8522_v19  ;;  %v6505_v55 = vadd.f32 %v5376_v46, %v2983_v37 }
 0x324   : > { %v5657_v17 = vadd.f32 1.0, %v7105_v56  ;;  %v2987_v62 = vpop.f32.mrb[56].mxu1  ;;  %v5521_v37 = vadd.f32 %v8684_v10, %v8553_v48 }
 0x325   : > { %v7107_v21 = vpop.eup %7106  ;;  %5751 = vst.msk [vmem:[%s8564_s16 + $0x98] sm:$0xff] %vm5731_vm8, %v5718_v60  ;;  %v5565_v18 = vsub.f32 0.0, %v5528_v16  ;;  %v5530_v47 = vadd.f32 %v6505_v55, %v8522_v19  ;;  %v2989_v9 = vpop.f32.mrb[57].mxu1 }
 0x326   : > { %7116 = vrcp.f32 %v5657_v17  ;;  %v5658_v6 = vadd.f32 1.0, %v7107_v21  ;;  %v2991_v14 = vpop.f32.mrb[58].mxu1 }
 0x327   : > { %v5623_v13 = vmul.f32 1.442695, %v5565_v18  ;;  %v5566_v57 = vsub.f32 0.0, %v5530_v47  ;;  %v5380_v23 = vpop.f32.mrb[56].mxu0  ;;  %v2993_v5 = vpop.f32.mrb[59].mxu1  ;;  %v5523_v18 = vadd.f32 %v8696_v31, %v8553_v48 }
 0x328   : > { %v7109_v25 = vpop.eup %7108  ;;  %7118 = vrcp.f32 %v5658_v6  ;;  %v8724_v20 = vadd.f32 %v5380_v23, %v2987_v62  ;;  %v5382_v29 = vpop.f32.mrb[57].mxu0 }
 0x329   : > { %v5719_v11 = vmul.f32 %v7109_v25, %v5515_v24  ;;  %7120 = vpow2.f32 %v5623_v13  ;;  %v5625_v59 = vmul.f32 1.442695, %v5566_v57  ;;  %v6507_v61 = vadd.f32 %v5382_v29, %v2989_v9  ;;  %v5384_v34 = vpop.f32.mrb[58].mxu0 }
 0x32a   : > { %v7111_v12 = vpop.eup %7110  ;;  %v8726_v36 = vadd.f32 %v5384_v34, %v2991_v14  ;;  %v5386_v32 = vpop.f32.mrb[59].mxu0  ;;  %v5525_v24 = vadd.f32 %v8698_v51, %v8553_v48 }
 0x32b   : > { %v7113_v35 = vpop.eup %7112  ;;  %5752 = vst.msk [vmem:[%s8564_s16 + $0xa0] sm:$0xff] %vm5731_vm8, %v5719_v11  ;;  %v5720_v38 = vmul.f32 %v7111_v12, %v5517_v26  ;;  %7122 = vpow2.f32 %v5625_v59  ;;  %v5532_v1 = vadd.f32 %v6507_v61, %v8522_v19  ;;  %v6509_v39 = vadd.f32 %v5386_v32, %v2993_v5 }
 0x32c   : > { %v5659_v63 = vadd.f32 1.0, %v7113_v35  ;;  %v2997_v54 = vpop.f32.mrb[60].mxu1  ;;  %v5527_v26 = vadd.f32 %v8710_v27, %v8553_v48  ;;  %v5529_v11 = vadd.f32 %v8712_v8, %v8553_v48  ;;  %v5531_v35 = vadd.f32 %v8724_v20, %v8553_v48 }
 0x32d   : > { %v7115_v43 = vpop.eup %7114  ;;  %5753 = vst.msk [vmem:[%s8564_s16 + $0xa8] sm:$0xff] %vm5731_vm8, %v5720_v38  ;;  %v5567_v42 = vsub.f32 0.0, %v5532_v1  ;;  %v5534_v30 = vadd.f32 %v6509_v39, %v8522_v19  ;;  %v2999_v40 = vpop.f32.mrb[61].mxu1  ;;  %v5533_v1 = vadd.f32 %v8726_v36, %v8553_v48 }
 0x32e   : > { %7124 = vrcp.f32 %v5659_v63  ;;  %v5660_v41 = vadd.f32 1.0, %v7115_v43  ;;  %v3001_v44 = vpop.f32.mrb[62].mxu1 }
 0x32f   : > { %v5627_v45 = vmul.f32 1.442695, %v5567_v42  ;;  %v5568_v33 = vsub.f32 0.0, %v5534_v30  ;;  %v5390_v4 = vpop.f32.mrb[60].mxu0  ;;  %v3003_v3 = vpop.f32.mrb[63].mxu1 }
 0x330   : > { %v7117_v22 = vpop.eup %7116  ;;  %7126 = vrcp.f32 %v5660_v41  ;;  %v8738_v15 = vadd.f32 %v5390_v4, %v2997_v54  ;;  %v5392_v53 = vpop.f32.mrb[61].mxu0 }
 0x331   : > { %v5721_v2 = vmul.f32 %v7117_v22, %v5519_v50  ;;  %7128 = vpow2.f32 %v5627_v45  ;;  %v5629_v58 = vmul.f32 1.442695, %v5568_v33  ;;  %v6511_v0 = vadd.f32 %v5392_v53, %v2999_v40  ;;  %v5394_v7 = vpop.f32.mrb[62].mxu0 }
 0x332   : > { %v7119_v28 = vpop.eup %7118  ;;  %v6512_v49 = vadd.f32 %v5394_v7, %v3001_v44  ;;  %v5396_v52 = vpop.f32.mrb[63].mxu0  ;;  %v5535_v54 = vadd.f32 %v8738_v15, %v8553_v48 }
 0x333   : > { %v7121_v46 = vpop.eup %7120  ;;  %5754 = vst.msk [vmem:[%s8564_s16 + $0xb0] sm:$0xff] %vm5731_vm8, %v5721_v2  ;;  %v5722_v56 = vmul.f32 %v7119_v28, %v5521_v37  ;;  %7130 = vpow2.f32 %v5629_v58  ;;  %v5536_v10 = vadd.f32 %v6511_v0, %v8522_v19  ;;  %v6513_v60 = vadd.f32 %v5396_v52, %v3003_v3 }
 0x334   : > { %v5661_v16 = vadd.f32 1.0, %v7121_v46  ;;  %v5537_v20 = vadd.f32 %v6512_v49, %v8553_v48 }
 0x335   : > { %v7123_v55 = vpop.eup %7122  ;;  %5755 = vst.msk [vmem:[%s8564_s16 + $0xb8] sm:$0xff] %vm5731_vm8, %v5722_v56  ;;  %v5569_v17 = vsub.f32 0.0, %v5536_v10  ;;  %v5538_v62 = vadd.f32 %v6513_v60, %v8522_v19 }
 0x336   : > { %7132 = vrcp.f32 %v5661_v16  ;;  %v5662_v21 = vadd.f32 1.0, %v7123_v55 }
 0x337   : > { %v5631_v47 = vmul.f32 1.442695, %v5569_v17  ;;  %v5570_v9 = vsub.f32 0.0, %v5538_v62 }
 0x338   : > { %v7125_v6 = vpop.eup %7124  ;;  %7134 = vrcp.f32 %v5662_v21 }
 0x339   : > { %v5723_v14 = vmul.f32 %v7125_v6, %v5523_v18  ;;  %7136 = vpow2.f32 %v5631_v47  ;;  %v5633_v13 = vmul.f32 1.442695, %v5570_v9 }
 0x33a   : > { %v7127_v57 = vpop.eup %7126 }
 0x33b   : > { %v7129_v23 = vpop.eup %7128  ;;  %5756 = vst.msk [vmem:[%s8564_s16 + $0xc0] sm:$0xff] %vm5731_vm8, %v5723_v14  ;;  %v5724_v19 = vmul.f32 %v7127_v57, %v5525_v24  ;;  %7138 = vpow2.f32 %v5633_v13 }
 0x33c   : > { %v5663_v5 = vadd.f32 1.0, %v7129_v23 }
 0x33d   : > { %v7131_v31 = vpop.eup %7130  ;;  %5757 = vst.msk [vmem:[%s8564_s16 + $0xc8] sm:$0xff] %vm5731_vm8, %v5724_v19 }
 0x33e   : > { %7140 = vrcp.f32 %v5663_v5  ;;  %v5664_v25 = vadd.f32 1.0, %v7131_v31 }
 0x340   : > { %v7133_v51 = vpop.eup %7132  ;;  %7142 = vrcp.f32 %v5664_v25 }
 0x341   : > { %v5725_v29 = vmul.f32 %v7133_v51, %v5527_v26 }
 0x342   : > { %v7135_v59 = vpop.eup %7134 }
 0x343   : > { %v7137_v61 = vpop.eup %7136  ;;  %5758 = vst.msk [vmem:[%s8564_s16 + $0xd0] sm:$0xff] %vm5731_vm8, %v5725_v29  ;;  %v5726_v34 = vmul.f32 %v7135_v59, %v5529_v11 }
 0x344   : > { %v5665_v12 = vadd.f32 1.0, %v7137_v61 }
 0x345   : > { %v7139_v32 = vpop.eup %7138  ;;  %5759 = vst.msk [vmem:[%s8564_s16 + $0xd8] sm:$0xff] %vm5731_vm8, %v5726_v34 }
 0x346   : > { %7144 = vrcp.f32 %v5665_v12  ;;  %v5666_v27 = vadd.f32 1.0, %v7139_v32 }
 0x348   : > { %v7141_v38 = vpop.eup %7140  ;;  %7146 = vrcp.f32 %v5666_v27 }
 0x349   : > { %v5727_v8 = vmul.f32 %v7141_v38, %v5531_v35 }
 0x34a   : > { %v7143_v39 = vpop.eup %7142 }
 0x34b   : > { %5760 = vst.msk [vmem:[%s8564_s16 + $0xe0] sm:$0xff] %vm5731_vm8, %v5727_v8  ;;  %v5728_v63 = vmul.f32 %v7143_v39, %v5533_v1 }
 0x34d   : > { %5761 = vst.msk [vmem:[%s8564_s16 + $0xe8] sm:$0xff] %vm5731_vm8, %v5728_v63 }
 0x350   : > { %v7145_v43 = vpop.eup %7144 }
 0x351   : > { %v5729_v42 = vmul.f32 %v7145_v43, %v5535_v54 }
 0x352   : > { %v7147_v30 = vpop.eup %7146 }
 0x353   : > { %5762 = vst.msk [vmem:[%s8564_s16 + $0xf0] sm:$0xff] %vm5731_vm8, %v5729_v42  ;;  %v5730_v40 = vmul.f32 %v7147_v30, %v5537_v20 }
 0x355   : > { %5763 = vst.msk [vmem:[%s8564_s16 + $0xf8] sm:$0xff] %vm5731_vm8, %v5730_v40 }
 0x356 PF: > { %s13_s12 = sadd.s32 1, %s7170_s12  }
 0x357   : > { %p10_p4 = scmp.ge.s32.totalorder %s13_s12, 4  }
 0x359   :  { %12 = sbr.rel (!%p10_p4) target bundleno = 1 (0x1), region = 72 }

</bundles_post_ra>
